<compile_context>
chip_gen: v7x
topology: tpu7x:2x2x1
jax: 0.10.0
libtpu: 0.0.40
codegen_flags: <defaults>
</compile_context>

<pallas_src>
import numpy as np
import jax
import jax.numpy as jnp
from jax.experimental import pallas as pl
from jax.experimental.pallas import tpu as pltpu

_BB = 8   # batch rows per tile (MXU LHS rows; one tile per "parallel" grid index)
_TC = 8   # timesteps per pipelined chunk


# ------------------------------ fused kernel ---------------------------------
def _tirg_text_kernel(x_ref,      # (TC*BB, Ep)  bf16  embedded tokens for chunk min(c, Ct-1)
                      wih_ref,    # (Ep, 4*Hp)   bf16  (gate order i,f,o,g; resident)
                      b_ref,      # (1, 4*Hp)    f32   b_ih + b_hh
                      whh_ref,    # (Hp, 4*Hp)   bf16  (resident)
                      len_ref,    # (BB, 1)      int32 sequence lengths for this batch tile
                      wfc_ref,    # (Hp, Op)     bf16
                      bfc_ref,    # (1, Op)      f32
                      out_ref,    # (BB, Op)     f32
                      gx_buf,     # (2, TC*BB, 4*Hp) f32   ping-pong projection scratch
                      h_sc,       # (BB, Hp)     f32
                      c_sc,       # (BB, Hp)     f32
                      f_sc):      # (BB, Hp)     f32   h at the last valid step
    c_idx = pl.program_id(1)
    n_chunks = pl.num_programs(1) - 1          # last grid step is the pipeline drain
    BB, Hp = h_sc.shape
    TCB = gx_buf.shape[1]
    TC = TCB // BB
    slot = c_idx % 2

    def project(dst_slot):
        # Hoisted input projection for one whole chunk: (TC*BB, Ep) x (Ep, 4Hp) on the MXU.
        gx_buf[dst_slot] = jnp.dot(x_ref[...], wih_ref[...],
                                   preferred_element_type=jnp.float32)

    def recur(src_slot, chunk):
        bias = b_ref[...]                                      # (1, 4Hp) f32
        lengths = len_ref[...]                                 # (BB, 1) int32
        # last valid step; length==0 wraps to the final padded step (Python neg-index style).
        last_t = jnp.where(lengths > 0, lengths - 1, n_chunks * TC - 1)
        t0 = chunk * TC
        h = h_sc[...]
        cell = c_sc[...]
        feats = f_sc[...]
        for t in range(TC):                                    # static, short: fully unrolled
            g = (gx_buf[src_slot, pl.ds(t * BB, BB), :]        # chunk projection slice
                 + jnp.dot(h.astype(whh_ref.dtype), whh_ref[...],   # stream w_hh from VMEM
                           preferred_element_type=jnp.float32)
                 + bias)                                       # bias folded per-step
            s = jax.nn.sigmoid(g[:, :3 * Hp])                  # gates reordered to [i, f, o, g]
            ig = s[:, 0 * Hp:1 * Hp]
            fg = s[:, 1 * Hp:2 * Hp]
            og = s[:, 2 * Hp:3 * Hp]
            gg = jnp.tanh(g[:, 3 * Hp:4 * Hp])
            cell = fg * cell + ig * gg
            h = og * jnp.tanh(cell)
            feats = jnp.where(last_t == (t0 + t), h, feats)    # capture h at last valid step
        h_sc[...] = h
        c_sc[...] = cell
        f_sc[...] = feats

    # Pipeline fill: reset carries for this batch tile, project chunk 0.
    @pl.when(c_idx == 0)
    def _():
        h_sc[...] = jnp.zeros_like(h_sc)
        c_sc[...] = jnp.zeros_like(c_sc)
        f_sc[...] = jnp.zeros_like(f_sc)
        project(slot)

    # Steady state: projection of chunk c and recurrence of chunk c-1 are data-independent
    # and share one basic block, so the scheduler can interleave their MXU work.
    @pl.when((c_idx > 0) & (c_idx < n_chunks))
    def _():
        project(slot)
        recur(1 - slot, c_idx - 1)

    # Drain: last chunk's recurrence + fused fc_output (Dropout is eval-mode identity).
    @pl.when(c_idx == n_chunks)
    def _():
        recur(1 - slot, c_idx - 1)
        out_ref[...] = (jnp.dot(f_sc[...].astype(wfc_ref.dtype), wfc_ref[...],
                                preferred_element_type=jnp.float32)
                        + bfc_ref[...])


@jax.jit
def _tirg_forward_device(itexts, lengths, emb, w_ih, b, w_hh, w_fc, b_fc):
    """itexts: (Tp, Bp) int32 (Tp % TC == 0, Bp % BB == 0); lengths: (Bp,) int32."""
    Tp, Bp = itexts.shape
    Ep = emb.shape[1]
    Hp = w_hh.shape[0]
    Op = w_fc.shape[1]
    Bt, Ct = Bp // _BB, Tp // _TC
    TCB = _TC * _BB

    # Embedding lookup + layout plumbing (plain-JAX glue outside the kernel):
    # (Tp, Bp, Ep) -> (Bt, Ct, TC*BB, Ep), one lane-dense chunk per grid step.
    x = jnp.take(emb, itexts, axis=0)                                    # (Tp, Bp, Ep) bf16
    x = x.reshape(Ct, _TC, Bt, _BB, Ep).transpose(2, 0, 1, 3, 4).reshape(Bt, Ct, TCB, Ep)
    lens = lengths.reshape(Bt, _BB, 1)

    # Explicit VMEM budget (double-buffered x chunk + gx ping-pong + resident weights + carries).
    vmem_bytes = (2 * TCB * Ep * 2
                  + 2 * TCB * 4 * Hp * 4
                  + 2 * (Ep + Hp) * 4 * Hp * 2
                  + 2 * Hp * Op * 2
                  + 2 * (4 * Hp + Op) * 4
                  + 3 * _BB * Hp * 4
                  + 2 * _BB * Op * 4
                  + 2 * _BB * 4)
    vmem_limit = int(min(96 * 2**20, max(32 * 2**20, 2 * vmem_bytes + (4 << 20))))

    return pl.pallas_call(
        _tirg_text_kernel,
        out_shape=jax.ShapeDtypeStruct((Bp, Op), jnp.float32),
        grid_spec=pltpu.PrefetchScalarGridSpec(
            num_scalar_prefetch=0,
            grid=(Bt, Ct + 1),
            in_specs=[
                # time-chunked embeddings, pipelined HBM->VMEM; clamp on the drain step
                pl.BlockSpec((None, None, TCB, Ep),
                             lambda bi, ci: (bi, jnp.minimum(ci, Ct - 1), 0, 0)),
                pl.BlockSpec((Ep, 4 * Hp), lambda bi, ci: (0, 0)),        # w_ih  (resident)
                pl.BlockSpec((1, 4 * Hp), lambda bi, ci: (0, 0)),         # b
                pl.BlockSpec((Hp, 4 * Hp), lambda bi, ci: (0, 0)),        # w_hh  (resident)
                pl.BlockSpec((None, _BB, 1), lambda bi, ci: (bi, 0, 0)),  # lengths
                pl.BlockSpec((Hp, Op), lambda bi, ci: (0, 0)),            # w_fc
                pl.BlockSpec((1, Op), lambda bi, ci: (0, 0)),             # b_fc
            ],
            out_specs=pl.BlockSpec((_BB, Op), lambda bi, ci: (bi, 0)),
            scratch_shapes=[
                pltpu.VMEM((2, TCB, 4 * Hp), jnp.float32),   # gx ping-pong
                pltpu.VMEM((_BB, Hp), jnp.float32),          # h
                pltpu.VMEM((_BB, Hp), jnp.float32),          # c
                pltpu.VMEM((_BB, Hp), jnp.float32),          # feats
            ]),
        compiler_params=pltpu.CompilerParams(
            dimension_semantics=("parallel", "arbitrary"),
            vmem_limit_bytes=vmem_limit),
    )(x, w_ih, b, w_hh, lens, w_fc, b_fc)


# ------------------------------- parameters ----------------------------------
def _round_up(x, m):
    return ((x + m - 1) // m) * m


def init_params(key, vocab_size, word_embed_dim, lstm_hidden_dim, output_dim):
    """Logical (unpadded, f32) parameters matching torch.nn.{Embedding,LSTM,Linear}."""
    # TODO(synk): GloVe-based init_weights needs external torchtext data; random init here.
    kE, k1, k2, k3, k4, k5, k6 = jax.random.split(key, 7)
    H = lstm_hidden_dim
    kH = 1.0 / np.sqrt(H)
    return {
        "emb": jax.random.normal(kE, (vocab_size, word_embed_dim), jnp.float32),
        # LSTM params stored transposed: (E, 4H), (H, 4H); PyTorch gate order i, f, g, o.
        "w_ih": jax.random.uniform(k1, (word_embed_dim, 4 * H), jnp.float32, -kH, kH),
        "w_hh": jax.random.uniform(k2, (H, 4 * H), jnp.float32, -kH, kH),
        # b = b_ih + b_hh (mathematically identical to PyTorch's two biases).
        "b": (jax.random.uniform(k3, (1, 4 * H), jnp.float32, -kH, kH)
              + jax.random.uniform(k4, (1, 4 * H), jnp.float32, -kH, kH)),
        # nn.Linear(H, output_dim): weight (O, H) stored transposed (H, O).
        "w_fc": jax.random.uniform(k5, (H, output_dim), jnp.float32, -kH, kH),
        "b_fc": jax.random.uniform(k6, (1, output_dim), jnp.float32, -kH, kH),
    }


def _pad_gates(w, hp, order=(0, 1, 3, 2)):
    """(..., 4*h) -> (..., 4*hp): zero-pad each gate block and reorder i,f,g,o -> i,f,o,g."""
    h = w.shape[-1] // 4
    pad_cfg = [(0, 0)] * (w.ndim - 1)
    blocks = [jnp.pad(w[..., k * h:(k + 1) * h], pad_cfg + [(0, hp - h)]) for k in order]
    return jnp.concatenate(blocks, axis=-1)


def pad_and_cast_params(params, compute_dtype=jnp.bfloat16):
    """Pad E/H/O to multiples of 128 (zero padding keeps real lanes exact), reorder gates to
    [i, f, o, g], and cast MXU operands to bf16.  Biases stay f32 (added post-accumulation)."""
    E = params["w_ih"].shape[0]
    H = params["w_hh"].shape[0]
    O = params["w_fc"].shape[1]
    Ep, Hp, Op = _round_up(E, 128), _round_up(H, 128), _round_up(O, 128)

    emb = jnp.pad(params["emb"], ((0, 0), (0, Ep - E))).astype(compute_dtype)
    w_ih = jnp.pad(_pad_gates(params["w_ih"], Hp), ((0, Ep - E), (0, 0))).astype(compute_dtype)
    w_hh = jnp.pad(_pad_gates(params["w_hh"], Hp), ((0, Hp - H), (0, 0))).astype(compute_dtype)
    b = _pad_gates(params["b"], Hp).astype(jnp.float32)                        # (1, 4Hp)
    w_fc = jnp.pad(params["w_fc"], ((0, Hp - H), (0, Op - O))).astype(compute_dtype)
    b_fc = jnp.pad(params["b_fc"], ((0, 0), (0, Op - O))).astype(jnp.float32)  # (1, Op)
    return {"emb": emb, "w_ih": w_ih, "w_hh": w_hh, "b": b, "w_fc": w_fc, "b_fc": b_fc,
            "dims": {"E": E, "H": H, "O": O, "Ep": Ep, "Hp": Hp, "Op": Op}}


# ------------------------------- forward glue ---------------------------------
def text_model_tirg_forward(texts, padded_params):
    """texts: list of python lists of token ids (ragged).  Returns (B, output_dim) f32."""
    d = padded_params["dims"]
    B = len(texts)
    lengths = np.array([len(t) for t in texts], dtype=np.int32)
    T = int(lengths.max()) if B else 1

    # Bucket T to whole chunks and pad B to whole batch tiles so kernels are reused.
    Tp = max(_TC, _round_up(T, _TC))
    Bp = _round_up(max(B, 1), _BB)

    itexts = np.zeros((Tp, Bp), dtype=np.int32)          # zero-padded, time-major
    for i, tok in enumerate(texts):
        itexts[:len(tok), i] = np.asarray(tok, dtype=np.int32)
    len_pad = np.ones((Bp,), dtype=np.int32)             # padded rows: length 1 (harmless)
    len_pad[:B] = lengths

    out = _tirg_forward_device(
        jnp.asarray(itexts), jnp.asarray(len_pad),
        padded_params["emb"], padded_params["w_ih"], padded_params["b"],
        padded_params["w_hh"], padded_params["w_fc"], padded_params["b_fc"])
    # TODO(synk): Dropout(p=0.1) is eval-mode identity; train-mode RNG dropout not implemented.
    return out[:B, :d["O"]]


# ------------------------------- pure-NumPy reference --------------------------
def _reference_forward(texts, params):
    lengths = [len(t) for t in texts]
    T, B = max(lengths), len(texts)
    H = params["w_hh"].shape[0]
    itexts = np.zeros((T, B), np.int32)
    for i, tok in enumerate(texts):
        itexts[:len(tok), i] = np.asarray(tok, np.int32)
    emb = np.asarray(params["emb"], np.float32)
    w_ih, w_hh = np.asarray(params["w_ih"]), np.asarray(params["w_hh"])
    b = np.asarray(params["b"])
    x = emb[itexts]                                      # (T, B, E)
    h = np.zeros((B, H), np.float32)
    c = np.zeros((B, H), np.float32)
    hs = []
    sig = lambda v: 1.0 / (1.0 + np.exp(-v))
    for t in range(T):
        g = x[t] @ w_ih + h @ w_hh + b
        i, f = sig(g[:, :H]), sig(g[:, H:2 * H])
        gg, o = np.tanh(g[:, 2 * H:3 * H]), sig(g[:, 3 * H:])
        c = f * c + i * gg
        h = o * np.tanh(c)
        hs.append(h.copy())
    feats = np.stack([hs[lengths[i] - 1][i] for i in range(B)])
    return feats @ np.asarray(params["w_fc"]) + np.asarray(params["b_fc"])


# ----------------------------------- main --------------------------------------
if __name__ == "__main__":
    VOCAB_SIZE = 64
    WORD_EMBED_DIM = 64
    LSTM_HIDDEN_DIM = 64
    OUTPUT_DIM = 32

    key = jax.random.PRNGKey(0)
    pkey, tkey = jax.random.split(key)
    params = init_params(pkey, VOCAB_SIZE, WORD_EMBED_DIM, LSTM_HIDDEN_DIM, OUTPUT_DIM)
    pparams = pad_and_cast_params(params)

    # Deterministic ragged batch: B=10, max len 20 -> exercises batch tiling (Bt=2),
    # chunk pipelining (Ct=3 steady-state chunks) and the drain step.
    lens = [5, 3, 17, 2, 20, 1, 8, 11, 7, 16]
    toks = np.asarray(jax.random.randint(tkey, (sum(lens),), 1, VOCAB_SIZE))
    texts, off = [], 0
    for L in lens:
        texts.append(toks[off:off + L].tolist())
        off += L

    out = text_model_tirg_forward(texts, pparams)
    out = jax.block_until_ready(out)

    assert out.shape == (len(texts), OUTPUT_DIM)
    assert bool(jnp.all(jnp.isfinite(out)))
    # Loose tolerance: kernel uses bf16 MXU operands with f32 accumulation.
    ref = _reference_forward(texts, params)
    np.testing.assert_allclose(np.asarray(out, np.float32), ref, rtol=0.1, atol=0.1)
    print("KERNEL_OK")
</pallas_src>

<mosaic_0001>
module attributes {stable_mosaic.version = 11 : i64} {
  func.func @_tirg_text_kernel(%arg0: i32, %arg1: i32, %arg2: memref<1x1x64x128xbf16, #tpu.memory_space<vmem>>, %arg3: memref<128x512xbf16, #tpu.memory_space<vmem>>, %arg4: memref<1x512xf32, #tpu.memory_space<vmem>>, %arg5: memref<128x512xbf16, #tpu.memory_space<vmem>>, %arg6: memref<1x8x1xi32, #tpu.memory_space<vmem>>, %arg7: memref<128x128xbf16, #tpu.memory_space<vmem>>, %arg8: memref<1x128xf32, #tpu.memory_space<vmem>>, %arg9: memref<8x128xf32, #tpu.memory_space<vmem>>, %arg10: memref<2x64x512xf32, #tpu.memory_space<vmem>>, %arg11: memref<8x128xf32, #tpu.memory_space<vmem>>, %arg12: memref<8x128xf32, #tpu.memory_space<vmem>>, %arg13: memref<8x128xf32, #tpu.memory_space<vmem>>) attributes {dimension_semantics = [#tpu.dimension_semantics<parallel>, #tpu.dimension_semantics<arbitrary>], iteration_bounds = array<i64: 2, 4>, scalar_prefetch = 0 : i64, scratch_operands = 4 : i64, tpu.core_type = #tpu.core_type<tc>, window_params = [{transform_indices = @transform_0, window_bounds = array<i64: 1, 1, 64, 128>}, {pipeline_mode = #tpu.pipeline_mode<synchronous>, transform_indices = @transform_1, window_bounds = array<i64: 128, 512>}, {pipeline_mode = #tpu.pipeline_mode<synchronous>, transform_indices = @transform_2, window_bounds = array<i64: 1, 512>}, {pipeline_mode = #tpu.pipeline_mode<synchronous>, transform_indices = @transform_3, window_bounds = array<i64: 128, 512>}, {transform_indices = @transform_4, window_bounds = array<i64: 1, 8, 1>}, {pipeline_mode = #tpu.pipeline_mode<synchronous>, transform_indices = @transform_5, window_bounds = array<i64: 128, 128>}, {pipeline_mode = #tpu.pipeline_mode<synchronous>, transform_indices = @transform_6, window_bounds = array<i64: 1, 128>}, {transform_indices = @transform_7, window_bounds = array<i64: 8, 128>}]} {
    %c2_i32 = arith.constant 2 : i32
    %c0_i32 = arith.constant 0 : i32
    %0 = arith.cmpi eq, %c2_i32, %c0_i32 : i32
    %c1_i32 = arith.constant 1 : i32
    %1 = arith.select %0, %c1_i32, %c2_i32 : i32
    %2 = arith.remsi %arg1, %1 : i32
    %c0_i32_0 = arith.constant 0 : i32
    %3 = arith.cmpi ne, %2, %c0_i32_0 : i32
    %c0_i32_1 = arith.constant 0 : i32
    %4 = arith.cmpi slt, %2, %c0_i32_1 : i32
    %c0_i32_2 = arith.constant 0 : i32
    %5 = arith.cmpi slt, %1, %c0_i32_2 : i32
    %6 = arith.xori %4, %5 : i1
    %7 = arith.andi %6, %3 : i1
    %8 = arith.addi %2, %1 : i32
    %9 = arith.select %7, %8, %2 : i32
    %c0_i32_3 = arith.constant 0 : i32
    %10 = arith.cmpi eq, %arg1, %c0_i32_3 : i32
    %11 = arith.extui %10 : i1 to i32
    %c0_i32_4 = arith.constant 0 : i32
    %12 = arith.cmpi ne, %11, %c0_i32_4 : i32
    scf.if %12 {
      %cst = arith.constant 0.000000e+00 : f32
      %21 = vector.broadcast %cst : f32 to vector<8x128xf32>
      %c0 = arith.constant 0 : index
      %c0_9 = arith.constant 0 : index
      %22 = vector.load %arg11[%c0, %c0_9] : memref<8x128xf32, #tpu.memory_space<vmem>>, vector<8x128xf32>
      tpu.vector_store %arg11[%c0, %c0_9], %21 {strides = array<i32>} : memref<8x128xf32, #tpu.memory_space<vmem>>, vector<8x128xf32>,
      %cst_10 = arith.constant 0.000000e+00 : f32
      %23 = vector.broadcast %cst_10 : f32 to vector<8x128xf32>
      %c0_11 = arith.constant 0 : index
      %c0_12 = arith.constant 0 : index
      %24 = vector.load %arg12[%c0_11, %c0_12] : memref<8x128xf32, #tpu.memory_space<vmem>>, vector<8x128xf32>
      tpu.vector_store %arg12[%c0_11, %c0_12], %23 {strides = array<i32>} : memref<8x128xf32, #tpu.memory_space<vmem>>, vector<8x128xf32>,
      %cst_13 = arith.constant 0.000000e+00 : f32
      %25 = vector.broadcast %cst_13 : f32 to vector<8x128xf32>
      %c0_14 = arith.constant 0 : index
      %c0_15 = arith.constant 0 : index
      %26 = vector.load %arg13[%c0_14, %c0_15] : memref<8x128xf32, #tpu.memory_space<vmem>>, vector<8x128xf32>
      tpu.vector_store %arg13[%c0_14, %c0_15], %25 {strides = array<i32>} : memref<8x128xf32, #tpu.memory_space<vmem>>, vector<8x128xf32>,
      %c0_16 = arith.constant 0 : index
      %c0_17 = arith.constant 0 : index
      %c0_18 = arith.constant 0 : index
      %c0_19 = arith.constant 0 : index
      %27 = vector.load %arg2[%c0_16, %c0_17, %c0_18, %c0_19] : memref<1x1x64x128xbf16, #tpu.memory_space<vmem>>, vector<1x1x64x128xbf16>
      %28 = vector.shape_cast %27 : vector<1x1x64x128xbf16> to vector<64x128xbf16>
      %c0_20 = arith.constant 0 : index
      %c0_21 = arith.constant 0 : index
      %29 = vector.load %arg3[%c0_20, %c0_21] : memref<128x512xbf16, #tpu.memory_space<vmem>>, vector<128x512xbf16>
      %cst_22 = arith.constant dense<0.000000e+00> : vector<64x512xf32>
      %30 = tpu.matmul %28, %29, %cst_22 {dimension_numbers = #tpu.dot_dimension_numbers<[1], [0], [0], [1], [0, 0, 1, 1], [], []>} : vector<64x128xbf16>, vector<128x512xbf16>, vector<64x512xf32> -> vector<64x512xf32>
      %31 = arith.index_cast %9 : i32 to index
      %c0_23 = arith.constant 0 : index
      %c0_24 = arith.constant 0 : index
      %32 = vector.load %arg10[%31, %c0_23, %c0_24] : memref<2x64x512xf32, #tpu.memory_space<vmem>>, vector<1x64x512xf32>
      %33 = vector.shape_cast %32 : vector<1x64x512xf32> to vector<64x512xf32>
      %34 = vector.shape_cast %30 : vector<64x512xf32> to vector<1x64x512xf32>
      tpu.vector_store %arg10[%31, %c0_23, %c0_24], %34 {strides = array<i32>} : memref<2x64x512xf32, #tpu.memory_space<vmem>>, vector<1x64x512xf32>,
    } else {
    }
    %c0_i32_5 = arith.constant 0 : i32
    %13 = arith.cmpi sgt, %arg1, %c0_i32_5 : i32
    %c3_i32 = arith.constant 3 : i32
    %14 = arith.cmpi slt, %arg1, %c3_i32 : i32
    %15 = arith.andi %13, %14 : i1
    %16 = arith.extui %15 : i1 to i32
    %c0_i32_6 = arith.constant 0 : i32
    %17 = arith.cmpi ne, %16, %c0_i32_6 : i32
    scf.if %17 {
      %c0 = arith.constant 0 : index
      %c0_9 = arith.constant 0 : index
      %c0_10 = arith.constant 0 : index
      %c0_11 = arith.constant 0 : index
      %21 = vector.load %arg2[%c0, %c0_9, %c0_10, %c0_11] : memref<1x1x64x128xbf16, #tpu.memory_space<vmem>>, vector<1x1x64x128xbf16>
      %22 = vector.shape_cast %21 : vector<1x1x64x128xbf16> to vector<64x128xbf16>
      %c0_12 = arith.constant 0 : index
      %c0_13 = arith.constant 0 : index
      %23 = vector.load %arg3[%c0_12, %c0_13] : memref<128x512xbf16, #tpu.memory_space<vmem>>, vector<128x512xbf16>
      %cst = arith.constant dense<0.000000e+00> : vector<64x512xf32>
      %24 = tpu.matmul %22, %23, %cst {dimension_numbers = #tpu.dot_dimension_numbers<[1], [0], [0], [1], [0, 0, 1, 1], [], []>} : vector<64x128xbf16>, vector<128x512xbf16>, vector<64x512xf32> -> vector<64x512xf32>
      %25 = arith.index_cast %9 : i32 to index
      %c0_14 = arith.constant 0 : index
      %c0_15 = arith.constant 0 : index
      %26 = vector.load %arg10[%25, %c0_14, %c0_15] : memref<2x64x512xf32, #tpu.memory_space<vmem>>, vector<1x64x512xf32>
      %27 = vector.shape_cast %26 : vector<1x64x512xf32> to vector<64x512xf32>
      %28 = vector.shape_cast %24 : vector<64x512xf32> to vector<1x64x512xf32>
      tpu.vector_store %arg10[%25, %c0_14, %c0_15], %28 {strides = array<i32>} : memref<2x64x512xf32, #tpu.memory_space<vmem>>, vector<1x64x512xf32>,
      %c1_i32_16 = arith.constant 1 : i32
      %29 = arith.subi %c1_i32_16, %9 : i32
      %c1_i32_17 = arith.constant 1 : i32
      %30 = arith.subi %arg1, %c1_i32_17 : i32
      %c0_18 = arith.constant 0 : index
      %c0_19 = arith.constant 0 : index
      %31 = vector.load %arg4[%c0_18, %c0_19] : memref<1x512xf32, #tpu.memory_space<vmem>>, vector<1x512xf32>
      %c0_20 = arith.constant 0 : index
      %c0_21 = arith.constant 0 : index
      %c0_22 = arith.constant 0 : index
      %32 = vector.load %arg6[%c0_20, %c0_21, %c0_22] : memref<1x8x1xi32, #tpu.memory_space<vmem>>, vector<1x8x1xi32>
      %33 = vector.shape_cast %32 : vector<1x8x1xi32> to vector<8x1xi32>
      %c0_i32_23 = arith.constant 0 : i32
      %34 = vector.broadcast %c0_i32_23 : i32 to vector<8x1xi32>
      %35 = arith.cmpi sgt, %33, %34 : vector<8x1xi32>
      %c1_i32_24 = arith.constant 1 : i32
      %36 = vector.broadcast %c1_i32_24 : i32 to vector<8x1xi32>
      %37 = arith.subi %33, %36 : vector<8x1xi32>
      %c23_i32 = arith.constant 23 : i32
      %38 = vector.broadcast %c23_i32 : i32 to vector<8x1xi32>
      %39 = arith.select %35, %37, %38 : vector<8x1xi1>, vector<8x1xi32>
      %c8_i32 = arith.constant 8 : i32
      %40 = arith.muli %30, %c8_i32 : i32
      %c0_25 = arith.constant 0 : index
      %c0_26 = arith.constant 0 : index
      %41 = vector.load %arg11[%c0_25, %c0_26] : memref<8x128xf32, #tpu.memory_space<vmem>>, vector<8x128xf32>
      %c0_27 = arith.constant 0 : index
      %c0_28 = arith.constant 0 : index
      %42 = vector.load %arg12[%c0_27, %c0_28] : memref<8x128xf32, #tpu.memory_space<vmem>>, vector<8x128xf32>
      %c0_29 = arith.constant 0 : index
      %c0_30 = arith.constant 0 : index
      %43 = vector.load %arg13[%c0_29, %c0_30] : memref<8x128xf32, #tpu.memory_space<vmem>>, vector<8x128xf32>
      %44 = arith.index_cast %29 : i32 to index
      %c0_31 = arith.constant 0 : index
      %c0_32 = arith.constant 0 : index
      %45 = vector.load %arg10[%44, %c0_31, %c0_32] : memref<2x64x512xf32, #tpu.memory_space<vmem>>, vector<1x8x512xf32>
      %46 = vector.shape_cast %45 : vector<1x8x512xf32> to vector<8x512xf32>
      %47 = arith.truncf %41 : vector<8x128xf32> to vector<8x128xbf16>
      %c0_33 = arith.constant 0 : index
      %c0_34 = arith.constant 0 : index
      %48 = vector.load %arg5[%c0_33, %c0_34] : memref<128x512xbf16, #tpu.memory_space<vmem>>, vector<128x512xbf16>
      %cst_35 = arith.constant dense<0.000000e+00> : vector<8x512xf32>
      %49 = tpu.matmul %47, %48, %cst_35 {dimension_numbers = #tpu.dot_dimension_numbers<[1], [0], [0], [1], [0, 0, 1, 1], [], []>} : vector<8x128xbf16>, vector<128x512xbf16>, vector<8x512xf32> -> vector<8x512xf32>
      %50 = arith.addf %46, %49 : vector<8x512xf32>
      %51 = vector.broadcast %31 : vector<1x512xf32> to vector<8x512xf32>
      %52 = arith.addf %50, %51 : vector<8x512xf32>
      %53 = vector.extract_strided_slice %52 {offsets = [0, 0], sizes = [8, 384], strides = [1, 1]} : vector<8x512xf32> to vector<8x384xf32>
      %54 = arith.negf %53 : vector<8x384xf32>
      %55 = math.exp %54 : vector<8x384xf32>
      %cst_36 = arith.constant 1.000000e+00 : f32
      %56 = vector.broadcast %cst_36 : f32 to vector<8x384xf32>
      %57 = arith.addf %56, %55 : vector<8x384xf32>
      %58 = arith.divf %56, %57 : vector<8x384xf32>
      %59 = vector.extract_strided_slice %58 {offsets = [0, 0], sizes = [8, 128], strides = [1, 1]} : vector<8x384xf32> to vector<8x128xf32>
      %60 = vector.extract_strided_slice %58 {offsets = [0, 128], sizes = [8, 128], strides = [1, 1]} : vector<8x384xf32> to vector<8x128xf32>
      %61 = vector.extract_strided_slice %58 {offsets = [0, 256], sizes = [8, 128], strides = [1, 1]} : vector<8x384xf32> to vector<8x128xf32>
      %62 = vector.extract_strided_slice %52 {offsets = [0, 384], sizes = [8, 128], strides = [1, 1]} : vector<8x512xf32> to vector<8x128xf32>
      %63 = math.tanh %62 : vector<8x128xf32>
      %64 = arith.mulf %60, %42 : vector<8x128xf32>
      %65 = arith.mulf %59, %63 : vector<8x128xf32>
      %66 = arith.addf %64, %65 : vector<8x128xf32>
      %67 = math.tanh %66 : vector<8x128xf32>
      %68 = arith.mulf %61, %67 : vector<8x128xf32>
      %c0_i32_37 = arith.constant 0 : i32
      %69 = arith.addi %40, %c0_i32_37 : i32
      %70 = vector.broadcast %69 : i32 to vector<8x1xi32>
      %71 = arith.cmpi eq, %39, %70 : vector<8x1xi32>
      %72 = vector.shape_cast %71 : vector<8x1xi1> to vector<8x1xi1>
      %73 = vector.broadcast %72 : vector<8x1xi1> to vector<8x128xi1>
      %74 = arith.select %73, %68, %43 : vector<8x128xi1>, vector<8x128xf32>
      %75 = arith.index_cast %29 : i32 to index
      %c8 = arith.constant 8 : index
      %c0_38 = arith.constant 0 : index
      %76 = vector.load %arg10[%75, %c8, %c0_38] : memref<2x64x512xf32, #tpu.memory_space<vmem>>, vector<1x8x512xf32>
      %77 = vector.shape_cast %76 : vector<1x8x512xf32> to vector<8x512xf32>
      %78 = arith.truncf %68 : vector<8x128xf32> to vector<8x128xbf16>
      %c0_39 = arith.constant 0 : index
      %c0_40 = arith.constant 0 : index
      %79 = vector.load %arg5[%c0_39, %c0_40] : memref<128x512xbf16, #tpu.memory_space<vmem>>, vector<128x512xbf16>
      %cst_41 = arith.constant dense<0.000000e+00> : vector<8x512xf32>
      %80 = tpu.matmul %78, %79, %cst_41 {dimension_numbers = #tpu.dot_dimension_numbers<[1], [0], [0], [1], [0, 0, 1, 1], [], []>} : vector<8x128xbf16>, vector<128x512xbf16>, vector<8x512xf32> -> vector<8x512xf32>
      %81 = arith.addf %77, %80 : vector<8x512xf32>
      %82 = vector.broadcast %31 : vector<1x512xf32> to vector<8x512xf32>
      %83 = arith.addf %81, %82 : vector<8x512xf32>
      %84 = vector.extract_strided_slice %83 {offsets = [0, 0], sizes = [8, 384], strides = [1, 1]} : vector<8x512xf32> to vector<8x384xf32>
      %85 = arith.negf %84 : vector<8x384xf32>
      %86 = math.exp %85 : vector<8x384xf32>
      %cst_42 = arith.constant 1.000000e+00 : f32
      %87 = vector.broadcast %cst_42 : f32 to vector<8x384xf32>
      %88 = arith.addf %87, %86 : vector<8x384xf32>
      %89 = arith.divf %87, %88 : vector<8x384xf32>
      %90 = vector.extract_strided_slice %89 {offsets = [0, 0], sizes = [8, 128], strides = [1, 1]} : vector<8x384xf32> to vector<8x128xf32>
      %91 = vector.extract_strided_slice %89 {offsets = [0, 128], sizes = [8, 128], strides = [1, 1]} : vector<8x384xf32> to vector<8x128xf32>
      %92 = vector.extract_strided_slice %89 {offsets = [0, 256], sizes = [8, 128], strides = [1, 1]} : vector<8x384xf32> to vector<8x128xf32>
      %93 = vector.extract_strided_slice %83 {offsets = [0, 384], sizes = [8, 128], strides = [1, 1]} : vector<8x512xf32> to vector<8x128xf32>
      %94 = math.tanh %93 : vector<8x128xf32>
      %95 = arith.mulf %91, %66 : vector<8x128xf32>
      %96 = arith.mulf %90, %94 : vector<8x128xf32>
      %97 = arith.addf %95, %96 : vector<8x128xf32>
      %98 = math.tanh %97 : vector<8x128xf32>
      %99 = arith.mulf %92, %98 : vector<8x128xf32>
      %c1_i32_43 = arith.constant 1 : i32
      %100 = arith.addi %40, %c1_i32_43 : i32
      %101 = vector.broadcast %100 : i32 to vector<8x1xi32>
      %102 = arith.cmpi eq, %39, %101 : vector<8x1xi32>
      %103 = vector.shape_cast %102 : vector<8x1xi1> to vector<8x1xi1>
      %104 = vector.broadcast %103 : vector<8x1xi1> to vector<8x128xi1>
      %105 = arith.select %104, %99, %74 : vector<8x128xi1>, vector<8x128xf32>
      %106 = arith.index_cast %29 : i32 to index
      %c16 = arith.constant 16 : index
      %c0_44 = arith.constant 0 : index
      %107 = vector.load %arg10[%106, %c16, %c0_44] : memref<2x64x512xf32, #tpu.memory_space<vmem>>, vector<1x8x512xf32>
      %108 = vector.shape_cast %107 : vector<1x8x512xf32> to vector<8x512xf32>
      %109 = arith.truncf %99 : vector<8x128xf32> to vector<8x128xbf16>
      %c0_45 = arith.constant 0 : index
      %c0_46 = arith.constant 0 : index
      %110 = vector.load %arg5[%c0_45, %c0_46] : memref<128x512xbf16, #tpu.memory_space<vmem>>, vector<128x512xbf16>
      %cst_47 = arith.constant dense<0.000000e+00> : vector<8x512xf32>
      %111 = tpu.matmul %109, %110, %cst_47 {dimension_numbers = #tpu.dot_dimension_numbers<[1], [0], [0], [1], [0, 0, 1, 1], [], []>} : vector<8x128xbf16>, vector<128x512xbf16>, vector<8x512xf32> -> vector<8x512xf32>
      %112 = arith.addf %108, %111 : vector<8x512xf32>
      %113 = vector.broadcast %31 : vector<1x512xf32> to vector<8x512xf32>
      %114 = arith.addf %112, %113 : vector<8x512xf32>
      %115 = vector.extract_strided_slice %114 {offsets = [0, 0], sizes = [8, 384], strides = [1, 1]} : vector<8x512xf32> to vector<8x384xf32>
      %116 = arith.negf %115 : vector<8x384xf32>
      %117 = math.exp %116 : vector<8x384xf32>
      %cst_48 = arith.constant 1.000000e+00 : f32
      %118 = vector.broadcast %cst_48 : f32 to vector<8x384xf32>
      %119 = arith.addf %118, %117 : vector<8x384xf32>
      %120 = arith.divf %118, %119 : vector<8x384xf32>
      %121 = vector.extract_strided_slice %120 {offsets = [0, 0], sizes = [8, 128], strides = [1, 1]} : vector<8x384xf32> to vector<8x128xf32>
      %122 = vector.extract_strided_slice %120 {offsets = [0, 128], sizes = [8, 128], strides = [1, 1]} : vector<8x384xf32> to vector<8x128xf32>
      %123 = vector.extract_strided_slice %120 {offsets = [0, 256], sizes = [8, 128], strides = [1, 1]} : vector<8x384xf32> to vector<8x128xf32>
      %124 = vector.extract_strided_slice %114 {offsets = [0, 384], sizes = [8, 128], strides = [1, 1]} : vector<8x512xf32> to vector<8x128xf32>
      %125 = math.tanh %124 : vector<8x128xf32>
      %126 = arith.mulf %122, %97 : vector<8x128xf32>
      %127 = arith.mulf %121, %125 : vector<8x128xf32>
      %128 = arith.addf %126, %127 : vector<8x128xf32>
      %129 = math.tanh %128 : vector<8x128xf32>
      %130 = arith.mulf %123, %129 : vector<8x128xf32>
      %c2_i32_49 = arith.constant 2 : i32
      %131 = arith.addi %40, %c2_i32_49 : i32
      %132 = vector.broadcast %131 : i32 to vector<8x1xi32>
      %133 = arith.cmpi eq, %39, %132 : vector<8x1xi32>
      %134 = vector.shape_cast %133 : vector<8x1xi1> to vector<8x1xi1>
      %135 = vector.broadcast %134 : vector<8x1xi1> to vector<8x128xi1>
      %136 = arith.select %135, %130, %105 : vector<8x128xi1>, vector<8x128xf32>
      %137 = arith.index_cast %29 : i32 to index
      %c24 = arith.constant 24 : index
      %c0_50 = arith.constant 0 : index
      %138 = vector.load %arg10[%137, %c24, %c0_50] : memref<2x64x512xf32, #tpu.memory_space<vmem>>, vector<1x8x512xf32>
      %139 = vector.shape_cast %138 : vector<1x8x512xf32> to vector<8x512xf32>
      %140 = arith.truncf %130 : vector<8x128xf32> to vector<8x128xbf16>
      %c0_51 = arith.constant 0 : index
      %c0_52 = arith.constant 0 : index
      %141 = vector.load %arg5[%c0_51, %c0_52] : memref<128x512xbf16, #tpu.memory_space<vmem>>, vector<128x512xbf16>
      %cst_53 = arith.constant dense<0.000000e+00> : vector<8x512xf32>
      %142 = tpu.matmul %140, %141, %cst_53 {dimension_numbers = #tpu.dot_dimension_numbers<[1], [0], [0], [1], [0, 0, 1, 1], [], []>} : vector<8x128xbf16>, vector<128x512xbf16>, vector<8x512xf32> -> vector<8x512xf32>
      %143 = arith.addf %139, %142 : vector<8x512xf32>
      %144 = vector.broadcast %31 : vector<1x512xf32> to vector<8x512xf32>
      %145 = arith.addf %143, %144 : vector<8x512xf32>
      %146 = vector.extract_strided_slice %145 {offsets = [0, 0], sizes = [8, 384], strides = [1, 1]} : vector<8x512xf32> to vector<8x384xf32>
      %147 = arith.negf %146 : vector<8x384xf32>
      %148 = math.exp %147 : vector<8x384xf32>
      %cst_54 = arith.constant 1.000000e+00 : f32
      %149 = vector.broadcast %cst_54 : f32 to vector<8x384xf32>
      %150 = arith.addf %149, %148 : vector<8x384xf32>
      %151 = arith.divf %149, %150 : vector<8x384xf32>
      %152 = vector.extract_strided_slice %151 {offsets = [0, 0], sizes = [8, 128], strides = [1, 1]} : vector<8x384xf32> to vector<8x128xf32>
      %153 = vector.extract_strided_slice %151 {offsets = [0, 128], sizes = [8, 128], strides = [1, 1]} : vector<8x384xf32> to vector<8x128xf32>
      %154 = vector.extract_strided_slice %151 {offsets = [0, 256], sizes = [8, 128], strides = [1, 1]} : vector<8x384xf32> to vector<8x128xf32>
      %155 = vector.extract_strided_slice %145 {offsets = [0, 384], sizes = [8, 128], strides = [1, 1]} : vector<8x512xf32> to vector<8x128xf32>
      %156 = math.tanh %155 : vector<8x128xf32>
      %157 = arith.mulf %153, %128 : vector<8x128xf32>
      %158 = arith.mulf %152, %156 : vector<8x128xf32>
      %159 = arith.addf %157, %158 : vector<8x128xf32>
      %160 = math.tanh %159 : vector<8x128xf32>
      %161 = arith.mulf %154, %160 : vector<8x128xf32>
      %c3_i32_55 = arith.constant 3 : i32
      %162 = arith.addi %40, %c3_i32_55 : i32
      %163 = vector.broadcast %162 : i32 to vector<8x1xi32>
      %164 = arith.cmpi eq, %39, %163 : vector<8x1xi32>
      %165 = vector.shape_cast %164 : vector<8x1xi1> to vector<8x1xi1>
      %166 = vector.broadcast %165 : vector<8x1xi1> to vector<8x128xi1>
      %167 = arith.select %166, %161, %136 : vector<8x128xi1>, vector<8x128xf32>
      %168 = arith.index_cast %29 : i32 to index
      %c32 = arith.constant 32 : index
      %c0_56 = arith.constant 0 : index
      %169 = vector.load %arg10[%168, %c32, %c0_56] : memref<2x64x512xf32, #tpu.memory_space<vmem>>, vector<1x8x512xf32>
      %170 = vector.shape_cast %169 : vector<1x8x512xf32> to vector<8x512xf32>
      %171 = arith.truncf %161 : vector<8x128xf32> to vector<8x128xbf16>
      %c0_57 = arith.constant 0 : index
      %c0_58 = arith.constant 0 : index
      %172 = vector.load %arg5[%c0_57, %c0_58] : memref<128x512xbf16, #tpu.memory_space<vmem>>, vector<128x512xbf16>
      %cst_59 = arith.constant dense<0.000000e+00> : vector<8x512xf32>
      %173 = tpu.matmul %171, %172, %cst_59 {dimension_numbers = #tpu.dot_dimension_numbers<[1], [0], [0], [1], [0, 0, 1, 1], [], []>} : vector<8x128xbf16>, vector<128x512xbf16>, vector<8x512xf32> -> vector<8x512xf32>
      %174 = arith.addf %170, %173 : vector<8x512xf32>
      %175 = vector.broadcast %31 : vector<1x512xf32> to vector<8x512xf32>
      %176 = arith.addf %174, %175 : vector<8x512xf32>
      %177 = vector.extract_strided_slice %176 {offsets = [0, 0], sizes = [8, 384], strides = [1, 1]} : vector<8x512xf32> to vector<8x384xf32>
      %178 = arith.negf %177 : vector<8x384xf32>
      %179 = math.exp %178 : vector<8x384xf32>
      %cst_60 = arith.constant 1.000000e+00 : f32
      %180 = vector.broadcast %cst_60 : f32 to vector<8x384xf32>
      %181 = arith.addf %180, %179 : vector<8x384xf32>
      %182 = arith.divf %180, %181 : vector<8x384xf32>
      %183 = vector.extract_strided_slice %182 {offsets = [0, 0], sizes = [8, 128], strides = [1, 1]} : vector<8x384xf32> to vector<8x128xf32>
      %184 = vector.extract_strided_slice %182 {offsets = [0, 128], sizes = [8, 128], strides = [1, 1]} : vector<8x384xf32> to vector<8x128xf32>
      %185 = vector.extract_strided_slice %182 {offsets = [0, 256], sizes = [8, 128], strides = [1, 1]} : vector<8x384xf32> to vector<8x128xf32>
      %186 = vector.extract_strided_slice %176 {offsets = [0, 384], sizes = [8, 128], strides = [1, 1]} : vector<8x512xf32> to vector<8x128xf32>
      %187 = math.tanh %186 : vector<8x128xf32>
      %188 = arith.mulf %184, %159 : vector<8x128xf32>
      %189 = arith.mulf %183, %187 : vector<8x128xf32>
      %190 = arith.addf %188, %189 : vector<8x128xf32>
      %191 = math.tanh %190 : vector<8x128xf32>
      %192 = arith.mulf %185, %191 : vector<8x128xf32>
      %c4_i32 = arith.constant 4 : i32
      %193 = arith.addi %40, %c4_i32 : i32
      %194 = vector.broadcast %193 : i32 to vector<8x1xi32>
      %195 = arith.cmpi eq, %39, %194 : vector<8x1xi32>
      %196 = vector.shape_cast %195 : vector<8x1xi1> to vector<8x1xi1>
      %197 = vector.broadcast %196 : vector<8x1xi1> to vector<8x128xi1>
      %198 = arith.select %197, %192, %167 : vector<8x128xi1>, vector<8x128xf32>
      %199 = arith.index_cast %29 : i32 to index
      %c40 = arith.constant 40 : index
      %c0_61 = arith.constant 0 : index
      %200 = vector.load %arg10[%199, %c40, %c0_61] : memref<2x64x512xf32, #tpu.memory_space<vmem>>, vector<1x8x512xf32>
      %201 = vector.shape_cast %200 : vector<1x8x512xf32> to vector<8x512xf32>
      %202 = arith.truncf %192 : vector<8x128xf32> to vector<8x128xbf16>
      %c0_62 = arith.constant 0 : index
      %c0_63 = arith.constant 0 : index
      %203 = vector.load %arg5[%c0_62, %c0_63] : memref<128x512xbf16, #tpu.memory_space<vmem>>, vector<128x512xbf16>
      %cst_64 = arith.constant dense<0.000000e+00> : vector<8x512xf32>
      %204 = tpu.matmul %202, %203, %cst_64 {dimension_numbers = #tpu.dot_dimension_numbers<[1], [0], [0], [1], [0, 0, 1, 1], [], []>} : vector<8x128xbf16>, vector<128x512xbf16>, vector<8x512xf32> -> vector<8x512xf32>
      %205 = arith.addf %201, %204 : vector<8x512xf32>
      %206 = vector.broadcast %31 : vector<1x512xf32> to vector<8x512xf32>
      %207 = arith.addf %205, %206 : vector<8x512xf32>
      %208 = vector.extract_strided_slice %207 {offsets = [0, 0], sizes = [8, 384], strides = [1, 1]} : vector<8x512xf32> to vector<8x384xf32>
      %209 = arith.negf %208 : vector<8x384xf32>
      %210 = math.exp %209 : vector<8x384xf32>
      %cst_65 = arith.constant 1.000000e+00 : f32
      %211 = vector.broadcast %cst_65 : f32 to vector<8x384xf32>
      %212 = arith.addf %211, %210 : vector<8x384xf32>
      %213 = arith.divf %211, %212 : vector<8x384xf32>
      %214 = vector.extract_strided_slice %213 {offsets = [0, 0], sizes = [8, 128], strides = [1, 1]} : vector<8x384xf32> to vector<8x128xf32>
      %215 = vector.extract_strided_slice %213 {offsets = [0, 128], sizes = [8, 128], strides = [1, 1]} : vector<8x384xf32> to vector<8x128xf32>
      %216 = vector.extract_strided_slice %213 {offsets = [0, 256], sizes = [8, 128], strides = [1, 1]} : vector<8x384xf32> to vector<8x128xf32>
      %217 = vector.extract_strided_slice %207 {offsets = [0, 384], sizes = [8, 128], strides = [1, 1]} : vector<8x512xf32> to vector<8x128xf32>
      %218 = math.tanh %217 : vector<8x128xf32>
      %219 = arith.mulf %215, %190 : vector<8x128xf32>
      %220 = arith.mulf %214, %218 : vector<8x128xf32>
      %221 = arith.addf %219, %220 : vector<8x128xf32>
      %222 = math.tanh %221 : vector<8x128xf32>
      %223 = arith.mulf %216, %222 : vector<8x128xf32>
      %c5_i32 = arith.constant 5 : i32
      %224 = arith.addi %40, %c5_i32 : i32
      %225 = vector.broadcast %224 : i32 to vector<8x1xi32>
      %226 = arith.cmpi eq, %39, %225 : vector<8x1xi32>
      %227 = vector.shape_cast %226 : vector<8x1xi1> to vector<8x1xi1>
      %228 = vector.broadcast %227 : vector<8x1xi1> to vector<8x128xi1>
      %229 = arith.select %228, %223, %198 : vector<8x128xi1>, vector<8x128xf32>
      %230 = arith.index_cast %29 : i32 to index
      %c48 = arith.constant 48 : index
      %c0_66 = arith.constant 0 : index
      %231 = vector.load %arg10[%230, %c48, %c0_66] : memref<2x64x512xf32, #tpu.memory_space<vmem>>, vector<1x8x512xf32>
      %232 = vector.shape_cast %231 : vector<1x8x512xf32> to vector<8x512xf32>
      %233 = arith.truncf %223 : vector<8x128xf32> to vector<8x128xbf16>
      %c0_67 = arith.constant 0 : index
      %c0_68 = arith.constant 0 : index
      %234 = vector.load %arg5[%c0_67, %c0_68] : memref<128x512xbf16, #tpu.memory_space<vmem>>, vector<128x512xbf16>
      %cst_69 = arith.constant dense<0.000000e+00> : vector<8x512xf32>
      %235 = tpu.matmul %233, %234, %cst_69 {dimension_numbers = #tpu.dot_dimension_numbers<[1], [0], [0], [1], [0, 0, 1, 1], [], []>} : vector<8x128xbf16>, vector<128x512xbf16>, vector<8x512xf32> -> vector<8x512xf32>
      %236 = arith.addf %232, %235 : vector<8x512xf32>
      %237 = vector.broadcast %31 : vector<1x512xf32> to vector<8x512xf32>
      %238 = arith.addf %236, %237 : vector<8x512xf32>
      %239 = vector.extract_strided_slice %238 {offsets = [0, 0], sizes = [8, 384], strides = [1, 1]} : vector<8x512xf32> to vector<8x384xf32>
      %240 = arith.negf %239 : vector<8x384xf32>
      %241 = math.exp %240 : vector<8x384xf32>
      %cst_70 = arith.constant 1.000000e+00 : f32
      %242 = vector.broadcast %cst_70 : f32 to vector<8x384xf32>
      %243 = arith.addf %242, %241 : vector<8x384xf32>
      %244 = arith.divf %242, %243 : vector<8x384xf32>
      %245 = vector.extract_strided_slice %244 {offsets = [0, 0], sizes = [8, 128], strides = [1, 1]} : vector<8x384xf32> to vector<8x128xf32>
      %246 = vector.extract_strided_slice %244 {offsets = [0, 128], sizes = [8, 128], strides = [1, 1]} : vector<8x384xf32> to vector<8x128xf32>
      %247 = vector.extract_strided_slice %244 {offsets = [0, 256], sizes = [8, 128], strides = [1, 1]} : vector<8x384xf32> to vector<8x128xf32>
      %248 = vector.extract_strided_slice %238 {offsets = [0, 384], sizes = [8, 128], strides = [1, 1]} : vector<8x512xf32> to vector<8x128xf32>
      %249 = math.tanh %248 : vector<8x128xf32>
      %250 = arith.mulf %246, %221 : vector<8x128xf32>
      %251 = arith.mulf %245, %249 : vector<8x128xf32>
      %252 = arith.addf %250, %251 : vector<8x128xf32>
      %253 = math.tanh %252 : vector<8x128xf32>
      %254 = arith.mulf %247, %253 : vector<8x128xf32>
      %c6_i32 = arith.constant 6 : i32
      %255 = arith.addi %40, %c6_i32 : i32
      %256 = vector.broadcast %255 : i32 to vector<8x1xi32>
      %257 = arith.cmpi eq, %39, %256 : vector<8x1xi32>
      %258 = vector.shape_cast %257 : vector<8x1xi1> to vector<8x1xi1>
      %259 = vector.broadcast %258 : vector<8x1xi1> to vector<8x128xi1>
      %260 = arith.select %259, %254, %229 : vector<8x128xi1>, vector<8x128xf32>
      %261 = arith.index_cast %29 : i32 to index
      %c56 = arith.constant 56 : index
      %c0_71 = arith.constant 0 : index
      %262 = vector.load %arg10[%261, %c56, %c0_71] : memref<2x64x512xf32, #tpu.memory_space<vmem>>, vector<1x8x512xf32>
      %263 = vector.shape_cast %262 : vector<1x8x512xf32> to vector<8x512xf32>
      %264 = arith.truncf %254 : vector<8x128xf32> to vector<8x128xbf16>
      %c0_72 = arith.constant 0 : index
      %c0_73 = arith.constant 0 : index
      %265 = vector.load %arg5[%c0_72, %c0_73] : memref<128x512xbf16, #tpu.memory_space<vmem>>, vector<128x512xbf16>
      %cst_74 = arith.constant dense<0.000000e+00> : vector<8x512xf32>
      %266 = tpu.matmul %264, %265, %cst_74 {dimension_numbers = #tpu.dot_dimension_numbers<[1], [0], [0], [1], [0, 0, 1, 1], [], []>} : vector<8x128xbf16>, vector<128x512xbf16>, vector<8x512xf32> -> vector<8x512xf32>
      %267 = arith.addf %263, %266 : vector<8x512xf32>
      %268 = vector.broadcast %31 : vector<1x512xf32> to vector<8x512xf32>
      %269 = arith.addf %267, %268 : vector<8x512xf32>
      %270 = vector.extract_strided_slice %269 {offsets = [0, 0], sizes = [8, 384], strides = [1, 1]} : vector<8x512xf32> to vector<8x384xf32>
      %271 = arith.negf %270 : vector<8x384xf32>
      %272 = math.exp %271 : vector<8x384xf32>
      %cst_75 = arith.constant 1.000000e+00 : f32
      %273 = vector.broadcast %cst_75 : f32 to vector<8x384xf32>
      %274 = arith.addf %273, %272 : vector<8x384xf32>
      %275 = arith.divf %273, %274 : vector<8x384xf32>
      %276 = vector.extract_strided_slice %275 {offsets = [0, 0], sizes = [8, 128], strides = [1, 1]} : vector<8x384xf32> to vector<8x128xf32>
      %277 = vector.extract_strided_slice %275 {offsets = [0, 128], sizes = [8, 128], strides = [1, 1]} : vector<8x384xf32> to vector<8x128xf32>
      %278 = vector.extract_strided_slice %275 {offsets = [0, 256], sizes = [8, 128], strides = [1, 1]} : vector<8x384xf32> to vector<8x128xf32>
      %279 = vector.extract_strided_slice %269 {offsets = [0, 384], sizes = [8, 128], strides = [1, 1]} : vector<8x512xf32> to vector<8x128xf32>
      %280 = math.tanh %279 : vector<8x128xf32>
      %281 = arith.mulf %277, %252 : vector<8x128xf32>
      %282 = arith.mulf %276, %280 : vector<8x128xf32>
      %283 = arith.addf %281, %282 : vector<8x128xf32>
      %284 = math.tanh %283 : vector<8x128xf32>
      %285 = arith.mulf %278, %284 : vector<8x128xf32>
      %c7_i32 = arith.constant 7 : i32
      %286 = arith.addi %40, %c7_i32 : i32
      %287 = vector.broadcast %286 : i32 to vector<8x1xi32>
      %288 = arith.cmpi eq, %39, %287 : vector<8x1xi32>
      %289 = vector.shape_cast %288 : vector<8x1xi1> to vector<8x1xi1>
      %290 = vector.broadcast %289 : vector<8x1xi1> to vector<8x128xi1>
      %291 = arith.select %290, %285, %260 : vector<8x128xi1>, vector<8x128xf32>
      %c0_76 = arith.constant 0 : index
      %c0_77 = arith.constant 0 : index
      %292 = vector.load %arg11[%c0_76, %c0_77] : memref<8x128xf32, #tpu.memory_space<vmem>>, vector<8x128xf32>
      tpu.vector_store %arg11[%c0_76, %c0_77], %285 {strides = array<i32>} : memref<8x128xf32, #tpu.memory_space<vmem>>, vector<8x128xf32>,
      %c0_78 = arith.constant 0 : index
      %c0_79 = arith.constant 0 : index
      %293 = vector.load %arg12[%c0_78, %c0_79] : memref<8x128xf32, #tpu.memory_space<vmem>>, vector<8x128xf32>
      tpu.vector_store %arg12[%c0_78, %c0_79], %283 {strides = array<i32>} : memref<8x128xf32, #tpu.memory_space<vmem>>, vector<8x128xf32>,
      %c0_80 = arith.constant 0 : index
      %c0_81 = arith.constant 0 : index
      %294 = vector.load %arg13[%c0_80, %c0_81] : memref<8x128xf32, #tpu.memory_space<vmem>>, vector<8x128xf32>
      tpu.vector_store %arg13[%c0_80, %c0_81], %291 {strides = array<i32>} : memref<8x128xf32, #tpu.memory_space<vmem>>, vector<8x128xf32>,
    } else {
    }
    %c3_i32_7 = arith.constant 3 : i32
    %18 = arith.cmpi eq, %arg1, %c3_i32_7 : i32
    %19 = arith.extui %18 : i1 to i32
    %c0_i32_8 = arith.constant 0 : i32
    %20 = arith.cmpi ne, %19, %c0_i32_8 : i32
    scf.if %20 {
      %c1_i32_9 = arith.constant 1 : i32
      %21 = arith.subi %c1_i32_9, %9 : i32
      %c1_i32_10 = arith.constant 1 : i32
      %22 = arith.subi %arg1, %c1_i32_10 : i32
      %c0 = arith.constant 0 : index
      %c0_11 = arith.constant 0 : index
      %23 = vector.load %arg4[%c0, %c0_11] : memref<1x512xf32, #tpu.memory_space<vmem>>, vector<1x512xf32>
      %c0_12 = arith.constant 0 : index
      %c0_13 = arith.constant 0 : index
      %c0_14 = arith.constant 0 : index
      %24 = vector.load %arg6[%c0_12, %c0_13, %c0_14] : memref<1x8x1xi32, #tpu.memory_space<vmem>>, vector<1x8x1xi32>
      %25 = vector.shape_cast %24 : vector<1x8x1xi32> to vector<8x1xi32>
      %c0_i32_15 = arith.constant 0 : i32
      %26 = vector.broadcast %c0_i32_15 : i32 to vector<8x1xi32>
      %27 = arith.cmpi sgt, %25, %26 : vector<8x1xi32>
      %c1_i32_16 = arith.constant 1 : i32
      %28 = vector.broadcast %c1_i32_16 : i32 to vector<8x1xi32>
      %29 = arith.subi %25, %28 : vector<8x1xi32>
      %c23_i32 = arith.constant 23 : i32
      %30 = vector.broadcast %c23_i32 : i32 to vector<8x1xi32>
      %31 = arith.select %27, %29, %30 : vector<8x1xi1>, vector<8x1xi32>
      %c8_i32 = arith.constant 8 : i32
      %32 = arith.muli %22, %c8_i32 : i32
      %c0_17 = arith.constant 0 : index
      %c0_18 = arith.constant 0 : index
      %33 = vector.load %arg11[%c0_17, %c0_18] : memref<8x128xf32, #tpu.memory_space<vmem>>, vector<8x128xf32>
      %c0_19 = arith.constant 0 : index
      %c0_20 = arith.constant 0 : index
      %34 = vector.load %arg12[%c0_19, %c0_20] : memref<8x128xf32, #tpu.memory_space<vmem>>, vector<8x128xf32>
      %c0_21 = arith.constant 0 : index
      %c0_22 = arith.constant 0 : index
      %35 = vector.load %arg13[%c0_21, %c0_22] : memref<8x128xf32, #tpu.memory_space<vmem>>, vector<8x128xf32>
      %36 = arith.index_cast %21 : i32 to index
      %c0_23 = arith.constant 0 : index
      %c0_24 = arith.constant 0 : index
      %37 = vector.load %arg10[%36, %c0_23, %c0_24] : memref<2x64x512xf32, #tpu.memory_space<vmem>>, vector<1x8x512xf32>
      %38 = vector.shape_cast %37 : vector<1x8x512xf32> to vector<8x512xf32>
      %39 = arith.truncf %33 : vector<8x128xf32> to vector<8x128xbf16>
      %c0_25 = arith.constant 0 : index
      %c0_26 = arith.constant 0 : index
      %40 = vector.load %arg5[%c0_25, %c0_26] : memref<128x512xbf16, #tpu.memory_space<vmem>>, vector<128x512xbf16>
      %cst = arith.constant dense<0.000000e+00> : vector<8x512xf32>
      %41 = tpu.matmul %39, %40, %cst {dimension_numbers = #tpu.dot_dimension_numbers<[1], [0], [0], [1], [0, 0, 1, 1], [], []>} : vector<8x128xbf16>, vector<128x512xbf16>, vector<8x512xf32> -> vector<8x512xf32>
      %42 = arith.addf %38, %41 : vector<8x512xf32>
      %43 = vector.broadcast %23 : vector<1x512xf32> to vector<8x512xf32>
      %44 = arith.addf %42, %43 : vector<8x512xf32>
      %45 = vector.extract_strided_slice %44 {offsets = [0, 0], sizes = [8, 384], strides = [1, 1]} : vector<8x512xf32> to vector<8x384xf32>
      %46 = arith.negf %45 : vector<8x384xf32>
      %47 = math.exp %46 : vector<8x384xf32>
      %cst_27 = arith.constant 1.000000e+00 : f32
      %48 = vector.broadcast %cst_27 : f32 to vector<8x384xf32>
      %49 = arith.addf %48, %47 : vector<8x384xf32>
      %50 = arith.divf %48, %49 : vector<8x384xf32>
      %51 = vector.extract_strided_slice %50 {offsets = [0, 0], sizes = [8, 128], strides = [1, 1]} : vector<8x384xf32> to vector<8x128xf32>
      %52 = vector.extract_strided_slice %50 {offsets = [0, 128], sizes = [8, 128], strides = [1, 1]} : vector<8x384xf32> to vector<8x128xf32>
      %53 = vector.extract_strided_slice %50 {offsets = [0, 256], sizes = [8, 128], strides = [1, 1]} : vector<8x384xf32> to vector<8x128xf32>
      %54 = vector.extract_strided_slice %44 {offsets = [0, 384], sizes = [8, 128], strides = [1, 1]} : vector<8x512xf32> to vector<8x128xf32>
      %55 = math.tanh %54 : vector<8x128xf32>
      %56 = arith.mulf %52, %34 : vector<8x128xf32>
      %57 = arith.mulf %51, %55 : vector<8x128xf32>
      %58 = arith.addf %56, %57 : vector<8x128xf32>
      %59 = math.tanh %58 : vector<8x128xf32>
      %60 = arith.mulf %53, %59 : vector<8x128xf32>
      %c0_i32_28 = arith.constant 0 : i32
      %61 = arith.addi %32, %c0_i32_28 : i32
      %62 = vector.broadcast %61 : i32 to vector<8x1xi32>
      %63 = arith.cmpi eq, %31, %62 : vector<8x1xi32>
      %64 = vector.shape_cast %63 : vector<8x1xi1> to vector<8x1xi1>
      %65 = vector.broadcast %64 : vector<8x1xi1> to vector<8x128xi1>
      %66 = arith.select %65, %60, %35 : vector<8x128xi1>, vector<8x128xf32>
      %67 = arith.index_cast %21 : i32 to index
      %c8 = arith.constant 8 : index
      %c0_29 = arith.constant 0 : index
      %68 = vector.load %arg10[%67, %c8, %c0_29] : memref<2x64x512xf32, #tpu.memory_space<vmem>>, vector<1x8x512xf32>
      %69 = vector.shape_cast %68 : vector<1x8x512xf32> to vector<8x512xf32>
      %70 = arith.truncf %60 : vector<8x128xf32> to vector<8x128xbf16>
      %c0_30 = arith.constant 0 : index
      %c0_31 = arith.constant 0 : index
      %71 = vector.load %arg5[%c0_30, %c0_31] : memref<128x512xbf16, #tpu.memory_space<vmem>>, vector<128x512xbf16>
      %cst_32 = arith.constant dense<0.000000e+00> : vector<8x512xf32>
      %72 = tpu.matmul %70, %71, %cst_32 {dimension_numbers = #tpu.dot_dimension_numbers<[1], [0], [0], [1], [0, 0, 1, 1], [], []>} : vector<8x128xbf16>, vector<128x512xbf16>, vector<8x512xf32> -> vector<8x512xf32>
      %73 = arith.addf %69, %72 : vector<8x512xf32>
      %74 = vector.broadcast %23 : vector<1x512xf32> to vector<8x512xf32>
      %75 = arith.addf %73, %74 : vector<8x512xf32>
      %76 = vector.extract_strided_slice %75 {offsets = [0, 0], sizes = [8, 384], strides = [1, 1]} : vector<8x512xf32> to vector<8x384xf32>
      %77 = arith.negf %76 : vector<8x384xf32>
      %78 = math.exp %77 : vector<8x384xf32>
      %cst_33 = arith.constant 1.000000e+00 : f32
      %79 = vector.broadcast %cst_33 : f32 to vector<8x384xf32>
      %80 = arith.addf %79, %78 : vector<8x384xf32>
      %81 = arith.divf %79, %80 : vector<8x384xf32>
      %82 = vector.extract_strided_slice %81 {offsets = [0, 0], sizes = [8, 128], strides = [1, 1]} : vector<8x384xf32> to vector<8x128xf32>
      %83 = vector.extract_strided_slice %81 {offsets = [0, 128], sizes = [8, 128], strides = [1, 1]} : vector<8x384xf32> to vector<8x128xf32>
      %84 = vector.extract_strided_slice %81 {offsets = [0, 256], sizes = [8, 128], strides = [1, 1]} : vector<8x384xf32> to vector<8x128xf32>
      %85 = vector.extract_strided_slice %75 {offsets = [0, 384], sizes = [8, 128], strides = [1, 1]} : vector<8x512xf32> to vector<8x128xf32>
      %86 = math.tanh %85 : vector<8x128xf32>
      %87 = arith.mulf %83, %58 : vector<8x128xf32>
      %88 = arith.mulf %82, %86 : vector<8x128xf32>
      %89 = arith.addf %87, %88 : vector<8x128xf32>
      %90 = math.tanh %89 : vector<8x128xf32>
      %91 = arith.mulf %84, %90 : vector<8x128xf32>
      %c1_i32_34 = arith.constant 1 : i32
      %92 = arith.addi %32, %c1_i32_34 : i32
      %93 = vector.broadcast %92 : i32 to vector<8x1xi32>
      %94 = arith.cmpi eq, %31, %93 : vector<8x1xi32>
      %95 = vector.shape_cast %94 : vector<8x1xi1> to vector<8x1xi1>
      %96 = vector.broadcast %95 : vector<8x1xi1> to vector<8x128xi1>
      %97 = arith.select %96, %91, %66 : vector<8x128xi1>, vector<8x128xf32>
      %98 = arith.index_cast %21 : i32 to index
      %c16 = arith.constant 16 : index
      %c0_35 = arith.constant 0 : index
      %99 = vector.load %arg10[%98, %c16, %c0_35] : memref<2x64x512xf32, #tpu.memory_space<vmem>>, vector<1x8x512xf32>
      %100 = vector.shape_cast %99 : vector<1x8x512xf32> to vector<8x512xf32>
      %101 = arith.truncf %91 : vector<8x128xf32> to vector<8x128xbf16>
      %c0_36 = arith.constant 0 : index
      %c0_37 = arith.constant 0 : index
      %102 = vector.load %arg5[%c0_36, %c0_37] : memref<128x512xbf16, #tpu.memory_space<vmem>>, vector<128x512xbf16>
      %cst_38 = arith.constant dense<0.000000e+00> : vector<8x512xf32>
      %103 = tpu.matmul %101, %102, %cst_38 {dimension_numbers = #tpu.dot_dimension_numbers<[1], [0], [0], [1], [0, 0, 1, 1], [], []>} : vector<8x128xbf16>, vector<128x512xbf16>, vector<8x512xf32> -> vector<8x512xf32>
      %104 = arith.addf %100, %103 : vector<8x512xf32>
      %105 = vector.broadcast %23 : vector<1x512xf32> to vector<8x512xf32>
      %106 = arith.addf %104, %105 : vector<8x512xf32>
      %107 = vector.extract_strided_slice %106 {offsets = [0, 0], sizes = [8, 384], strides = [1, 1]} : vector<8x512xf32> to vector<8x384xf32>
      %108 = arith.negf %107 : vector<8x384xf32>
      %109 = math.exp %108 : vector<8x384xf32>
      %cst_39 = arith.constant 1.000000e+00 : f32
      %110 = vector.broadcast %cst_39 : f32 to vector<8x384xf32>
      %111 = arith.addf %110, %109 : vector<8x384xf32>
      %112 = arith.divf %110, %111 : vector<8x384xf32>
      %113 = vector.extract_strided_slice %112 {offsets = [0, 0], sizes = [8, 128], strides = [1, 1]} : vector<8x384xf32> to vector<8x128xf32>
      %114 = vector.extract_strided_slice %112 {offsets = [0, 128], sizes = [8, 128], strides = [1, 1]} : vector<8x384xf32> to vector<8x128xf32>
      %115 = vector.extract_strided_slice %112 {offsets = [0, 256], sizes = [8, 128], strides = [1, 1]} : vector<8x384xf32> to vector<8x128xf32>
      %116 = vector.extract_strided_slice %106 {offsets = [0, 384], sizes = [8, 128], strides = [1, 1]} : vector<8x512xf32> to vector<8x128xf32>
      %117 = math.tanh %116 : vector<8x128xf32>
      %118 = arith.mulf %114, %89 : vector<8x128xf32>
      %119 = arith.mulf %113, %117 : vector<8x128xf32>
      %120 = arith.addf %118, %119 : vector<8x128xf32>
      %121 = math.tanh %120 : vector<8x128xf32>
      %122 = arith.mulf %115, %121 : vector<8x128xf32>
      %c2_i32_40 = arith.constant 2 : i32
      %123 = arith.addi %32, %c2_i32_40 : i32
      %124 = vector.broadcast %123 : i32 to vector<8x1xi32>
      %125 = arith.cmpi eq, %31, %124 : vector<8x1xi32>
      %126 = vector.shape_cast %125 : vector<8x1xi1> to vector<8x1xi1>
      %127 = vector.broadcast %126 : vector<8x1xi1> to vector<8x128xi1>
      %128 = arith.select %127, %122, %97 : vector<8x128xi1>, vector<8x128xf32>
      %129 = arith.index_cast %21 : i32 to index
      %c24 = arith.constant 24 : index
      %c0_41 = arith.constant 0 : index
      %130 = vector.load %arg10[%129, %c24, %c0_41] : memref<2x64x512xf32, #tpu.memory_space<vmem>>, vector<1x8x512xf32>
      %131 = vector.shape_cast %130 : vector<1x8x512xf32> to vector<8x512xf32>
      %132 = arith.truncf %122 : vector<8x128xf32> to vector<8x128xbf16>
      %c0_42 = arith.constant 0 : index
      %c0_43 = arith.constant 0 : index
      %133 = vector.load %arg5[%c0_42, %c0_43] : memref<128x512xbf16, #tpu.memory_space<vmem>>, vector<128x512xbf16>
      %cst_44 = arith.constant dense<0.000000e+00> : vector<8x512xf32>
      %134 = tpu.matmul %132, %133, %cst_44 {dimension_numbers = #tpu.dot_dimension_numbers<[1], [0], [0], [1], [0, 0, 1, 1], [], []>} : vector<8x128xbf16>, vector<128x512xbf16>, vector<8x512xf32> -> vector<8x512xf32>
      %135 = arith.addf %131, %134 : vector<8x512xf32>
      %136 = vector.broadcast %23 : vector<1x512xf32> to vector<8x512xf32>
      %137 = arith.addf %135, %136 : vector<8x512xf32>
      %138 = vector.extract_strided_slice %137 {offsets = [0, 0], sizes = [8, 384], strides = [1, 1]} : vector<8x512xf32> to vector<8x384xf32>
      %139 = arith.negf %138 : vector<8x384xf32>
      %140 = math.exp %139 : vector<8x384xf32>
      %cst_45 = arith.constant 1.000000e+00 : f32
      %141 = vector.broadcast %cst_45 : f32 to vector<8x384xf32>
      %142 = arith.addf %141, %140 : vector<8x384xf32>
      %143 = arith.divf %141, %142 : vector<8x384xf32>
      %144 = vector.extract_strided_slice %143 {offsets = [0, 0], sizes = [8, 128], strides = [1, 1]} : vector<8x384xf32> to vector<8x128xf32>
      %145 = vector.extract_strided_slice %143 {offsets = [0, 128], sizes = [8, 128], strides = [1, 1]} : vector<8x384xf32> to vector<8x128xf32>
      %146 = vector.extract_strided_slice %143 {offsets = [0, 256], sizes = [8, 128], strides = [1, 1]} : vector<8x384xf32> to vector<8x128xf32>
      %147 = vector.extract_strided_slice %137 {offsets = [0, 384], sizes = [8, 128], strides = [1, 1]} : vector<8x512xf32> to vector<8x128xf32>
      %148 = math.tanh %147 : vector<8x128xf32>
      %149 = arith.mulf %145, %120 : vector<8x128xf32>
      %150 = arith.mulf %144, %148 : vector<8x128xf32>
      %151 = arith.addf %149, %150 : vector<8x128xf32>
      %152 = math.tanh %151 : vector<8x128xf32>
      %153 = arith.mulf %146, %152 : vector<8x128xf32>
      %c3_i32_46 = arith.constant 3 : i32
      %154 = arith.addi %32, %c3_i32_46 : i32
      %155 = vector.broadcast %154 : i32 to vector<8x1xi32>
      %156 = arith.cmpi eq, %31, %155 : vector<8x1xi32>
      %157 = vector.shape_cast %156 : vector<8x1xi1> to vector<8x1xi1>
      %158 = vector.broadcast %157 : vector<8x1xi1> to vector<8x128xi1>
      %159 = arith.select %158, %153, %128 : vector<8x128xi1>, vector<8x128xf32>
      %160 = arith.index_cast %21 : i32 to index
      %c32 = arith.constant 32 : index
      %c0_47 = arith.constant 0 : index
      %161 = vector.load %arg10[%160, %c32, %c0_47] : memref<2x64x512xf32, #tpu.memory_space<vmem>>, vector<1x8x512xf32>
      %162 = vector.shape_cast %161 : vector<1x8x512xf32> to vector<8x512xf32>
      %163 = arith.truncf %153 : vector<8x128xf32> to vector<8x128xbf16>
      %c0_48 = arith.constant 0 : index
      %c0_49 = arith.constant 0 : index
      %164 = vector.load %arg5[%c0_48, %c0_49] : memref<128x512xbf16, #tpu.memory_space<vmem>>, vector<128x512xbf16>
      %cst_50 = arith.constant dense<0.000000e+00> : vector<8x512xf32>
      %165 = tpu.matmul %163, %164, %cst_50 {dimension_numbers = #tpu.dot_dimension_numbers<[1], [0], [0], [1], [0, 0, 1, 1], [], []>} : vector<8x128xbf16>, vector<128x512xbf16>, vector<8x512xf32> -> vector<8x512xf32>
      %166 = arith.addf %162, %165 : vector<8x512xf32>
      %167 = vector.broadcast %23 : vector<1x512xf32> to vector<8x512xf32>
      %168 = arith.addf %166, %167 : vector<8x512xf32>
      %169 = vector.extract_strided_slice %168 {offsets = [0, 0], sizes = [8, 384], strides = [1, 1]} : vector<8x512xf32> to vector<8x384xf32>
      %170 = arith.negf %169 : vector<8x384xf32>
      %171 = math.exp %170 : vector<8x384xf32>
      %cst_51 = arith.constant 1.000000e+00 : f32
      %172 = vector.broadcast %cst_51 : f32 to vector<8x384xf32>
      %173 = arith.addf %172, %171 : vector<8x384xf32>
      %174 = arith.divf %172, %173 : vector<8x384xf32>
      %175 = vector.extract_strided_slice %174 {offsets = [0, 0], sizes = [8, 128], strides = [1, 1]} : vector<8x384xf32> to vector<8x128xf32>
      %176 = vector.extract_strided_slice %174 {offsets = [0, 128], sizes = [8, 128], strides = [1, 1]} : vector<8x384xf32> to vector<8x128xf32>
      %177 = vector.extract_strided_slice %174 {offsets = [0, 256], sizes = [8, 128], strides = [1, 1]} : vector<8x384xf32> to vector<8x128xf32>
      %178 = vector.extract_strided_slice %168 {offsets = [0, 384], sizes = [8, 128], strides = [1, 1]} : vector<8x512xf32> to vector<8x128xf32>
      %179 = math.tanh %178 : vector<8x128xf32>
      %180 = arith.mulf %176, %151 : vector<8x128xf32>
      %181 = arith.mulf %175, %179 : vector<8x128xf32>
      %182 = arith.addf %180, %181 : vector<8x128xf32>
      %183 = math.tanh %182 : vector<8x128xf32>
      %184 = arith.mulf %177, %183 : vector<8x128xf32>
      %c4_i32 = arith.constant 4 : i32
      %185 = arith.addi %32, %c4_i32 : i32
      %186 = vector.broadcast %185 : i32 to vector<8x1xi32>
      %187 = arith.cmpi eq, %31, %186 : vector<8x1xi32>
      %188 = vector.shape_cast %187 : vector<8x1xi1> to vector<8x1xi1>
      %189 = vector.broadcast %188 : vector<8x1xi1> to vector<8x128xi1>
      %190 = arith.select %189, %184, %159 : vector<8x128xi1>, vector<8x128xf32>
      %191 = arith.index_cast %21 : i32 to index
      %c40 = arith.constant 40 : index
      %c0_52 = arith.constant 0 : index
      %192 = vector.load %arg10[%191, %c40, %c0_52] : memref<2x64x512xf32, #tpu.memory_space<vmem>>, vector<1x8x512xf32>
      %193 = vector.shape_cast %192 : vector<1x8x512xf32> to vector<8x512xf32>
      %194 = arith.truncf %184 : vector<8x128xf32> to vector<8x128xbf16>
      %c0_53 = arith.constant 0 : index
      %c0_54 = arith.constant 0 : index
      %195 = vector.load %arg5[%c0_53, %c0_54] : memref<128x512xbf16, #tpu.memory_space<vmem>>, vector<128x512xbf16>
      %cst_55 = arith.constant dense<0.000000e+00> : vector<8x512xf32>
      %196 = tpu.matmul %194, %195, %cst_55 {dimension_numbers = #tpu.dot_dimension_numbers<[1], [0], [0], [1], [0, 0, 1, 1], [], []>} : vector<8x128xbf16>, vector<128x512xbf16>, vector<8x512xf32> -> vector<8x512xf32>
      %197 = arith.addf %193, %196 : vector<8x512xf32>
      %198 = vector.broadcast %23 : vector<1x512xf32> to vector<8x512xf32>
      %199 = arith.addf %197, %198 : vector<8x512xf32>
      %200 = vector.extract_strided_slice %199 {offsets = [0, 0], sizes = [8, 384], strides = [1, 1]} : vector<8x512xf32> to vector<8x384xf32>
      %201 = arith.negf %200 : vector<8x384xf32>
      %202 = math.exp %201 : vector<8x384xf32>
      %cst_56 = arith.constant 1.000000e+00 : f32
      %203 = vector.broadcast %cst_56 : f32 to vector<8x384xf32>
      %204 = arith.addf %203, %202 : vector<8x384xf32>
      %205 = arith.divf %203, %204 : vector<8x384xf32>
      %206 = vector.extract_strided_slice %205 {offsets = [0, 0], sizes = [8, 128], strides = [1, 1]} : vector<8x384xf32> to vector<8x128xf32>
      %207 = vector.extract_strided_slice %205 {offsets = [0, 128], sizes = [8, 128], strides = [1, 1]} : vector<8x384xf32> to vector<8x128xf32>
      %208 = vector.extract_strided_slice %205 {offsets = [0, 256], sizes = [8, 128], strides = [1, 1]} : vector<8x384xf32> to vector<8x128xf32>
      %209 = vector.extract_strided_slice %199 {offsets = [0, 384], sizes = [8, 128], strides = [1, 1]} : vector<8x512xf32> to vector<8x128xf32>
      %210 = math.tanh %209 : vector<8x128xf32>
      %211 = arith.mulf %207, %182 : vector<8x128xf32>
      %212 = arith.mulf %206, %210 : vector<8x128xf32>
      %213 = arith.addf %211, %212 : vector<8x128xf32>
      %214 = math.tanh %213 : vector<8x128xf32>
      %215 = arith.mulf %208, %214 : vector<8x128xf32>
      %c5_i32 = arith.constant 5 : i32
      %216 = arith.addi %32, %c5_i32 : i32
      %217 = vector.broadcast %216 : i32 to vector<8x1xi32>
      %218 = arith.cmpi eq, %31, %217 : vector<8x1xi32>
      %219 = vector.shape_cast %218 : vector<8x1xi1> to vector<8x1xi1>
      %220 = vector.broadcast %219 : vector<8x1xi1> to vector<8x128xi1>
      %221 = arith.select %220, %215, %190 : vector<8x128xi1>, vector<8x128xf32>
      %222 = arith.index_cast %21 : i32 to index
      %c48 = arith.constant 48 : index
      %c0_57 = arith.constant 0 : index
      %223 = vector.load %arg10[%222, %c48, %c0_57] : memref<2x64x512xf32, #tpu.memory_space<vmem>>, vector<1x8x512xf32>
      %224 = vector.shape_cast %223 : vector<1x8x512xf32> to vector<8x512xf32>
      %225 = arith.truncf %215 : vector<8x128xf32> to vector<8x128xbf16>
      %c0_58 = arith.constant 0 : index
      %c0_59 = arith.constant 0 : index
      %226 = vector.load %arg5[%c0_58, %c0_59] : memref<128x512xbf16, #tpu.memory_space<vmem>>, vector<128x512xbf16>
      %cst_60 = arith.constant dense<0.000000e+00> : vector<8x512xf32>
      %227 = tpu.matmul %225, %226, %cst_60 {dimension_numbers = #tpu.dot_dimension_numbers<[1], [0], [0], [1], [0, 0, 1, 1], [], []>} : vector<8x128xbf16>, vector<128x512xbf16>, vector<8x512xf32> -> vector<8x512xf32>
      %228 = arith.addf %224, %227 : vector<8x512xf32>
      %229 = vector.broadcast %23 : vector<1x512xf32> to vector<8x512xf32>
      %230 = arith.addf %228, %229 : vector<8x512xf32>
      %231 = vector.extract_strided_slice %230 {offsets = [0, 0], sizes = [8, 384], strides = [1, 1]} : vector<8x512xf32> to vector<8x384xf32>
      %232 = arith.negf %231 : vector<8x384xf32>
      %233 = math.exp %232 : vector<8x384xf32>
      %cst_61 = arith.constant 1.000000e+00 : f32
      %234 = vector.broadcast %cst_61 : f32 to vector<8x384xf32>
      %235 = arith.addf %234, %233 : vector<8x384xf32>
      %236 = arith.divf %234, %235 : vector<8x384xf32>
      %237 = vector.extract_strided_slice %236 {offsets = [0, 0], sizes = [8, 128], strides = [1, 1]} : vector<8x384xf32> to vector<8x128xf32>
      %238 = vector.extract_strided_slice %236 {offsets = [0, 128], sizes = [8, 128], strides = [1, 1]} : vector<8x384xf32> to vector<8x128xf32>
      %239 = vector.extract_strided_slice %236 {offsets = [0, 256], sizes = [8, 128], strides = [1, 1]} : vector<8x384xf32> to vector<8x128xf32>
      %240 = vector.extract_strided_slice %230 {offsets = [0, 384], sizes = [8, 128], strides = [1, 1]} : vector<8x512xf32> to vector<8x128xf32>
      %241 = math.tanh %240 : vector<8x128xf32>
      %242 = arith.mulf %238, %213 : vector<8x128xf32>
      %243 = arith.mulf %237, %241 : vector<8x128xf32>
      %244 = arith.addf %242, %243 : vector<8x128xf32>
      %245 = math.tanh %244 : vector<8x128xf32>
      %246 = arith.mulf %239, %245 : vector<8x128xf32>
      %c6_i32 = arith.constant 6 : i32
      %247 = arith.addi %32, %c6_i32 : i32
      %248 = vector.broadcast %247 : i32 to vector<8x1xi32>
      %249 = arith.cmpi eq, %31, %248 : vector<8x1xi32>
      %250 = vector.shape_cast %249 : vector<8x1xi1> to vector<8x1xi1>
      %251 = vector.broadcast %250 : vector<8x1xi1> to vector<8x128xi1>
      %252 = arith.select %251, %246, %221 : vector<8x128xi1>, vector<8x128xf32>
      %253 = arith.index_cast %21 : i32 to index
      %c56 = arith.constant 56 : index
      %c0_62 = arith.constant 0 : index
      %254 = vector.load %arg10[%253, %c56, %c0_62] : memref<2x64x512xf32, #tpu.memory_space<vmem>>, vector<1x8x512xf32>
      %255 = vector.shape_cast %254 : vector<1x8x512xf32> to vector<8x512xf32>
      %256 = arith.truncf %246 : vector<8x128xf32> to vector<8x128xbf16>
      %c0_63 = arith.constant 0 : index
      %c0_64 = arith.constant 0 : index
      %257 = vector.load %arg5[%c0_63, %c0_64] : memref<128x512xbf16, #tpu.memory_space<vmem>>, vector<128x512xbf16>
      %cst_65 = arith.constant dense<0.000000e+00> : vector<8x512xf32>
      %258 = tpu.matmul %256, %257, %cst_65 {dimension_numbers = #tpu.dot_dimension_numbers<[1], [0], [0], [1], [0, 0, 1, 1], [], []>} : vector<8x128xbf16>, vector<128x512xbf16>, vector<8x512xf32> -> vector<8x512xf32>
      %259 = arith.addf %255, %258 : vector<8x512xf32>
      %260 = vector.broadcast %23 : vector<1x512xf32> to vector<8x512xf32>
      %261 = arith.addf %259, %260 : vector<8x512xf32>
      %262 = vector.extract_strided_slice %261 {offsets = [0, 0], sizes = [8, 384], strides = [1, 1]} : vector<8x512xf32> to vector<8x384xf32>
      %263 = arith.negf %262 : vector<8x384xf32>
      %264 = math.exp %263 : vector<8x384xf32>
      %cst_66 = arith.constant 1.000000e+00 : f32
      %265 = vector.broadcast %cst_66 : f32 to vector<8x384xf32>
      %266 = arith.addf %265, %264 : vector<8x384xf32>
      %267 = arith.divf %265, %266 : vector<8x384xf32>
      %268 = vector.extract_strided_slice %267 {offsets = [0, 0], sizes = [8, 128], strides = [1, 1]} : vector<8x384xf32> to vector<8x128xf32>
      %269 = vector.extract_strided_slice %267 {offsets = [0, 128], sizes = [8, 128], strides = [1, 1]} : vector<8x384xf32> to vector<8x128xf32>
      %270 = vector.extract_strided_slice %267 {offsets = [0, 256], sizes = [8, 128], strides = [1, 1]} : vector<8x384xf32> to vector<8x128xf32>
      %271 = vector.extract_strided_slice %261 {offsets = [0, 384], sizes = [8, 128], strides = [1, 1]} : vector<8x512xf32> to vector<8x128xf32>
      %272 = math.tanh %271 : vector<8x128xf32>
      %273 = arith.mulf %269, %244 : vector<8x128xf32>
      %274 = arith.mulf %268, %272 : vector<8x128xf32>
      %275 = arith.addf %273, %274 : vector<8x128xf32>
      %276 = math.tanh %275 : vector<8x128xf32>
      %277 = arith.mulf %270, %276 : vector<8x128xf32>
      %c7_i32 = arith.constant 7 : i32
      %278 = arith.addi %32, %c7_i32 : i32
      %279 = vector.broadcast %278 : i32 to vector<8x1xi32>
      %280 = arith.cmpi eq, %31, %279 : vector<8x1xi32>
      %281 = vector.shape_cast %280 : vector<8x1xi1> to vector<8x1xi1>
      %282 = vector.broadcast %281 : vector<8x1xi1> to vector<8x128xi1>
      %283 = arith.select %282, %277, %252 : vector<8x128xi1>, vector<8x128xf32>
      %c0_67 = arith.constant 0 : index
      %c0_68 = arith.constant 0 : index
      %284 = vector.load %arg11[%c0_67, %c0_68] : memref<8x128xf32, #tpu.memory_space<vmem>>, vector<8x128xf32>
      tpu.vector_store %arg11[%c0_67, %c0_68], %277 {strides = array<i32>} : memref<8x128xf32, #tpu.memory_space<vmem>>, vector<8x128xf32>,
      %c0_69 = arith.constant 0 : index
      %c0_70 = arith.constant 0 : index
      %285 = vector.load %arg12[%c0_69, %c0_70] : memref<8x128xf32, #tpu.memory_space<vmem>>, vector<8x128xf32>
      tpu.vector_store %arg12[%c0_69, %c0_70], %275 {strides = array<i32>} : memref<8x128xf32, #tpu.memory_space<vmem>>, vector<8x128xf32>,
      %c0_71 = arith.constant 0 : index
      %c0_72 = arith.constant 0 : index
      %286 = vector.load %arg13[%c0_71, %c0_72] : memref<8x128xf32, #tpu.memory_space<vmem>>, vector<8x128xf32>
      tpu.vector_store %arg13[%c0_71, %c0_72], %283 {strides = array<i32>} : memref<8x128xf32, #tpu.memory_space<vmem>>, vector<8x128xf32>,
      %c0_73 = arith.constant 0 : index
      %c0_74 = arith.constant 0 : index
      %287 = vector.load %arg13[%c0_73, %c0_74] : memref<8x128xf32, #tpu.memory_space<vmem>>, vector<8x128xf32>
      %288 = arith.truncf %287 : vector<8x128xf32> to vector<8x128xbf16>
      %c0_75 = arith.constant 0 : index
      %c0_76 = arith.constant 0 : index
      %289 = vector.load %arg7[%c0_75, %c0_76] : memref<128x128xbf16, #tpu.memory_space<vmem>>, vector<128x128xbf16>
      %cst_77 = arith.constant dense<0.000000e+00> : vector<8x128xf32>
      %290 = tpu.matmul %288, %289, %cst_77 {dimension_numbers = #tpu.dot_dimension_numbers<[1], [0], [0], [1], [0, 0, 1, 1], [], []>} : vector<8x128xbf16>, vector<128x128xbf16>, vector<8x128xf32> -> vector<8x128xf32>
      %c0_78 = arith.constant 0 : index
      %c0_79 = arith.constant 0 : index
      %291 = vector.load %arg8[%c0_78, %c0_79] : memref<1x128xf32, #tpu.memory_space<vmem>>, vector<1x128xf32>
      %292 = vector.broadcast %291 : vector<1x128xf32> to vector<8x128xf32>
      %293 = arith.addf %290, %292 : vector<8x128xf32>
      %c0_80 = arith.constant 0 : index
      %c0_81 = arith.constant 0 : index
      %294 = vector.load %arg9[%c0_80, %c0_81] : memref<8x128xf32, #tpu.memory_space<vmem>>, vector<8x128xf32>
      tpu.vector_store %arg9[%c0_80, %c0_81], %293 {strides = array<i32>} : memref<8x128xf32, #tpu.memory_space<vmem>>, vector<8x128xf32>,
    } else {
    }
    return
  }
  func.func @transform_0(%arg0: i32, %arg1: i32) -> (i32, i32, i32, i32) {
    %c2_i32 = arith.constant 2 : i32
    %0 = arith.minsi %arg1, %c2_i32 : i32
    %c0_i32 = arith.constant 0 : i32
    %c0_i32_0 = arith.constant 0 : i32
    %c0_i32_1 = arith.constant 0 : i32
    return %arg0, %0, %c0_i32, %c0_i32_0 : i32, i32, i32, i32
  }
  func.func @transform_1(%arg0: i32, %arg1: i32) -> (i32, i32) {
    %c0_i32 = arith.constant 0 : i32
    %c0_i32_0 = arith.constant 0 : i32
    %c0_i32_1 = arith.constant 0 : i32
    return %c0_i32, %c0_i32_0 : i32, i32
  }
  func.func @transform_2(%arg0: i32, %arg1: i32) -> (i32, i32) {
    %c0_i32 = arith.constant 0 : i32
    %c0_i32_0 = arith.constant 0 : i32
    %c0_i32_1 = arith.constant 0 : i32
    return %c0_i32, %c0_i32_0 : i32, i32
  }
  func.func @transform_3(%arg0: i32, %arg1: i32) -> (i32, i32) {
    %c0_i32 = arith.constant 0 : i32
    %c0_i32_0 = arith.constant 0 : i32
    %c0_i32_1 = arith.constant 0 : i32
    return %c0_i32, %c0_i32_0 : i32, i32
  }
  func.func @transform_4(%arg0: i32, %arg1: i32) -> (i32, i32, i32) {
    %c0_i32 = arith.constant 0 : i32
    %c0_i32_0 = arith.constant 0 : i32
    %c0_i32_1 = arith.constant 0 : i32
    return %arg0, %c0_i32, %c0_i32_0 : i32, i32, i32
  }
  func.func @transform_5(%arg0: i32, %arg1: i32) -> (i32, i32) {
    %c0_i32 = arith.constant 0 : i32
    %c0_i32_0 = arith.constant 0 : i32
    %c0_i32_1 = arith.constant 0 : i32
    return %c0_i32, %c0_i32_0 : i32, i32
  }
  func.func @transform_6(%arg0: i32, %arg1: i32) -> (i32, i32) {
    %c0_i32 = arith.constant 0 : i32
    %c0_i32_0 = arith.constant 0 : i32
    %c0_i32_1 = arith.constant 0 : i32
    return %c0_i32, %c0_i32_0 : i32, i32
  }
  func.func @transform_7(%arg0: i32, %arg1: i32) -> (i32, i32) {
    %c0_i32 = arith.constant 0 : i32
    %c0_i32_0 = arith.constant 0 : i32
    return %arg0, %c0_i32 : i32, i32
  }
}

</mosaic_0001>

<bundles_post_ra>
// kernel: _tirg_forward_device.1
= control target key start
LH: loop header
LB: loop body
LE: loop exit
PB: predicated region body
PF: predicated region fallthrough
CT: control target
= control target key end

     0   :  { %12 = vsyncpa [#allocation7], 0  ;;  %s6884_s0 = inlined_call_operand.vmem [shape: bf16[2,3,64,128], index: 0, kind: input, shape index: {}]   ;;  %s6885_s1 = inlined_call_operand.vmem [shape: bf16[128,512], index: 1, kind: input, shape index: {}]   ;;  %s6886_s2 = inlined_call_operand.vmem [shape: f32[1,512], index: 2, kind: input, shape index: {}]   ;;  %s6887_s3 = inlined_call_operand.vmem [shape: bf16[128,512], index: 3, kind: input, shape index: {}]   ;;  %s6888_s4 = inlined_call_operand.vmem [shape: s32[2,8,1], index: 4, kind: input, shape index: {}]   ;;  %s6889_s5 = inlined_call_operand.vmem [shape: bf16[128,128], index: 5, kind: input, shape index: {}]   ;;  %s6890_s6 = inlined_call_operand.vmem [shape: f32[1,128], index: 6, kind: input, shape index: {}]   ;;  %s6891_s7 = inlined_call_operand.hbm [shape: f32[16,128], index: 7, kind: output, shape index: {}]  }
   0x1   :  { %14 = vsyncpa [#allocation7 + $0x1], 0  ;;  %s4921_s24 = smov 0   ;;  %s4923_s25 = smov 0  }
   0x2   :  { %s4925_s26 = smov 0   ;;  %s4927_s27 = smov 0  }
   0x3   :  { %s4929_s28 = smov 0   ;;  %s4931_s29 = smov 0  }
   0x4   :  { %s4933_s30 = smov 0   ;;  %s4935_s8 = smov 0  }
   0x5 LB: > { %6899 = sst [smem:[#allocation9_spill]] %s4844_s24  ;;  %s3907_s9 = sadd.s32 4294967295, %s4872_s8   ;;  %s4872_s8 = sphi %s4935_s8, %s20_s8   ;;  %s4868_s30 = sphi %s4933_s30, %s6920_s30   ;;  %s4864_s29 = sphi %s4931_s29, %s6916_s29   ;;  %s4860_s28 = sphi %s4929_s28, %s6915_s28   ;;  %s4856_s27 = sphi %s4927_s27, %s6914_s27   ;;  %s4852_s26 = sphi %s4925_s26, %s6913_s26   ;;  %s4848_s25 = sphi %s4923_s25, %s6919_s25   ;;  %s4844_s24 = sphi %s4921_s24, %s6918_s24  }
   0x6   : > { %6900 = sst [smem:[#allocation10_spill]] %s4852_s26  ;;  %s3908_s10 = sadd.s32 4294967294, %s4872_s8  }
   0x7   : > { %6901 = sst [smem:[#allocation11_spill]] %s4864_s29  ;;  %s29_s11 = sadd.s32 1, %s4864_s29 }
   0x8   : > { %6902 = sst [smem:[#allocation12_spill]] %s4868_s30  ;;  %p30_p0 = scmp.ge.s32.totalorder %s29_s11, 4 }
   0x9   : > { %s32_s12 = sadd.s32 1, %s4868_s30  ;;  %p212_p1 = scmp.ne.s32.totalorder %s4852_s26, %s4848_s25 }
   0xa   : > { %p213_p2 = scmp.eq.s32.totalorder %s3907_s9, 7  ;;  %s6922_s11 = smov (%p30_p0, %s29_s11), 0 }
   0xb   : > { %6903 = sst [smem:[#allocation13_spill]] %s6922_s11  ;;  %s6924_s12 = smov (!%p30_p0, %s32_s12), %s4868_s30 }
   0xc   : > { %p4970_p3 = por %p213_p2, %p212_p1  ;;  %p218_p4 = scmp.ne.s32.totalorder %s4848_s25, %s4844_s24 }
   0xd   : > { %p34_p5 = scmp.ge.s32.totalorder %s6924_s12, 2  ;;  %p219_p6 = scmp.eq.s32.totalorder %s3908_s10, 7 }
   0xe   : > { %p3911_p7 = scmp.ge.s32.totalorder %s4872_s8, 1  ;;  %p275_p8 = scmp.lt.s32.totalorder %s4872_s8, 9 }
   0xf   : > { %s6926_s12 = smov (%p34_p5, %s6924_s12), 0  ;;  %p4980_p9 = por %p219_p6, %p218_p4 }
  0x10   : > { %6905 = sst [smem:[#allocation14_spill]] %s6926_s12  ;;  %p276_p10 = pnand %p3911_p7, %p275_p8 }
  0x11   : > { %s6906_s14 = scalar_select %p4980_p9, 1, 0 }
  0x12   : > { %s199_s15 = ssub.s32 %s4868_s30, %s6926_s12  ;;  %s202_s16 = sadd.s32 1, %s4852_s26 }
  0x13   : > { %6907 = sst [smem:[#allocation15_spill]] %s6906_s14  ;;  %p200_p11 = scmp.eq.s32.totalorder %s199_s15, 0 }
  0x14   : > { %279 = sbr.rel (%p276_p10) target bundleno = 4844 (0x12ec), region = 48  ;;  %s6894_s18 = sand.u32 (!%p276_p10), 1, %s4848_s25  }
  0x15   : > { %s4988_s17 = scalar_select %p200_p11, %s4852_s26, %s202_s16  }
  0x16   : > { %p317_p12 = scmp.lt.s32.totalorder (!%p276_p10), %s4856_s27, 2  ;;  %s4994_s19 = sshll.u32 (!%p276_p10), %s6894_s18, 3 }
  0x17   : > { %6908 = sst [smem:[#allocation16_spill]] %s4988_s17  ;;  %p319_p13 = scmp.lt.s32.totalorder (!%p276_p10), %s4860_s28, 1 }
  0x18   : > { %p335_p0 = scmp.lt.s32.totalorder (!%p276_p10), %s4856_s27, 0  ;;  %s336_s11 = ssub.s32 (!%p276_p10), 0, %s4856_s27 }
  0x19   : > { %s3919_s18 = smin.u32 (!%p276_p10), %s4856_s27, %s336_s11  ;;  %p3922_p2 = scmp.ne.s32.totalorder (!%p276_p10), %s4856_s27, 0 }
  0x1a   : > { %s338_s14 = sand.u32 (!%p276_p10), 1, %s3919_s18  }
  0x1b   : > { %s318_s20 = scalar_select %p317_p12, %s4856_s27, 2 }
  0x1c   : > { %s320_s21 = scalar_select %p319_p13, %s4860_s28, 1 }
  0x1d   : > { %s6928_s20 = smov (!%p317_p12, %s318_s20), 2  ;;  %s339_s24 = ssub.s32 0, %s338_s14  ;;  %v4246_v0 = vld [vmem:[%s6885_s1 + $0x4] ss:$16 sps:$4 sm:$0xff] (!%p3922_p2)   ;;  %v4874_v1 = vmov (!%p3922_p2), 0.0   ;;  %v4875_v3 = vmov (!%p3922_p2), 0  }
  0x1e   : > { %s4168_s22 = smul.u32 24, %s320_s21  ;;  %s3918_s23 = sshll.u32 %s320_s21, 3  ;;  %351 = vst [vmem:[#allocation3] sm:$0xff] (!%p3922_p2), %v4874_v1  ;;  %352 = vst [vmem:[#allocation4] sm:$0xff] (!%p3922_p2), %v4874_v1  ;;  %v4248_v2 = vld [vmem:[%s6885_s1 + $0xc] ss:$16 sps:$4 sm:$0xff] (!%p3922_p2)   ;;  %610 = vmatprep.mubr.bf16.mxu0 (!%p3922_p2), %v4875_v3  ;;  %683 = vmatprep.mubr.bf16.mxu1 (!%p3922_p2), %v4875_v3 }
  0x1f   : > { %s3916_s9 = sshll.u32 %s6928_s20, 3  ;;  %s5003_s16 = scalar_lea.vmem %s6888_s4, %s3918_s23  ;;  %353 = vst [vmem:[#allocation5] sm:$0xff] (!%p3922_p2), %v4874_v1  ;;  %578 = vmatprep.subr.bf16.mxu0 (!%p3922_p2), %v4246_v0  ;;  %v4250_v4 = vld [vmem:[%s6885_s1] ss:$16 sps:$4 sm:$0xff] (!%p3922_p2)   ;;  %v4251_v5 = vld [vmem:[%s6885_s1 + $0x8] ss:$16 sps:$4 sm:$0xff] (!%p3922_p2)   ;;  %651 = vmatprep.subr.bf16.mxu1 (!%p3922_p2), %v4248_v2 }
  0x20   : > { %s325_s12 = sadd.s32 %s4168_s22, %s3916_s9  ;;  %s6930_s24 = smov (!%p335_p0, %s339_s24), %s338_s14  ;;  %v4252_v6 = vld [vmem:[%s6885_s1 + $0x24] ss:$16 sps:$4 sm:$0xff] (!%p3922_p2)   ;;  %579 = vmatpush1.bf16.msra.mxu0 (!%p3922_p2), %v4250_v4  ;;  %652 = vmatpush1.bf16.msra.mxu1 (!%p3922_p2), %v4251_v5  ;;  %v4254_v7 = vld [vmem:[%s6885_s1 + $0x2c] ss:$16 sps:$4 sm:$0xff] (!%p3922_p2)   ;;  %v4256_v8 = vld [vmem:[%s6885_s1 + $0x20] ss:$16 sps:$4 sm:$0xff] (!%p3922_p2)  }
  0x21   : > { %s3917_s30 = sshll.u32 %s325_s12, 2  ;;  %p3921_p1 = scmp.lt.s32.totalorder %s6930_s24, 0  ;;  %580 = vmatprep.subr.bf16.mxu0 (!%p3922_p2), %v4252_v6  ;;  %v4257_v9 = vld [vmem:[%s6885_s1 + $0x28] ss:$16 sps:$4 sm:$0xff] (!%p3922_p2)   ;;  %653 = vmatprep.subr.bf16.mxu1 (!%p3922_p2), %v4254_v7  ;;  %v4258_v10 = vld [vmem:[%s6885_s1 + $0x44] ss:$16 sps:$4 sm:$0xff] (!%p3922_p2)  }
  0x22   : > { %s5010_s26 = scalar_lea.vmem %s6884_s0, %s3917_s30  ;;  %s345_s20 = sadd.s32 2, %s6930_s24  ;;  %v4260_v11 = vld [vmem:[%s6885_s1 + $0x4c] ss:$16 sps:$4 sm:$0xff] (!%p3922_p2)   ;;  %v4262_v12 = vld [vmem:[%s6885_s1 + $0x40] ss:$16 sps:$4 sm:$0xff] (!%p3922_p2)  }
  0x23   : > { %s6932_s20 = smov (!%p3921_p1, %s345_s20), %s6930_s24  ;;  %s316_s21 = scalar_lea.vmem [#allocation6], %s4994_s19  ;;  %v4263_v13 = vld [vmem:[%s6885_s1 + $0x48] ss:$16 sps:$4 sm:$0xff] (!%p3922_p2)   ;;  %v4264_v14 = vld [vmem:[%s6885_s1 + $0x64] ss:$16 sps:$4 sm:$0xff] (!%p3922_p2)  }
  0x24   : > { %350 = sbr.rel (%p3922_p2) target bundleno = 303 (0x12f), region = 52  ;;  %581 = vmatpush1.bf16.msra.mxu0 (!%p3922_p2), %v4256_v8  ;;  %654 = vmatpush1.bf16.msra.mxu1 (!%p3922_p2), %v4257_v9  ;;  %v4266_v15 = vld [vmem:[%s6885_s1 + $0x6c] ss:$16 sps:$4 sm:$0xff] (!%p3922_p2)   ;;  %v4268_v16 = vld [vmem:[%s6885_s1 + $0x60] ss:$16 sps:$4 sm:$0xff] (!%p3922_p2)   ;;  %s4135_s15 = sshll.u32 (!%p3922_p2), %s6932_s20, 8 }
  0x25   : > { %582 = vmatprep.subr.bf16.mxu0 (!%p3922_p2), %v4258_v10  ;;  %655 = vmatprep.subr.bf16.mxu1 (!%p3922_p2), %v4260_v11  ;;  %v4269_v17 = vld [vmem:[%s6885_s1 + $0x68] ss:$16 sps:$4 sm:$0xff] (!%p3922_p2)   ;;  %v4270_v18 = vld [vmem:[%s6885_s1 + $0x84] ss:$16 sps:$4 sm:$0xff] (!%p3922_p2)   ;;  %v4272_v19 = vld [vmem:[%s6885_s1 + $0x8c] ss:$16 sps:$4 sm:$0xff] (!%p3922_p2)  }
  0x26   : > { %v4274_v20 = vld [vmem:[%s6885_s1 + $0x80] ss:$16 sps:$4 sm:$0xff] (!%p3922_p2)   ;;  %v4275_v21 = vld [vmem:[%s6885_s1 + $0x88] ss:$16 sps:$4 sm:$0xff] (!%p3922_p2)   ;;  %v4276_v22 = vld [vmem:[%s6885_s1 + $0xa4] ss:$16 sps:$4 sm:$0xff] (!%p3922_p2)  }
  0x27   : > { %v4278_v23 = vld [vmem:[%s6885_s1 + $0xac] ss:$16 sps:$4 sm:$0xff] (!%p3922_p2)   ;;  %v4280_v24 = vld [vmem:[%s6885_s1 + $0xa0] ss:$16 sps:$4 sm:$0xff] (!%p3922_p2)   ;;  %v4281_v25 = vld [vmem:[%s6885_s1 + $0xa8] ss:$16 sps:$4 sm:$0xff] (!%p3922_p2)  }
  0x28   : > { %583 = vmatpush1.bf16.msra.mxu0 (!%p3922_p2), %v4262_v12  ;;  %656 = vmatpush1.bf16.msra.mxu1 (!%p3922_p2), %v4263_v13  ;;  %v4282_v26 = vld [vmem:[%s6885_s1 + $0xc4] ss:$16 sps:$4 sm:$0xff] (!%p3922_p2)   ;;  %v4284_v27 = vld [vmem:[%s6885_s1 + $0xcc] ss:$16 sps:$4 sm:$0xff] (!%p3922_p2)   ;;  %v4286_v28 = vld [vmem:[%s6885_s1 + $0xc0] ss:$16 sps:$4 sm:$0xff] (!%p3922_p2)  }
  0x29   : > { %584 = vmatprep.subr.bf16.mxu0 (!%p3922_p2), %v4264_v14  ;;  %657 = vmatprep.subr.bf16.mxu1 (!%p3922_p2), %v4266_v15  ;;  %v4287_v29 = vld [vmem:[%s6885_s1 + $0xc8] ss:$16 sps:$4 sm:$0xff] (!%p3922_p2)   ;;  %v4288_v30 = vld [vmem:[%s6885_s1 + $0xe4] ss:$16 sps:$4 sm:$0xff] (!%p3922_p2)   ;;  %v4290_v31 = vld [vmem:[%s6885_s1 + $0xec] ss:$16 sps:$4 sm:$0xff] (!%p3922_p2)  }
  0x2a   : > { %v4292_v32 = vld [vmem:[%s6885_s1 + $0xe0] ss:$16 sps:$4 sm:$0xff] (!%p3922_p2)   ;;  %v4293_v33 = vld [vmem:[%s6885_s1 + $0xe8] ss:$16 sps:$4 sm:$0xff] (!%p3922_p2)   ;;  %s5127_s22 = scalar_lea.vmem (!%p3922_p2), [#allocation2], %s4135_s15 }
  0x2b   : > { %v4294_v34 = vld [vmem:[%s5010_s26] sm:$0xff]   ;;  %v4295_v35 = vld [vmem:[%s5010_s26 + $0x8] sm:$0xff]   ;;  %v4296_v36 = vld [vmem:[%s5010_s26 + $0x10] sm:$0xff]  }
  0x2c   : > { %585 = vmatpush1.bf16.msra.mxu0 %v4268_v16  ;;  %658 = vmatpush1.bf16.msra.mxu1 %v4269_v17  ;;  %v4297_v37 = vld [vmem:[%s5010_s26 + $0x18] sm:$0xff]  }
  0x2d   : > { %586 = vmatprep.subr.bf16.mxu0 %v4270_v18  ;;  %659 = vmatprep.subr.bf16.mxu1 %v4272_v19 }
  0x30   : > { %587 = vmatpush1.bf16.msra.mxu0 %v4274_v20  ;;  %660 = vmatpush1.bf16.msra.mxu1 %v4275_v21 }
  0x31   : > { %588 = vmatprep.subr.bf16.mxu0 %v4276_v22  ;;  %661 = vmatprep.subr.bf16.mxu1 %v4278_v23 }
  0x34   : > { %589 = vmatpush1.bf16.msra.mxu0 %v4280_v24  ;;  %662 = vmatpush1.bf16.msra.mxu1 %v4281_v25 }
  0x35   : > { %590 = vmatprep.subr.bf16.mxu0 %v4282_v26  ;;  %663 = vmatprep.subr.bf16.mxu1 %v4284_v27 }
  0x38   : > { %591 = vmatpush1.bf16.msra.mxu0 %v4286_v28  ;;  %664 = vmatpush1.bf16.msra.mxu1 %v4287_v29 }
  0x39   : > { %592 = vmatprep.subr.bf16.mxu0 %v4288_v30  ;;  %665 = vmatprep.subr.bf16.mxu1 %v4290_v31 }
  0x3c   : > { %593 = vmatpush1.bf16.msra.mxu0 %v4292_v32  ;;  %666 = vmatpush1.bf16.msra.mxu1 %v4293_v33 }
  0x3f   : > { %611 = vmatmul.mubr.bf16.vlgmr.msra.gmra.mrb[0].mxu0 %v4294_v34  ;;  %684 = vmatmul.mubr.bf16.vlgmr.msra.gmra.mrb[0].mxu1 %v4294_v34 }
  0x40   : > { %620 = vmatprep.mubr.bf16.mxu0 %v4875_v3  ;;  %693 = vmatprep.mubr.bf16.mxu1 %v4875_v3 }
  0x47   : > { %621 = vmatmul.mubr.bf16.gmra.mrb[4].mxu0 %v4295_v35  ;;  %694 = vmatmul.mubr.bf16.gmra.mrb[4].mxu1 %v4295_v35 }
  0x48   : > { %630 = vmatprep.mubr.bf16.mxu0 %v4875_v3  ;;  %703 = vmatprep.mubr.bf16.mxu1 %v4875_v3 }
  0x4f   : > { %631 = vmatmul.mubr.bf16.gmra.mrb[8].mxu0 %v4296_v36  ;;  %704 = vmatmul.mubr.bf16.gmra.mrb[8].mxu1 %v4296_v36 }
  0x50   : > { %640 = vmatprep.mubr.bf16.mxu0 %v4875_v3  ;;  %713 = vmatprep.mubr.bf16.mxu1 %v4875_v3 }
  0x57   : > { %641 = vmatmul.mubr.bf16.gmra.mrb[12].mxu0 %v4297_v37  ;;  %714 = vmatmul.mubr.bf16.gmra.mrb[12].mxu1 %v4297_v37 }
 0x112   : > { %v612_v38 = vpop.f32.mrb[0].mxu0  ;;  %v685_v39 = vpop.f32.mrb[0].mxu1 }
 0x113   : > { %727 = vst [vmem:[%s5127_s22] sm:$0xff] %v612_v38  ;;  %729 = vst [vmem:[%s5127_s22 + $0x10] sm:$0xff] %v685_v39  ;;  %v614_v40 = vpop.f32.mrb[1].mxu0  ;;  %v687_v41 = vpop.f32.mrb[1].mxu1 }
 0x114   : > { %728 = vst [vmem:[%s5127_s22 + $0x8] sm:$0xff] %v614_v40  ;;  %730 = vst [vmem:[%s5127_s22 + $0x18] sm:$0xff] %v687_v41  ;;  %v616_v42 = vpop.f32.mrb[2].mxu0  ;;  %v689_v43 = vpop.f32.mrb[2].mxu1 }
 0x115   : > { %731 = vst [vmem:[%s5127_s22 + $0x20] sm:$0xff] %v616_v42  ;;  %733 = vst [vmem:[%s5127_s22 + $0x30] sm:$0xff] %v689_v43  ;;  %v618_v44 = vpop.f32.mrb[3].mxu0  ;;  %v691_v45 = vpop.f32.mrb[3].mxu1 }
 0x116   : > { %732 = vst [vmem:[%s5127_s22 + $0x28] sm:$0xff] %v618_v44  ;;  %734 = vst [vmem:[%s5127_s22 + $0x38] sm:$0xff] %v691_v45 }
 0x11a   : > { %v622_v46 = vpop.f32.mrb[4].mxu0  ;;  %v695_v47 = vpop.f32.mrb[4].mxu1 }
 0x11b   : > { %735 = vst [vmem:[%s5127_s22 + $0x40] sm:$0xff] %v622_v46  ;;  %737 = vst [vmem:[%s5127_s22 + $0x50] sm:$0xff] %v695_v47  ;;  %v624_v48 = vpop.f32.mrb[5].mxu0  ;;  %v697_v49 = vpop.f32.mrb[5].mxu1 }
 0x11c   : > { %736 = vst [vmem:[%s5127_s22 + $0x48] sm:$0xff] %v624_v48  ;;  %738 = vst [vmem:[%s5127_s22 + $0x58] sm:$0xff] %v697_v49  ;;  %v626_v50 = vpop.f32.mrb[6].mxu0  ;;  %v699_v51 = vpop.f32.mrb[6].mxu1 }
 0x11d   : > { %739 = vst [vmem:[%s5127_s22 + $0x60] sm:$0xff] %v626_v50  ;;  %741 = vst [vmem:[%s5127_s22 + $0x70] sm:$0xff] %v699_v51  ;;  %v628_v52 = vpop.f32.mrb[7].mxu0  ;;  %v701_v53 = vpop.f32.mrb[7].mxu1 }
 0x11e   : > { %740 = vst [vmem:[%s5127_s22 + $0x68] sm:$0xff] %v628_v52  ;;  %742 = vst [vmem:[%s5127_s22 + $0x78] sm:$0xff] %v701_v53 }
 0x122   : > { %v632_v54 = vpop.f32.mrb[8].mxu0  ;;  %v705_v55 = vpop.f32.mrb[8].mxu1 }
 0x123   : > { %743 = vst [vmem:[%s5127_s22 + $0x80] sm:$0xff] %v632_v54  ;;  %745 = vst [vmem:[%s5127_s22 + $0x90] sm:$0xff] %v705_v55  ;;  %v634_v56 = vpop.f32.mrb[9].mxu0  ;;  %v707_v57 = vpop.f32.mrb[9].mxu1 }
 0x124   : > { %744 = vst [vmem:[%s5127_s22 + $0x88] sm:$0xff] %v634_v56  ;;  %746 = vst [vmem:[%s5127_s22 + $0x98] sm:$0xff] %v707_v57  ;;  %v636_v58 = vpop.f32.mrb[10].mxu0  ;;  %v709_v59 = vpop.f32.mrb[10].mxu1 }
 0x125   : > { %747 = vst [vmem:[%s5127_s22 + $0xa0] sm:$0xff] %v636_v58  ;;  %749 = vst [vmem:[%s5127_s22 + $0xb0] sm:$0xff] %v709_v59  ;;  %v638_v60 = vpop.f32.mrb[11].mxu0  ;;  %v711_v61 = vpop.f32.mrb[11].mxu1 }
 0x126   : > { %748 = vst [vmem:[%s5127_s22 + $0xa8] sm:$0xff] %v638_v60  ;;  %750 = vst [vmem:[%s5127_s22 + $0xb8] sm:$0xff] %v711_v61 }
 0x12a   : > { %v642_v62 = vpop.f32.mrb[12].mxu0  ;;  %v715_v63 = vpop.f32.mrb[12].mxu1 }
 0x12b   : > { %751 = vst [vmem:[%s5127_s22 + $0xc0] sm:$0xff] %v642_v62  ;;  %753 = vst [vmem:[%s5127_s22 + $0xd0] sm:$0xff] %v715_v63  ;;  %v644_v0 = vpop.f32.mrb[13].mxu0  ;;  %v717_v1 = vpop.f32.mrb[13].mxu1 }
 0x12c   : > { %752 = vst [vmem:[%s5127_s22 + $0xc8] sm:$0xff] %v644_v0  ;;  %754 = vst [vmem:[%s5127_s22 + $0xd8] sm:$0xff] %v717_v1  ;;  %v646_v2 = vpop.f32.mrb[14].mxu0  ;;  %v719_v3 = vpop.f32.mrb[14].mxu1 }
 0x12d   : > { %755 = vst [vmem:[%s5127_s22 + $0xe0] sm:$0xff] %v646_v2  ;;  %757 = vst [vmem:[%s5127_s22 + $0xf0] sm:$0xff] %v719_v3  ;;  %v648_v4 = vpop.f32.mrb[15].mxu0  ;;  %v721_v5 = vpop.f32.mrb[15].mxu1 }
 0x12e   : > { %756 = vst [vmem:[%s5127_s22 + $0xe8] sm:$0xff] %v648_v4  ;;  %758 = vst [vmem:[%s5127_s22 + $0xf8] sm:$0xff] %v721_v5 }
 0x12f PF: > { %p759_p4 = scmp.gt.s32.totalorder %s4856_s27, 0  ;;  %p760_p5 = scmp.lt.s32.totalorder %s4856_s27, 3 }
 0x131   : > { %p761_p6 = pnand %p760_p5, %p759_p4 }
 0x132   : > { %v4300_v6 = vld [vmem:[%s6885_s1 + $0x4] ss:$16 sps:$4 sm:$0xff] (!%p761_p6)   ;;  %v4302_v7 = vld [vmem:[%s6885_s1 + $0xc] ss:$16 sps:$4 sm:$0xff] (!%p761_p6)   ;;  %v4876_v8 = vmov (!%p761_p6), 0   ;;  %s3999_s29 = sadd.s32 (!%p761_p6), 4294967295, %s4856_s27 }
 0x133   : > { %764 = sbr.rel (%p761_p6) target bundleno = 2472 (0x9a8), region = 56  ;;  %1021 = vmatprep.mubr.bf16.mxu0 (!%p761_p6), %v4876_v8  ;;  %1094 = vmatprep.mubr.bf16.mxu1 (!%p761_p6), %v4876_v8  ;;  %v4304_v9 = vld [vmem:[%s6885_s1] ss:$16 sps:$4 sm:$0xff] (!%p761_p6)   ;;  %v4305_v10 = vld [vmem:[%s6885_s1 + $0x8] ss:$16 sps:$4 sm:$0xff] (!%p761_p6)   ;;  %s5372_s10 = sshll.u32 (!%p761_p6), %s3999_s29, 3 }
 0x134   : > { %989 = vmatprep.subr.bf16.mxu0 (!%p761_p6), %v4300_v6  ;;  %4298 = vset.pattern.permute.xlu0 (!%p761_p6), %v4876_v8  ;;  %v4306_v11 = vld [vmem:[%s6885_s1 + $0x24] ss:$16 sps:$4 sm:$0xff] (!%p761_p6)   ;;  %v4308_v12 = vld [vmem:[%s6885_s1 + $0x2c] ss:$16 sps:$4 sm:$0xff] (!%p761_p6)   ;;  %v4310_v13 = vld [vmem:[%s6885_s1 + $0x20] ss:$16 sps:$4 sm:$0xff] (!%p761_p6)   ;;  %v1516_v0 = vstv (!%p761_p6), %s5372_s10 }
 0x135   : > { %1062 = vmatprep.subr.bf16.mxu1 (!%p761_p6), %v4302_v7  ;;  %4299 = vset.pattern.permute.xlu1 (!%p761_p6), %v4876_v8  ;;  %v4311_v14 = vld [vmem:[%s6885_s1 + $0x28] ss:$16 sps:$4 sm:$0xff] (!%p761_p6)   ;;  %v4312_v15 = vld [vmem:[%s6885_s1 + $0x44] ss:$16 sps:$4 sm:$0xff] (!%p761_p6)   ;;  %v4314_v16 = vld [vmem:[%s6885_s1 + $0x4c] ss:$16 sps:$4 sm:$0xff] (!%p761_p6)  }
 0x136   : > { %990 = vmatpush1.bf16.msra.mxu0 (!%p761_p6), %v4304_v9  ;;  %1063 = vmatpush1.bf16.msra.mxu1 (!%p761_p6), %v4305_v10  ;;  %v4316_v17 = vld [vmem:[%s6885_s1 + $0x40] ss:$16 sps:$4 sm:$0xff] (!%p761_p6)   ;;  %v4317_v18 = vld [vmem:[%s6885_s1 + $0x48] ss:$16 sps:$4 sm:$0xff] (!%p761_p6)   ;;  %v4318_v19 = vld [vmem:[%s6885_s1 + $0x64] ss:$16 sps:$4 sm:$0xff] (!%p761_p6)  }
 0x137   : > { %991 = vmatprep.subr.bf16.mxu0 (!%p761_p6), %v4306_v11  ;;  %1064 = vmatprep.subr.bf16.mxu1 (!%p761_p6), %v4308_v12  ;;  %v4320_v20 = vld [vmem:[%s6885_s1 + $0x6c] ss:$16 sps:$4 sm:$0xff] (!%p761_p6)   ;;  %v4322_v21 = vld [vmem:[%s6885_s1 + $0x60] ss:$16 sps:$4 sm:$0xff] (!%p761_p6)   ;;  %v4323_v22 = vld [vmem:[%s6885_s1 + $0x68] ss:$16 sps:$4 sm:$0xff] (!%p761_p6)  }
 0x138   : > { %v4324_v23 = vld [vmem:[%s6885_s1 + $0x84] ss:$16 sps:$4 sm:$0xff] (!%p761_p6)   ;;  %v4326_v24 = vld [vmem:[%s6885_s1 + $0x8c] ss:$16 sps:$4 sm:$0xff] (!%p761_p6)   ;;  %v4328_v25 = vld [vmem:[%s6885_s1 + $0x80] ss:$16 sps:$4 sm:$0xff] (!%p761_p6)  }
 0x139   : > { %v4329_v26 = vld [vmem:[%s6885_s1 + $0x88] ss:$16 sps:$4 sm:$0xff] (!%p761_p6)   ;;  %v4330_v27 = vld [vmem:[%s6885_s1 + $0xa4] ss:$16 sps:$4 sm:$0xff] (!%p761_p6)   ;;  %v4332_v28 = vld [vmem:[%s6885_s1 + $0xac] ss:$16 sps:$4 sm:$0xff] (!%p761_p6)  }
 0x13a   : > { %992 = vmatpush1.bf16.msra.mxu0 %v4310_v13  ;;  %1065 = vmatpush1.bf16.msra.mxu1 %v4311_v14  ;;  %v4334_v29 = vld [vmem:[%s6885_s1 + $0xa0] ss:$16 sps:$4 sm:$0xff]   ;;  %v4335_v30 = vld [vmem:[%s6885_s1 + $0xa8] ss:$16 sps:$4 sm:$0xff]   ;;  %v4336_v31 = vld [vmem:[%s6885_s1 + $0xc4] ss:$16 sps:$4 sm:$0xff]  }
 0x13b   : > { %993 = vmatprep.subr.bf16.mxu0 %v4312_v15  ;;  %1066 = vmatprep.subr.bf16.mxu1 %v4314_v16  ;;  %v4338_v32 = vld [vmem:[%s6885_s1 + $0xcc] ss:$16 sps:$4 sm:$0xff]   ;;  %v4340_v33 = vld [vmem:[%s6885_s1 + $0xc0] ss:$16 sps:$4 sm:$0xff]   ;;  %v4341_v34 = vld [vmem:[%s6885_s1 + $0xc8] ss:$16 sps:$4 sm:$0xff]  }
 0x13c   : > { %v4342_v35 = vld [vmem:[%s6885_s1 + $0xe4] ss:$16 sps:$4 sm:$0xff]   ;;  %v4344_v36 = vld [vmem:[%s6885_s1 + $0xec] ss:$16 sps:$4 sm:$0xff]   ;;  %v4346_v37 = vld [vmem:[%s6885_s1 + $0xe0] ss:$16 sps:$4 sm:$0xff]  }
 0x13d   : > { %v4347_v38 = vld [vmem:[%s6885_s1 + $0xe8] ss:$16 sps:$4 sm:$0xff]   ;;  %v5266_v39 = vld [vmem:[%s6887_s3 + $0x4] ss:$16 sps:$4 sm:$0xff]   ;;  %v5271_v40 = vld [vmem:[%s6887_s3 + $0xc] ss:$16 sps:$4 sm:$0xff]  }
 0x13e   : > { %994 = vmatpush1.bf16.msra.mxu0 %v4316_v17  ;;  %1067 = vmatpush1.bf16.msra.mxu1 %v4317_v18  ;;  %v4348_v41 = vld [vmem:[%s5010_s26] sm:$0xff]   ;;  %v5282_v43 = vld [vmem:[%s6887_s3 + $0x8] ss:$16 sps:$4 sm:$0xff]   ;;  %v5294_v45 = vld [vmem:[%s6887_s3 + $0x2c] ss:$16 sps:$4 sm:$0xff]   ;;  %s1643_s30 = sadd.s32 1, %s5372_s10 }
 0x13f   : > { %995 = vmatprep.subr.bf16.mxu0 %v4318_v19  ;;  %1068 = vmatprep.subr.bf16.mxu1 %v4320_v20  ;;  %v5277_v42 = vld [vmem:[%s6887_s3] ss:$16 sps:$4 sm:$0xff]   ;;  %v5289_v44 = vld [vmem:[%s6887_s3 + $0x24] ss:$16 sps:$4 sm:$0xff]   ;;  %v5306_v47 = vld [vmem:[%s6887_s3 + $0x28] ss:$16 sps:$4 sm:$0xff]   ;;  %v1644_v19 = vstv %s1643_s30 }
 0x140   : > { %v5299_v46 = vld [vmem:[%s6887_s3 + $0x20] ss:$16 sps:$4 sm:$0xff]   ;;  %v5313_v48 = vld [vmem:[%s6887_s3 + $0x44] ss:$16 sps:$4 sm:$0xff]   ;;  %v5318_v49 = vld [vmem:[%s6887_s3 + $0x4c] ss:$16 sps:$4 sm:$0xff]  }
 0x141   : > { %v4361_v50 = vld [vmem:[%s5010_s26 + $0x8] sm:$0xff]   ;;  %v5326_v51 = vld [vmem:[%s6887_s3 + $0x40] ss:$16 sps:$4 sm:$0xff]   ;;  %v5338_v53 = vld [vmem:[%s6887_s3 + $0x64] ss:$16 sps:$4 sm:$0xff]   ;;  %s4136_s29 = sshll.u32 %s6932_s20, 8 }
 0x142   : > { %996 = vmatpush1.bf16.msra.mxu0 %v4322_v21  ;;  %1069 = vmatpush1.bf16.msra.mxu1 %v4323_v22  ;;  %v5331_v52 = vld [vmem:[%s6887_s3 + $0x48] ss:$16 sps:$4 sm:$0xff]   ;;  %v5345_v54 = vld [vmem:[%s6887_s3 + $0x6c] ss:$16 sps:$4 sm:$0xff]   ;;  %v5351_v55 = vld [vmem:[%s6887_s3 + $0x60] ss:$16 sps:$4 sm:$0xff]  }
 0x143   : > { %997 = vmatprep.subr.bf16.mxu0 %v4324_v23  ;;  %1070 = vmatprep.subr.bf16.mxu1 %v4326_v24  ;;  %v5356_v56 = vld [vmem:[%s6887_s3 + $0x68] ss:$16 sps:$4 sm:$0xff]   ;;  %v5363_v57 = vld [vmem:[%s6887_s3 + $0x84] ss:$16 sps:$4 sm:$0xff]   ;;  %v5370_v58 = vld [vmem:[%s6887_s3 + $0x8c] ss:$16 sps:$4 sm:$0xff]  }
 0x144   : > { %v4374_v59 = vld [vmem:[%s5010_s26 + $0x10] sm:$0xff]   ;;  %v1173_v60 = vld [vmem:[%s5003_s16] sm:$0xff]  ;;  %v5388_v62 = vld [vmem:[%s6887_s3 + $0x88] ss:$16 sps:$4 sm:$0xff]   ;;  %s5516_s24 = scalar_lea.vmem [#allocation2], %s4136_s29  ;;  %s1170_s11 = ssub.s32 1, %s6932_s20 }
 0x145   : > { %v5383_v61 = vld [vmem:[%s6887_s3 + $0x80] ss:$16 sps:$4 sm:$0xff]   ;;  %vm1174_vm0 = vcmp.gt.s32.totalorder %v1173_v60, 0  ;;  %v4000_v63 = vadd.s32 4294967295, %v1173_v60  ;;  %v5396_v1 = vld [vmem:[%s6887_s3 + $0xa4] ss:$16 sps:$4 sm:$0xff]  }
 0x146   : > { %998 = vmatpush1.bf16.msra.mxu0 %v4328_v25  ;;  %1071 = vmatpush1.bf16.msra.mxu1 %v4329_v26  ;;  %v5401_v2 = vld [vmem:[%s6887_s3 + $0xac] ss:$16 sps:$4 sm:$0xff]   ;;  %v5411_v4 = vld [vmem:[%s6887_s3 + $0xa0] ss:$16 sps:$4 sm:$0xff]   ;;  %v5416_v5 = vld [vmem:[%s6887_s3 + $0xa8] ss:$16 sps:$4 sm:$0xff]  }
 0x147   : > { %999 = vmatprep.subr.bf16.mxu0 %v4330_v27  ;;  %1072 = vmatprep.subr.bf16.mxu1 %v4332_v28  ;;  %v5403_v3 = vsel %vm1174_vm0, %v4000_v63, 23  ;;  %v5424_v7 = vld [vmem:[%s6887_s3 + $0xc4] ss:$16 sps:$4 sm:$0xff]   ;;  %v5429_v9 = vld [vmem:[%s6887_s3 + $0xcc] ss:$16 sps:$4 sm:$0xff]   ;;  %s4137_s14 = sshll.u32 %s1170_s11, 8 }
 0x148   : > { %vm1517_vm1 = vcmp.eq.s32.totalorder %v5403_v3, %v1516_v0  ;;  %v4387_v10 = vld [vmem:[%s5010_s26 + $0x18] sm:$0xff]   ;;  %v5439_v11 = vld [vmem:[%s6887_s3 + $0xc0] ss:$16 sps:$4 sm:$0xff]   ;;  %v5451_v13 = vld [vmem:[%s6887_s3 + $0xe4] ss:$16 sps:$4 sm:$0xff]   ;;  %vm1645_vm2 = vcmp.eq.s32.totalorder %v5403_v3, %v1644_v19  ;;  %s5556_s18 = scalar_lea.vmem [#allocation2], %s4137_s14 }
 0x149   : > { %v1518_v6 = vsel %vm1517_vm1, 1, %v4876_v8  ;;  %v5444_v12 = vld [vmem:[%s6887_s3 + $0xc8] ss:$16 sps:$4 sm:$0xff]   ;;  %v5456_v14 = vld [vmem:[%s6887_s3 + $0xec] ss:$16 sps:$4 sm:$0xff]   ;;  %v1178_v17 = vld [vmem:[#allocation3] sm:$0xff] }
 0x14a   : > { %1000 = vmatpush1.bf16.msra.mxu0 %v4334_v29  ;;  %1073 = vmatpush1.bf16.msra.mxu1 %v4335_v30  ;;  %v5463_v15 = vld [vmem:[%s6887_s3 + $0xe0] ss:$16 sps:$4 sm:$0xff]   ;;  %v5468_v16 = vld [vmem:[%s6887_s3 + $0xe8] ss:$16 sps:$4 sm:$0xff]   ;;  %v1188_v18 = vpack.c.bf16 %v1178_v17, %v1178_v17  ;;  %v1646_v20 = vsel %vm1645_vm2, 1, %v4876_v8  ;;  %s1771_s23 = sadd.s32 2, %s5372_s10 }
 0x14b   : > { %1001 = vmatprep.subr.bf16.mxu0 %v4336_v31  ;;  %1074 = vmatprep.subr.bf16.mxu1 %v4338_v32  ;;  %s1899_s9 = sadd.s32 3, %s5372_s10  ;;  %s2027_s29 = sadd.s32 4, %s5372_s10 }
 0x14c   : > { %1520 = vperm.xlu0 %4298, %v1518_v6   ;;  %v1468_v6 = vlaneseq  ;;  %s2283_s11 = sadd.s32 6, %s5372_s10  ;;  %s2411_s14 = sadd.s32 7, %s5372_s10 }
 0x14e   : > { %1002 = vmatpush1.bf16.msra.mxu0 %v4340_v33  ;;  %1075 = vmatpush1.bf16.msra.mxu1 %v4341_v34 }
 0x14f   : > { %1003 = vmatprep.subr.bf16.mxu0 %v4342_v35  ;;  %1076 = vmatprep.subr.bf16.mxu1 %v4344_v36 }
 0x150   : > { %1648 = vperm.xlu0 %4298, %v1646_v20  }
 0x152   : > { %1004 = vmatpush1.bf16.msra.mxu0 %v4346_v37  ;;  %1077 = vmatpush1.bf16.msra.mxu1 %v4347_v38 }
 0x153   : > { %1381 = vmatprep.subr.bf16.mxu0 %v5266_v39  ;;  %1422 = vmatprep.subr.bf16.mxu1 %v5271_v40 }
 0x155   : > { %1022 = vmatmul.mubr.bf16.vlgmr.msra.gmra.mrb[0].mxu0 %v4348_v41  ;;  %1095 = vmatmul.mubr.bf16.vlgmr.msra.gmra.mrb[0].mxu1 %v4348_v41 }
 0x156   : > { %1382 = vmatpush1.bf16.msra.mxu0 %v5277_v42  ;;  %1423 = vmatpush1.bf16.msra.mxu1 %v5282_v43 }
 0x157   : > { %1383 = vmatprep.subr.bf16.mxu0 %v5289_v44  ;;  %1424 = vmatprep.subr.bf16.mxu1 %v5294_v45 }
 0x158   : > { %1031 = vmatprep.mubr.bf16.mxu0 %v4876_v8  ;;  %1104 = vmatprep.mubr.bf16.mxu1 %v4876_v8 }
 0x15a   : > { %1384 = vmatpush1.bf16.msra.mxu0 %v5299_v46  ;;  %1425 = vmatpush1.bf16.msra.mxu1 %v5306_v47 }
 0x15b   : > { %1385 = vmatprep.subr.bf16.mxu0 %v5313_v48  ;;  %1426 = vmatprep.subr.bf16.mxu1 %v5318_v49 }
 0x15d   : > { %1032 = vmatmul.mubr.bf16.gmra.mrb[4].mxu0 %v4361_v50  ;;  %1105 = vmatmul.mubr.bf16.gmra.mrb[4].mxu1 %v4361_v50 }
 0x15e   : > { %1386 = vmatpush1.bf16.msra.mxu0 %v5326_v51  ;;  %1427 = vmatpush1.bf16.msra.mxu1 %v5331_v52 }
 0x15f   : > { %1387 = vmatprep.subr.bf16.mxu0 %v5338_v53  ;;  %1428 = vmatprep.subr.bf16.mxu1 %v5345_v54 }
 0x160   : > { %1041 = vmatprep.mubr.bf16.mxu0 %v4876_v8  ;;  %1114 = vmatprep.mubr.bf16.mxu1 %v4876_v8 }
 0x162   : > { %1388 = vmatpush1.bf16.msra.mxu0 %v5351_v55  ;;  %1429 = vmatpush1.bf16.msra.mxu1 %v5356_v56 }
 0x163   : > { %1389 = vmatprep.subr.bf16.mxu0 %v5363_v57  ;;  %1430 = vmatprep.subr.bf16.mxu1 %v5370_v58 }
 0x165   : > { %1042 = vmatmul.mubr.bf16.gmra.mrb[8].mxu0 %v4374_v59  ;;  %1115 = vmatmul.mubr.bf16.gmra.mrb[8].mxu1 %v4374_v59 }
 0x166   : > { %1390 = vmatpush1.bf16.msra.mxu0 %v5383_v61  ;;  %1431 = vmatpush1.bf16.msra.mxu1 %v5388_v62 }
 0x167   : > { %1391 = vmatprep.subr.bf16.mxu0 %v5396_v1  ;;  %1432 = vmatprep.subr.bf16.mxu1 %v5401_v2 }
 0x168   : > { %1051 = vmatprep.mubr.bf16.mxu0 %v4876_v8  ;;  %1124 = vmatprep.mubr.bf16.mxu1 %v4876_v8 }
 0x16a   : > { %1392 = vmatpush1.bf16.msra.mxu0 %v5411_v4  ;;  %1433 = vmatpush1.bf16.msra.mxu1 %v5416_v5 }
 0x16b   : > { %1393 = vmatprep.subr.bf16.mxu0 %v5424_v7  ;;  %1434 = vmatprep.subr.bf16.mxu1 %v5429_v9 }
 0x16d   : > { %1052 = vmatmul.mubr.bf16.gmra.mrb[12].mxu0 %v4387_v10  ;;  %1125 = vmatmul.mubr.bf16.gmra.mrb[12].mxu1 %v4387_v10  ;;  %v1469_v10 = vshrl.u32 %v1468_v6, 7 }
 0x16e   : > { %1394 = vmatpush1.bf16.msra.mxu0 %v5439_v11  ;;  %1435 = vmatpush1.bf16.msra.mxu1 %v5444_v12 }
 0x16f   : > { %1395 = vmatprep.subr.bf16.mxu0 %v5451_v13  ;;  %1436 = vmatprep.subr.bf16.mxu1 %v5456_v14 }
 0x170   : > { %1413 = vmatprep.mubr.bf16.mxu0 %v4876_v8  ;;  %1454 = vmatprep.mubr.bf16.mxu1 %v4876_v8 }
 0x172   : > { %1396 = vmatpush1.bf16.msra.mxu0 %v5463_v15  ;;  %1437 = vmatpush1.bf16.msra.mxu1 %v5468_v16 }
 0x173   : > { %1529 = vmatprep.subr.bf16.mxu0 %v5266_v39  ;;  %1570 = vmatprep.subr.bf16.mxu1 %v5271_v40 }
 0x175   : > { %1414 = vmatmul.mubr.bf16.vlgmr.msra.gmra.mrb[16].mxu0 %v1188_v18  ;;  %1455 = vmatmul.mubr.bf16.vlgmr.msra.gmra.mrb[16].mxu1 %v1188_v18 }
 0x176   : > { %1530 = vmatpush1.bf16.msra.mxu0 %v5277_v42  ;;  %1571 = vmatpush1.bf16.msra.mxu1 %v5282_v43 }
 0x177   : > { %1531 = vmatprep.subr.bf16.mxu0 %v5289_v44  ;;  %1572 = vmatprep.subr.bf16.mxu1 %v5294_v45 }
 0x178   : > { %1561 = vmatprep.mubr.bf16.mxu0 %v4876_v8  ;;  %1602 = vmatprep.mubr.bf16.mxu1 %v4876_v8 }
 0x17a   : > { %1532 = vmatpush1.bf16.msra.mxu0 %v5299_v46  ;;  %1573 = vmatpush1.bf16.msra.mxu1 %v5306_v47 }
 0x17b   : > { %1533 = vmatprep.subr.bf16.mxu0 %v5313_v48  ;;  %1574 = vmatprep.subr.bf16.mxu1 %v5318_v49 }
 0x17e   : > { %1534 = vmatpush1.bf16.msra.mxu0 %v5326_v51  ;;  %1575 = vmatpush1.bf16.msra.mxu1 %v5331_v52 }
 0x17f   : > { %1535 = vmatprep.subr.bf16.mxu0 %v5338_v53  ;;  %1576 = vmatprep.subr.bf16.mxu1 %v5345_v54 }
 0x182   : > { %1536 = vmatpush1.bf16.msra.mxu0 %v5351_v55  ;;  %1577 = vmatpush1.bf16.msra.mxu1 %v5356_v56 }
 0x183   : > { %1537 = vmatprep.subr.bf16.mxu0 %v5363_v57  ;;  %1578 = vmatprep.subr.bf16.mxu1 %v5370_v58 }
 0x186   : > { %1538 = vmatpush1.bf16.msra.mxu0 %v5383_v61  ;;  %1579 = vmatpush1.bf16.msra.mxu1 %v5388_v62 }
 0x187   : > { %1539 = vmatprep.subr.bf16.mxu0 %v5396_v1  ;;  %1580 = vmatprep.subr.bf16.mxu1 %v5401_v2 }
 0x18a   : > { %1540 = vmatpush1.bf16.msra.mxu0 %v5411_v4  ;;  %1581 = vmatpush1.bf16.msra.mxu1 %v5416_v5 }
 0x18b   : > { %1541 = vmatprep.subr.bf16.mxu0 %v5424_v7  ;;  %1582 = vmatprep.subr.bf16.mxu1 %v5429_v9 }
 0x18e   : > { %1542 = vmatpush1.bf16.msra.mxu0 %v5439_v11  ;;  %1583 = vmatpush1.bf16.msra.mxu1 %v5444_v12 }
 0x18f   : > { %1543 = vmatprep.subr.bf16.mxu0 %v5451_v13  ;;  %1584 = vmatprep.subr.bf16.mxu1 %v5456_v14 }
 0x192   : > { %1544 = vmatpush1.bf16.msra.mxu0 %v5463_v15  ;;  %1585 = vmatpush1.bf16.msra.mxu1 %v5468_v16 }
 0x193   : > { %1657 = vmatprep.subr.bf16.mxu0 %v5266_v39  ;;  %1698 = vmatprep.subr.bf16.mxu1 %v5271_v40 }
 0x228   : > { %v1023_v21 = vpop.f32.mrb[0].mxu0  ;;  %v1096_v22 = vpop.f32.mrb[0].mxu1 }
 0x229   : > { %1138 = vst [vmem:[%s5516_s24] sm:$0xff] %v1023_v21  ;;  %v1025_v23 = vpop.f32.mrb[1].mxu0  ;;  %1140 = vst [vmem:[%s5516_s24 + $0x10] sm:$0xff] %v1096_v22  ;;  %v1098_v24 = vpop.f32.mrb[1].mxu1 }
 0x22a   : > { %1139 = vst [vmem:[%s5516_s24 + $0x8] sm:$0xff] %v1025_v23  ;;  %v1027_v25 = vpop.f32.mrb[2].mxu0  ;;  %1141 = vst [vmem:[%s5516_s24 + $0x18] sm:$0xff] %v1098_v24  ;;  %v1100_v26 = vpop.f32.mrb[2].mxu1 }
 0x22b   : > { %1142 = vst [vmem:[%s5516_s24 + $0x20] sm:$0xff] %v1027_v25  ;;  %v1029_v27 = vpop.f32.mrb[3].mxu0  ;;  %1144 = vst [vmem:[%s5516_s24 + $0x30] sm:$0xff] %v1100_v26  ;;  %v1102_v28 = vpop.f32.mrb[3].mxu1  ;;  %v1470_v25 = vsub.s32 0, %v1469_v10 }
 0x22c   : > { %1143 = vst [vmem:[%s5516_s24 + $0x28] sm:$0xff] %v1029_v27  ;;  %1145 = vst [vmem:[%s5516_s24 + $0x38] sm:$0xff] %v1102_v28  ;;  %v1172_v26 = vld [vmem:[%s6886_s2] sm:$0xf]  ;;  %v1474_v27 = vsub.s32 1, %v1469_v10 }
 0x22d   : > { %v5554_v28 = vrot.slane %v1172_v26, %v1470_v25 }
 0x230   : > { %v1033_v29 = vpop.f32.mrb[4].mxu0  ;;  %v1106_v30 = vpop.f32.mrb[4].mxu1 }
 0x231   : > { %1146 = vst [vmem:[%s5516_s24 + $0x40] sm:$0xff] %v1033_v29  ;;  %v1035_v31 = vpop.f32.mrb[5].mxu0  ;;  %1148 = vst [vmem:[%s5516_s24 + $0x50] sm:$0xff] %v1106_v30  ;;  %v1108_v32 = vpop.f32.mrb[5].mxu1 }
 0x232   : > { %1147 = vst [vmem:[%s5516_s24 + $0x48] sm:$0xff] %v1035_v31  ;;  %v1037_v33 = vpop.f32.mrb[6].mxu0  ;;  %1149 = vst [vmem:[%s5516_s24 + $0x58] sm:$0xff] %v1108_v32  ;;  %v1110_v34 = vpop.f32.mrb[6].mxu1  ;;  %v5559_v32 = vrot.slane %v1172_v26, %v1474_v27 }
 0x233   : > { %1150 = vst [vmem:[%s5516_s24 + $0x60] sm:$0xff] %v1037_v33  ;;  %v1039_v35 = vpop.f32.mrb[7].mxu0  ;;  %1152 = vst [vmem:[%s5516_s24 + $0x70] sm:$0xff] %v1110_v34  ;;  %v1112_v36 = vpop.f32.mrb[7].mxu1 }
 0x234   : > { %1151 = vst [vmem:[%s5516_s24 + $0x68] sm:$0xff] %v1039_v35  ;;  %1153 = vst [vmem:[%s5516_s24 + $0x78] sm:$0xff] %v1112_v36 }
 0x238   : > { %v1043_v37 = vpop.f32.mrb[8].mxu0  ;;  %v1116_v38 = vpop.f32.mrb[8].mxu1 }
 0x239   : > { %1154 = vst [vmem:[%s5516_s24 + $0x80] sm:$0xff] %v1043_v37  ;;  %v1045_v41 = vpop.f32.mrb[9].mxu0  ;;  %1156 = vst [vmem:[%s5516_s24 + $0x90] sm:$0xff] %v1116_v38  ;;  %v1118_v50 = vpop.f32.mrb[9].mxu1 }
 0x23a   : > { %1155 = vst [vmem:[%s5516_s24 + $0x88] sm:$0xff] %v1045_v41  ;;  %v1047_v59 = vpop.f32.mrb[10].mxu0  ;;  %1157 = vst [vmem:[%s5516_s24 + $0x98] sm:$0xff] %v1118_v50  ;;  %v1120_v60 = vpop.f32.mrb[10].mxu1 }
 0x23b   : > { %1158 = vst [vmem:[%s5516_s24 + $0xa0] sm:$0xff] %v1047_v59  ;;  %v1049_v63 = vpop.f32.mrb[11].mxu0  ;;  %1160 = vst [vmem:[%s5516_s24 + $0xb0] sm:$0xff] %v1120_v60  ;;  %v1122_v0 = vpop.f32.mrb[11].mxu1  ;;  %v1478_v59 = vsub.s32 2, %v1469_v10 }
 0x23c   : > { %1159 = vst [vmem:[%s5516_s24 + $0xa8] sm:$0xff] %v1049_v63  ;;  %1161 = vst [vmem:[%s5516_s24 + $0xb8] sm:$0xff] %v1122_v0 }
 0x240   : > { %v1053_v17 = vpop.f32.mrb[12].mxu0  ;;  %v1126_v18 = vpop.f32.mrb[12].mxu1 }
 0x241   : > { %1162 = vst [vmem:[%s5516_s24 + $0xc0] sm:$0xff] %v1053_v17  ;;  %v1055_v19 = vpop.f32.mrb[13].mxu0  ;;  %1164 = vst [vmem:[%s5516_s24 + $0xd0] sm:$0xff] %v1126_v18  ;;  %v1128_v20 = vpop.f32.mrb[13].mxu1 }
 0x242   : > { %1163 = vst [vmem:[%s5516_s24 + $0xc8] sm:$0xff] %v1055_v19  ;;  %v1057_v21 = vpop.f32.mrb[14].mxu0  ;;  %1165 = vst [vmem:[%s5516_s24 + $0xd8] sm:$0xff] %v1128_v20  ;;  %v1130_v22 = vpop.f32.mrb[14].mxu1  ;;  %v1482_v19 = vsub.s32 3, %v1469_v10 }
 0x243   : > { %1166 = vst [vmem:[%s5516_s24 + $0xe0] sm:$0xff] %v1057_v21  ;;  %v1059_v23 = vpop.f32.mrb[15].mxu0  ;;  %1168 = vst [vmem:[%s5516_s24 + $0xf0] sm:$0xff] %v1130_v22  ;;  %v1132_v24 = vpop.f32.mrb[15].mxu1  ;;  %v5565_v21 = vrot.slane %v1172_v26, %v1478_v59 }
 0x244   : > { %1167 = vst [vmem:[%s5516_s24 + $0xe8] sm:$0xff] %v1059_v23  ;;  %1169 = vst [vmem:[%s5516_s24 + $0xf8] sm:$0xff] %v1132_v24  ;;  %v5568_v24 = vrot.slane %v1172_v26, %v1482_v19  ;;  %s2155_s24 = sadd.s32 5, %s5372_s10 }
 0x248   : > { %v1415_v30 = vpop.f32.mrb[16].mxu0  ;;  %v1456_v31 = vpop.f32.mrb[16].mxu1 }
 0x249   : > { %v1417_v35 = vpop.f32.mrb[17].mxu0  ;;  %v1458_v36 = vpop.f32.mrb[17].mxu1 }
 0x24a   : > { %v1419_v38 = vpop.f32.mrb[18].mxu0  ;;  %v1460_v41 = vpop.f32.mrb[18].mxu1 }
 0x24b   : > { %v1184_v29 = vld [vmem:[%s5556_s18] sm:$0xff]  ;;  %v1185_v34 = vld [vmem:[%s5556_s18 + $0x8] sm:$0xff]  ;;  %v1420_v60 = vpop.f32.mrb[19].mxu0  ;;  %v1461_v63 = vpop.f32.mrb[19].mxu1  ;;  %v1186_v17 = vld [vmem:[%s5556_s18 + $0x10] sm:$0xff] }
 0x24c   : > { %v1463_v33 = vadd.f32 %v1415_v30, %v1184_v29  ;;  %v1464_v37 = vadd.f32 %v1417_v35, %v1185_v34  ;;  %v1465_v20 = vadd.f32 %v1456_v31, %v1186_v17  ;;  %v1187_v22 = vld [vmem:[%s5556_s18 + $0x18] sm:$0xff]  ;;  %v1179_v38 = vld [vmem:[#allocation4] sm:$0xff]  ;;  %v1772_v17 = vstv %s1771_s23  ;;  %v1524_v19 = vld [vmem:[%s5556_s18 + $0x20] sm:$0xff] }
 0x24d   : > { %v1466_v23 = vadd.f32 %v1458_v36, %v1187_v22  ;;  %vm1773_vm3 = vcmp.eq.s32.totalorder %v5403_v3, %v1772_v17  ;;  %v1526_v22 = vld [vmem:[%s5556_s18 + $0x30] sm:$0xff] }
 0x24e   : > { %v1488_v50 = vadd.f32 %v5554_v28, %v1463_v33  ;;  %v1489_v0 = vadd.f32 %v5559_v32, %v1464_v37  ;;  %v1490_v25 = vadd.f32 %v5565_v21, %v1465_v20 }
 0x24f   : > { %v1491_v27 = vadd.f32 %v5568_v24, %v1466_v23 }
 0x250   : > { %v4036_v6 = vmul.f32 -1.442695, %v1488_v50  ;;  %v4037_v18 = vmul.f32 -1.442695, %v1489_v0  ;;  %v4038_v29 = vmul.f32 -1.442695, %v1490_v25 }
 0x252   : > { %4400 = vpow2.f32 %v4036_v6 }
 0x253   : > { %4402 = vpow2.f32 %v4037_v18  ;;  %v1774_v18 = vsel %vm1773_vm3, 1, %v4876_v8 }
 0x254   : > { %4404 = vtanh.f32 %v1491_v27  ;;  %1776 = vperm.xlu1 %4299, %v1774_v18  }
 0x255   : > { %4406 = vpow2.f32 %v4038_v29  ;;  %v1525_v29 = vld [vmem:[%s5556_s18 + $0x28] sm:$0xff] }
 0x25c   : > { %v4401_v30 = vpop.eup %4400 }
 0x25d   : > { %v1501_v33 = vadd.f32 1.0, %v4401_v30  ;;  %v4403_v34 = vpop.eup %4402 }
 0x25e   : > { %v1502_v10 = vadd.f32 1.0, %v4403_v34  ;;  %v4405_v31 = vpop.eup %4404 }
 0x25f   : > { %4408 = vrcp.f32 %v1501_v33  ;;  %v4407_v35 = vpop.eup %4406  ;;  %v1527_v33 = vld [vmem:[%s5556_s18 + $0x38] sm:$0xff] }
 0x260   : > { %4410 = vrcp.f32 %v1502_v10  ;;  %v1503_v41 = vadd.f32 1.0, %v4407_v35 }
 0x262   : > { %4412 = vrcp.f32 %v1503_v41 }
 0x269   : > { %v4409_v37 = vpop.eup %4408 }
 0x26a   : > { %v1512_v36 = vmul.f32 %v4409_v37, %v4405_v31  ;;  %v4411_v26 = vpop.eup %4410 }
 0x26b   : > { %v1511_v50 = vmul.f32 %v4411_v26, %v1179_v38 }
 0x26c   : > { %v4413_v60 = vpop.eup %4412 }
 0x26d   : > { %v5572_v59 = vadd.f32 %v1512_v36, %v1511_v50 }
 0x26f   : > { %4414 = vtanh.f32 %v5572_v59 }
 0x279   : > { %v4415_v63 = vpop.eup %4414 }
 0x27a   : > { %v5575_v0 = vmul.f32 %v4415_v63, %v4413_v60 }
 0x27c   : > { %v1528_v6 = vpack.c.bf16 %v5575_v0, %v5575_v0 }
 0x27e   : > { %1562 = vmatmul.mubr.bf16.vlgmr.msra.gmra.mrb[20].mxu0 %v1528_v6  ;;  %1603 = vmatmul.mubr.bf16.vlgmr.msra.gmra.mrb[20].mxu1 %v1528_v6 }
 0x27f   : > { %1658 = vmatpush1.bf16.msra.mxu0 %v5277_v42  ;;  %1699 = vmatpush1.bf16.msra.mxu1 %v5282_v43 }
 0x280   : > { %1659 = vmatprep.subr.bf16.mxu0 %v5289_v44  ;;  %1700 = vmatprep.subr.bf16.mxu1 %v5294_v45 }
 0x281   : > { %1689 = vmatprep.mubr.bf16.mxu0 %v4876_v8  ;;  %1730 = vmatprep.mubr.bf16.mxu1 %v4876_v8 }
 0x283   : > { %1660 = vmatpush1.bf16.msra.mxu0 %v5299_v46  ;;  %1701 = vmatpush1.bf16.msra.mxu1 %v5306_v47 }
 0x284   : > { %1661 = vmatprep.subr.bf16.mxu0 %v5313_v48  ;;  %1702 = vmatprep.subr.bf16.mxu1 %v5318_v49 }
 0x287   : > { %1662 = vmatpush1.bf16.msra.mxu0 %v5326_v51  ;;  %1703 = vmatpush1.bf16.msra.mxu1 %v5331_v52 }
 0x288   : > { %1663 = vmatprep.subr.bf16.mxu0 %v5338_v53  ;;  %1704 = vmatprep.subr.bf16.mxu1 %v5345_v54 }
 0x28b   : > { %1664 = vmatpush1.bf16.msra.mxu0 %v5351_v55  ;;  %1705 = vmatpush1.bf16.msra.mxu1 %v5356_v56 }
 0x28c   : > { %1665 = vmatprep.subr.bf16.mxu0 %v5363_v57  ;;  %1706 = vmatprep.subr.bf16.mxu1 %v5370_v58 }
 0x28f   : > { %1666 = vmatpush1.bf16.msra.mxu0 %v5383_v61  ;;  %1707 = vmatpush1.bf16.msra.mxu1 %v5388_v62 }
 0x290   : > { %1667 = vmatprep.subr.bf16.mxu0 %v5396_v1  ;;  %1708 = vmatprep.subr.bf16.mxu1 %v5401_v2 }
 0x293   : > { %1668 = vmatpush1.bf16.msra.mxu0 %v5411_v4  ;;  %1709 = vmatpush1.bf16.msra.mxu1 %v5416_v5 }
 0x294   : > { %1669 = vmatprep.subr.bf16.mxu0 %v5424_v7  ;;  %1710 = vmatprep.subr.bf16.mxu1 %v5429_v9 }
 0x297   : > { %1670 = vmatpush1.bf16.msra.mxu0 %v5439_v11  ;;  %1711 = vmatpush1.bf16.msra.mxu1 %v5444_v12 }
 0x298   : > { %1671 = vmatprep.subr.bf16.mxu0 %v5451_v13  ;;  %1712 = vmatprep.subr.bf16.mxu1 %v5456_v14 }
 0x29b   : > { %1672 = vmatpush1.bf16.msra.mxu0 %v5463_v15  ;;  %1713 = vmatpush1.bf16.msra.mxu1 %v5468_v16 }
 0x29c   : > { %1785 = vmatprep.subr.bf16.mxu0 %v5266_v39  ;;  %1826 = vmatprep.subr.bf16.mxu1 %v5271_v40 }
 0x351   : > { %v1563_v20 = vpop.f32.mrb[20].mxu0  ;;  %v1604_v23 = vpop.f32.mrb[20].mxu1 }
 0x352   : > { %v1611_v25 = vadd.f32 %v1563_v20, %v1524_v19  ;;  %v1613_v27 = vadd.f32 %v1604_v23, %v1526_v22  ;;  %v1565_v30 = vpop.f32.mrb[21].mxu0  ;;  %v1606_v34 = vpop.f32.mrb[21].mxu1 }
 0x353   : > { %v1612_v10 = vadd.f32 %v1565_v30, %v1525_v29  ;;  %v1614_v31 = vadd.f32 %v1606_v34, %v1527_v33  ;;  %v1567_v35 = vpop.f32.mrb[22].mxu0  ;;  %v1608_v37 = vpop.f32.mrb[22].mxu1 }
 0x354   : > { %v1615_v38 = vadd.f32 %v1611_v25, %v5554_v28  ;;  %v1568_v36 = vpop.f32.mrb[23].mxu0  ;;  %v1609_v26 = vpop.f32.mrb[23].mxu1  ;;  %v1617_v63 = vadd.f32 %v1613_v27, %v5565_v21 }
 0x355   : > { %v1616_v41 = vadd.f32 %v1612_v10, %v5559_v32  ;;  %v1618_v6 = vadd.f32 %v1614_v31, %v5568_v24  ;;  %v1521_v31 = vpop.permute.xlu0 %1520 }
 0x356   : > { %v4039_v50 = vmul.f32 -1.442695, %v1615_v38  ;;  %v4041_v17 = vmul.f32 -1.442695, %v1617_v63  ;;  %v1180_v38 = vld [vmem:[#allocation5] sm:$0xff]  ;;  %vm1522_vm4 = vcmp.eq.s32.totalorder %v1521_v31, 1 }
 0x357   : > { %v4040_v60 = vmul.f32 -1.442695, %v1616_v41  ;;  %v1523_v41 = vsel %vm1522_vm4, %v5575_v0, %v1180_v38  ;;  %v1652_v63 = vld [vmem:[%s5556_s18 + $0x40] sm:$0xff] }
 0x358   : > { %4416 = vpow2.f32 %v4039_v50 }
 0x359   : > { %4418 = vpow2.f32 %v4040_v60  ;;  %v1649_v35 = vpop.permute.xlu0 %1648 }
 0x35a   : > { %4420 = vtanh.f32 %v1618_v6  ;;  %vm1650_vm5 = vcmp.eq.s32.totalorder %v1649_v35, 1 }
 0x35b   : > { %4422 = vpow2.f32 %v4041_v17  ;;  %v1654_v17 = vld [vmem:[%s5556_s18 + $0x50] sm:$0xff] }
 0x362   : > { %v4417_v18 = vpop.eup %4416 }
 0x363   : > { %v1628_v19 = vadd.f32 1.0, %v4417_v18  ;;  %v4419_v20 = vpop.eup %4418 }
 0x364   : > { %v1629_v22 = vadd.f32 1.0, %v4419_v20  ;;  %v4421_v23 = vpop.eup %4420 }
 0x365   : > { %4424 = vrcp.f32 %v1628_v19  ;;  %v4423_v25 = vpop.eup %4422 }
 0x366   : > { %4426 = vrcp.f32 %v1629_v22  ;;  %v1630_v34 = vadd.f32 1.0, %v4423_v25  ;;  %v1653_v22 = vld [vmem:[%s5556_s18 + $0x48] sm:$0xff]  ;;  %v1655_v25 = vld [vmem:[%s5556_s18 + $0x58] sm:$0xff] }
 0x368   : > { %4428 = vrcp.f32 %v1630_v34 }
 0x36f   : > { %v4425_v29 = vpop.eup %4424 }
 0x370   : > { %v1639_v30 = vmul.f32 %v4425_v29, %v4421_v23  ;;  %v4427_v33 = vpop.eup %4426 }
 0x371   : > { %v1638_v10 = vmul.f32 %v4427_v33, %v5572_v59  ;;  %v1900_v59 = vstv %s1899_s9 }
 0x372   : > { %v4429_v37 = vpop.eup %4428  ;;  %vm1901_vm6 = vcmp.eq.s32.totalorder %v5403_v3, %v1900_v59 }
 0x373   : > { %v5625_v27 = vadd.f32 %v1639_v30, %v1638_v10  ;;  %v1902_v0 = vsel %vm1901_vm6, 1, %v4876_v8 }
 0x374   : > { %1904 = vperm.xlu1 %4299, %v1902_v0  }
 0x375   : > { %4430 = vtanh.f32 %v5625_v27 }
 0x37f   : > { %v4431_v36 = vpop.eup %4430 }
 0x380   : > { %v1642_v26 = vmul.f32 %v4431_v36, %v4429_v37 }
 0x382   : > { %v5629_v50 = vsel %vm1650_vm5, %v1642_v26, %v1523_v41  ;;  %v1656_v60 = vpack.c.bf16 %v1642_v26, %v1642_v26 }
 0x384   : > { %1690 = vmatmul.mubr.bf16.vlgmr.msra.gmra.mrb[24].mxu0 %v1656_v60  ;;  %1731 = vmatmul.mubr.bf16.vlgmr.msra.gmra.mrb[24].mxu1 %v1656_v60 }
 0x385   : > { %1786 = vmatpush1.bf16.msra.mxu0 %v5277_v42  ;;  %1827 = vmatpush1.bf16.msra.mxu1 %v5282_v43 }
 0x386   : > { %1787 = vmatprep.subr.bf16.mxu0 %v5289_v44  ;;  %1828 = vmatprep.subr.bf16.mxu1 %v5294_v45 }
 0x387   : > { %1817 = vmatprep.mubr.bf16.mxu0 %v4876_v8  ;;  %1858 = vmatprep.mubr.bf16.mxu1 %v4876_v8 }
 0x389   : > { %1788 = vmatpush1.bf16.msra.mxu0 %v5299_v46  ;;  %1829 = vmatpush1.bf16.msra.mxu1 %v5306_v47 }
 0x38a   : > { %1789 = vmatprep.subr.bf16.mxu0 %v5313_v48  ;;  %1830 = vmatprep.subr.bf16.mxu1 %v5318_v49 }
 0x38d   : > { %1790 = vmatpush1.bf16.msra.mxu0 %v5326_v51  ;;  %1831 = vmatpush1.bf16.msra.mxu1 %v5331_v52 }
 0x38e   : > { %1791 = vmatprep.subr.bf16.mxu0 %v5338_v53  ;;  %1832 = vmatprep.subr.bf16.mxu1 %v5345_v54 }
 0x391   : > { %1792 = vmatpush1.bf16.msra.mxu0 %v5351_v55  ;;  %1833 = vmatpush1.bf16.msra.mxu1 %v5356_v56 }
 0x392   : > { %1793 = vmatprep.subr.bf16.mxu0 %v5363_v57  ;;  %1834 = vmatprep.subr.bf16.mxu1 %v5370_v58 }
 0x395   : > { %1794 = vmatpush1.bf16.msra.mxu0 %v5383_v61  ;;  %1835 = vmatpush1.bf16.msra.mxu1 %v5388_v62 }
 0x396   : > { %1795 = vmatprep.subr.bf16.mxu0 %v5396_v1  ;;  %1836 = vmatprep.subr.bf16.mxu1 %v5401_v2 }
 0x399   : > { %1796 = vmatpush1.bf16.msra.mxu0 %v5411_v4  ;;  %1837 = vmatpush1.bf16.msra.mxu1 %v5416_v5 }
 0x39a   : > { %1797 = vmatprep.subr.bf16.mxu0 %v5424_v7  ;;  %1838 = vmatprep.subr.bf16.mxu1 %v5429_v9 }
 0x39d   : > { %1798 = vmatpush1.bf16.msra.mxu0 %v5439_v11  ;;  %1839 = vmatpush1.bf16.msra.mxu1 %v5444_v12 }
 0x39e   : > { %1799 = vmatprep.subr.bf16.mxu0 %v5451_v13  ;;  %1840 = vmatprep.subr.bf16.mxu1 %v5456_v14 }
 0x3a1   : > { %1800 = vmatpush1.bf16.msra.mxu0 %v5463_v15  ;;  %1841 = vmatpush1.bf16.msra.mxu1 %v5468_v16 }
 0x3a2   : > { %1913 = vmatprep.subr.bf16.mxu0 %v5266_v39  ;;  %1954 = vmatprep.subr.bf16.mxu1 %v5271_v40 }
 0x457   : > { %v1691_v6 = vpop.f32.mrb[24].mxu0  ;;  %v1732_v18 = vpop.f32.mrb[24].mxu1 }
 0x458   : > { %v1739_v19 = vadd.f32 %v1691_v6, %v1652_v63  ;;  %v1741_v20 = vadd.f32 %v1732_v18, %v1654_v17  ;;  %v1693_v23 = vpop.f32.mrb[25].mxu0  ;;  %v1734_v29 = vpop.f32.mrb[25].mxu1 }
 0x459   : > { %v1740_v39 = vadd.f32 %v1693_v23, %v1653_v22  ;;  %v1742_v30 = vadd.f32 %v1734_v29, %v1655_v25  ;;  %v1695_v40 = vpop.f32.mrb[26].mxu0  ;;  %v1736_v33 = vpop.f32.mrb[26].mxu1 }
 0x45a   : > { %v1743_v34 = vadd.f32 %v1739_v19, %v5554_v28  ;;  %v1696_v10 = vpop.f32.mrb[27].mxu0  ;;  %v1737_v31 = vpop.f32.mrb[27].mxu1  ;;  %v1745_v36 = vadd.f32 %v1741_v20, %v5565_v21 }
 0x45b   : > { %v1744_v35 = vadd.f32 %v1740_v39, %v5559_v32  ;;  %v1746_v26 = vadd.f32 %v1742_v30, %v5568_v24  ;;  %v1777_v29 = vpop.permute.xlu1 %1776 }
 0x45c   : > { %v4042_v37 = vmul.f32 -1.442695, %v1743_v34  ;;  %v4044_v41 = vmul.f32 -1.442695, %v1745_v36  ;;  %vm1778_vm7 = vcmp.eq.s32.totalorder %v1777_v29, 1 }
 0x45d   : > { %v4043_v38 = vmul.f32 -1.442695, %v1744_v35 }
 0x45e   : > { %4432 = vpow2.f32 %v4042_v37 }
 0x45f   : > { %4434 = vpow2.f32 %v4043_v38  ;;  %v1905_v29 = vpop.permute.xlu1 %1904 }
 0x460   : > { %4436 = vtanh.f32 %v1746_v26  ;;  %vm1906_vm9 = vcmp.eq.s32.totalorder %v1905_v29, 1 }
 0x461   : > { %4438 = vpow2.f32 %v4044_v41 }
 0x468   : > { %v4433_v60 = vpop.eup %4432 }
 0x469   : > { %v1756_v59 = vadd.f32 1.0, %v4433_v60  ;;  %v4435_v0 = vpop.eup %4434 }
 0x46a   : > { %v1757_v63 = vadd.f32 1.0, %v4435_v0  ;;  %v4437_v6 = vpop.eup %4436 }
 0x46b   : > { %4440 = vrcp.f32 %v1756_v59  ;;  %v4439_v17 = vpop.eup %4438 }
 0x46c   : > { %4442 = vrcp.f32 %v1757_v63  ;;  %v1758_v23 = vadd.f32 1.0, %v4439_v17 }
 0x46e   : > { %4444 = vrcp.f32 %v1758_v23 }
 0x475   : > { %v4441_v18 = vpop.eup %4440 }
 0x476   : > { %v1767_v19 = vmul.f32 %v4441_v18, %v4437_v6  ;;  %v4443_v22 = vpop.eup %4442 }
 0x477   : > { %v1766_v25 = vmul.f32 %v4443_v22, %v5625_v27 }
 0x478   : > { %v4445_v39 = vpop.eup %4444 }
 0x479   : > { %v5677_v20 = vadd.f32 %v1767_v19, %v1766_v25 }
 0x47b   : > { %4446 = vtanh.f32 %v5677_v20 }
 0x485   : > { %v4447_v30 = vpop.eup %4446 }
 0x486   : > { %v1770_v40 = vmul.f32 %v4447_v30, %v4445_v39 }
 0x488   : > { %v5681_v33 = vsel %vm1778_vm7, %v1770_v40, %v5629_v50  ;;  %v1784_v34 = vpack.c.bf16 %v1770_v40, %v1770_v40 }
 0x48a   : > { %1818 = vmatmul.mubr.bf16.vlgmr.msra.gmra.mrb[28].mxu0 %v1784_v34  ;;  %1859 = vmatmul.mubr.bf16.vlgmr.msra.gmra.mrb[28].mxu1 %v1784_v34 }
 0x48b   : > { %1914 = vmatpush1.bf16.msra.mxu0 %v5277_v42  ;;  %1955 = vmatpush1.bf16.msra.mxu1 %v5282_v43  ;;  %v5718_v42 = vld [vmem:[%s6887_s3 + $0x4] ss:$16 sps:$4 sm:$0xff]   ;;  %v5724_v43 = vld [vmem:[%s6887_s3 + $0xc] ss:$16 sps:$4 sm:$0xff]  }
 0x48c   : > { %1915 = vmatprep.subr.bf16.mxu0 %v5289_v44  ;;  %1956 = vmatprep.subr.bf16.mxu1 %v5294_v45  ;;  %v2028_v44 = vstv %s2027_s29 }
 0x48d   : > { %1945 = vmatprep.mubr.bf16.mxu0 %v4876_v8  ;;  %1986 = vmatprep.mubr.bf16.mxu1 %v4876_v8  ;;  %vm2029_vm8 = vcmp.eq.s32.totalorder %v5403_v3, %v2028_v44 }
 0x48e   : > { %v2030_v45 = vsel %vm2029_vm8, 1, %v4876_v8 }
 0x48f   : > { %1916 = vmatpush1.bf16.msra.mxu0 %v5299_v46  ;;  %1957 = vmatpush1.bf16.msra.mxu1 %v5306_v47  ;;  %v1780_v46 = vld [vmem:[%s5556_s18 + $0x60] sm:$0xff] }
 0x490   : > { %1917 = vmatprep.subr.bf16.mxu0 %v5313_v48  ;;  %1958 = vmatprep.subr.bf16.mxu1 %v5318_v49  ;;  %v1782_v48 = vld [vmem:[%s5556_s18 + $0x70] sm:$0xff] }
 0x491   : > { %2032 = vperm.xlu0 %4298, %v2030_v45   ;;  %v5754_v45 = vld [vmem:[%s6887_s3 + $0x8] ss:$16 sps:$4 sm:$0xff]  }
 0x493   : > { %1918 = vmatpush1.bf16.msra.mxu0 %v5326_v51  ;;  %1959 = vmatpush1.bf16.msra.mxu1 %v5331_v52 }
 0x494   : > { %1919 = vmatprep.subr.bf16.mxu0 %v5338_v53  ;;  %1960 = vmatprep.subr.bf16.mxu1 %v5345_v54  ;;  %v1781_v53 = vld [vmem:[%s5556_s18 + $0x68] sm:$0xff] }
 0x497   : > { %1920 = vmatpush1.bf16.msra.mxu0 %v5351_v55  ;;  %1961 = vmatpush1.bf16.msra.mxu1 %v5356_v56  ;;  %v1783_v55 = vld [vmem:[%s5556_s18 + $0x78] sm:$0xff] }
 0x498   : > { %1921 = vmatprep.subr.bf16.mxu0 %v5363_v57  ;;  %1962 = vmatprep.subr.bf16.mxu1 %v5370_v58 }
 0x49b   : > { %1922 = vmatpush1.bf16.msra.mxu0 %v5383_v61  ;;  %1963 = vmatpush1.bf16.msra.mxu1 %v5388_v62 }
 0x49c   : > { %1923 = vmatprep.subr.bf16.mxu0 %v5396_v1  ;;  %1964 = vmatprep.subr.bf16.mxu1 %v5401_v2 }
 0x49f   : > { %1924 = vmatpush1.bf16.msra.mxu0 %v5411_v4  ;;  %1965 = vmatpush1.bf16.msra.mxu1 %v5416_v5 }
 0x4a0   : > { %1925 = vmatprep.subr.bf16.mxu0 %v5424_v7  ;;  %1966 = vmatprep.subr.bf16.mxu1 %v5429_v9 }
 0x4a3   : > { %1926 = vmatpush1.bf16.msra.mxu0 %v5439_v11  ;;  %1967 = vmatpush1.bf16.msra.mxu1 %v5444_v12 }
 0x4a4   : > { %1927 = vmatprep.subr.bf16.mxu0 %v5451_v13  ;;  %1968 = vmatprep.subr.bf16.mxu1 %v5456_v14 }
 0x4a7   : > { %1928 = vmatpush1.bf16.msra.mxu0 %v5463_v15  ;;  %1969 = vmatpush1.bf16.msra.mxu1 %v5468_v16 }
 0x4a8   : > { %2041 = vmatprep.subr.bf16.mxu0 %v5718_v42  ;;  %2082 = vmatprep.subr.bf16.mxu1 %v5724_v43 }
 0x55d   : > { %v1819_v47 = vpop.f32.mrb[28].mxu0  ;;  %v1860_v49 = vpop.f32.mrb[28].mxu1 }
 0x55e   : > { %v1867_v51 = vadd.f32 %v1819_v47, %v1780_v46  ;;  %v1869_v52 = vadd.f32 %v1860_v49, %v1782_v48  ;;  %v1821_v54 = vpop.f32.mrb[29].mxu0  ;;  %v1862_v56 = vpop.f32.mrb[29].mxu1  ;;  %v5766_v46 = vld [vmem:[%s6887_s3 + $0x2c] ss:$16 sps:$4 sm:$0xff]   ;;  %v5774_v47 = vld [vmem:[%s6887_s3 + $0x20] ss:$16 sps:$4 sm:$0xff]  }
 0x55f   : > { %v1868_v57 = vadd.f32 %v1821_v54, %v1781_v53  ;;  %v1870_v58 = vadd.f32 %v1862_v56, %v1783_v55  ;;  %v1823_v61 = vpop.f32.mrb[30].mxu0  ;;  %v1864_v62 = vpop.f32.mrb[30].mxu1  ;;  %v5780_v48 = vld [vmem:[%s6887_s3 + $0x28] ss:$16 sps:$4 sm:$0xff]   ;;  %v5786_v49 = vld [vmem:[%s6887_s3 + $0x44] ss:$16 sps:$4 sm:$0xff]  }
 0x560   : > { %v1871_v27 = vadd.f32 %v1867_v51, %v5554_v28  ;;  %v1824_v50 = vpop.f32.mrb[31].mxu0  ;;  %v1865_v10 = vpop.f32.mrb[31].mxu1  ;;  %v1873_v38 = vadd.f32 %v1869_v52, %v5565_v21  ;;  %v5792_v51 = vld [vmem:[%s6887_s3 + $0x4c] ss:$16 sps:$4 sm:$0xff]   ;;  %v5798_v52 = vld [vmem:[%s6887_s3 + $0x40] ss:$16 sps:$4 sm:$0xff]  }
 0x561   : > { %v1872_v31 = vadd.f32 %v1868_v57, %v5559_v32  ;;  %v1874_v36 = vadd.f32 %v1870_v58, %v5568_v24  ;;  %v5804_v53 = vld [vmem:[%s6887_s3 + $0x48] ss:$16 sps:$4 sm:$0xff]   ;;  %v5810_v54 = vld [vmem:[%s6887_s3 + $0x64] ss:$16 sps:$4 sm:$0xff]   ;;  %v5816_v55 = vld [vmem:[%s6887_s3 + $0x6c] ss:$16 sps:$4 sm:$0xff]  }
 0x562   : > { %v4045_v35 = vmul.f32 -1.442695, %v1871_v27  ;;  %v4047_v26 = vmul.f32 -1.442695, %v1873_v38  ;;  %v5822_v56 = vld [vmem:[%s6887_s3 + $0x60] ss:$16 sps:$4 sm:$0xff]  }
 0x563   : > { %v4046_v37 = vmul.f32 -1.442695, %v1872_v31  ;;  %v5828_v57 = vld [vmem:[%s6887_s3 + $0x68] ss:$16 sps:$4 sm:$0xff]   ;;  %v5834_v58 = vld [vmem:[%s6887_s3 + $0x84] ss:$16 sps:$4 sm:$0xff]  }
 0x564   : > { %4448 = vpow2.f32 %v4045_v35  ;;  %v5840_v61 = vld [vmem:[%s6887_s3 + $0x8c] ss:$16 sps:$4 sm:$0xff]   ;;  %v5846_v62 = vld [vmem:[%s6887_s3 + $0x80] ss:$16 sps:$4 sm:$0xff]   ;;  %v5852_v27 = vld [vmem:[%s6887_s3 + $0x88] ss:$16 sps:$4 sm:$0xff]  }
 0x565   : > { %4450 = vpow2.f32 %v4046_v37 }
 0x566   : > { %4452 = vtanh.f32 %v1874_v36 }
 0x567   : > { %4454 = vpow2.f32 %v4047_v26 }
 0x56e   : > { %v4449_v41 = vpop.eup %4448 }
 0x56f   : > { %v1884_v60 = vadd.f32 1.0, %v4449_v41  ;;  %v4451_v59 = vpop.eup %4450 }
 0x570   : > { %v1885_v0 = vadd.f32 1.0, %v4451_v59  ;;  %v4453_v63 = vpop.eup %4452 }
 0x571   : > { %4456 = vrcp.f32 %v1884_v60  ;;  %v4455_v6 = vpop.eup %4454 }
 0x572   : > { %4458 = vrcp.f32 %v1885_v0  ;;  %v1886_v22 = vadd.f32 1.0, %v4455_v6 }
 0x574   : > { %4460 = vrcp.f32 %v1886_v22 }
 0x57b   : > { %v4457_v17 = vpop.eup %4456 }
 0x57c   : > { %v1895_v18 = vmul.f32 %v4457_v17, %v4453_v63  ;;  %v4459_v19 = vpop.eup %4458 }
 0x57d   : > { %v1894_v23 = vmul.f32 %v4459_v19, %v5677_v20  ;;  %v5748_v20 = vld [vmem:[%s6887_s3] ss:$16 sps:$4 sm:$0xff]  }
 0x57e   : > { %v4461_v39 = vpop.eup %4460 }
 0x57f   : > { %v5739_v25 = vadd.f32 %v1895_v18, %v1894_v23 }
 0x581   : > { %4462 = vtanh.f32 %v5739_v25 }
 0x58b   : > { %v4463_v30 = vpop.eup %4462 }
 0x58c   : > { %v1898_v40 = vmul.f32 %v4463_v30, %v4461_v39 }
 0x58e   : > { %v5743_v34 = vsel %vm1906_vm9, %v1898_v40, %v5681_v33  ;;  %v1912_v44 = vpack.c.bf16 %v1898_v40, %v1898_v40  ;;  %v5760_v33 = vld [vmem:[%s6887_s3 + $0x24] ss:$16 sps:$4 sm:$0xff]  }
 0x590   : > { %1946 = vmatmul.mubr.bf16.vlgmr.msra.gmra.mrb[32].mxu0 %v1912_v44  ;;  %1987 = vmatmul.mubr.bf16.vlgmr.msra.gmra.mrb[32].mxu1 %v1912_v44 }
 0x591   : > { %2042 = vmatpush1.bf16.msra.mxu0 %v5748_v20  ;;  %2083 = vmatpush1.bf16.msra.mxu1 %v5754_v45 }
 0x592   : > { %2043 = vmatprep.subr.bf16.mxu0 %v5760_v33  ;;  %2084 = vmatprep.subr.bf16.mxu1 %v5766_v46 }
 0x593   : > { %2073 = vmatprep.mubr.bf16.mxu0 %v4876_v8  ;;  %2114 = vmatprep.mubr.bf16.mxu1 %v4876_v8 }
 0x595   : > { %2044 = vmatpush1.bf16.msra.mxu0 %v5774_v47  ;;  %2085 = vmatpush1.bf16.msra.mxu1 %v5780_v48 }
 0x596   : > { %2045 = vmatprep.subr.bf16.mxu0 %v5786_v49  ;;  %2086 = vmatprep.subr.bf16.mxu1 %v5792_v51 }
 0x599   : > { %2046 = vmatpush1.bf16.msra.mxu0 %v5798_v52  ;;  %2087 = vmatpush1.bf16.msra.mxu1 %v5804_v53 }
 0x59a   : > { %2047 = vmatprep.subr.bf16.mxu0 %v5810_v54  ;;  %2088 = vmatprep.subr.bf16.mxu1 %v5816_v55 }
 0x59d   : > { %2048 = vmatpush1.bf16.msra.mxu0 %v5822_v56  ;;  %2089 = vmatpush1.bf16.msra.mxu1 %v5828_v57 }
 0x59e   : > { %2049 = vmatprep.subr.bf16.mxu0 %v5834_v58  ;;  %2090 = vmatprep.subr.bf16.mxu1 %v5840_v61 }
 0x5a1   : > { %2050 = vmatpush1.bf16.msra.mxu0 %v5846_v62  ;;  %2091 = vmatpush1.bf16.msra.mxu1 %v5852_v27 }
 0x5a2   : > { %2051 = vmatprep.subr.bf16.mxu0 %v5396_v1  ;;  %2092 = vmatprep.subr.bf16.mxu1 %v5401_v2  ;;  %v2156_v1 = vstv %s2155_s24 }
 0x5a3   : > { %vm2157_vm10 = vcmp.eq.s32.totalorder %v5403_v3, %v2156_v1 }
 0x5a4   : > { %v2158_v2 = vsel %vm2157_vm10, 1, %v4876_v8 }
 0x5a5   : > { %2052 = vmatpush1.bf16.msra.mxu0 %v5411_v4  ;;  %2093 = vmatpush1.bf16.msra.mxu1 %v5416_v5  ;;  %v1908_v4 = vld [vmem:[%s5556_s18 + $0x80] sm:$0xff] }
 0x5a6   : > { %2053 = vmatprep.subr.bf16.mxu0 %v5424_v7  ;;  %2094 = vmatprep.subr.bf16.mxu1 %v5429_v9  ;;  %v1910_v7 = vld [vmem:[%s5556_s18 + $0x90] sm:$0xff] }
 0x5a7   : > { %2160 = vperm.xlu1 %4299, %v2158_v2   ;;  %v2033_v2 = vpop.permute.xlu0 %2032 }
 0x5a8   : > { %vm2034_vm11 = vcmp.eq.s32.totalorder %v2033_v2, 1 }
 0x5a9   : > { %2054 = vmatpush1.bf16.msra.mxu0 %v5439_v11  ;;  %2095 = vmatpush1.bf16.msra.mxu1 %v5444_v12 }
 0x5aa   : > { %2055 = vmatprep.subr.bf16.mxu0 %v5451_v13  ;;  %2096 = vmatprep.subr.bf16.mxu1 %v5456_v14  ;;  %v1909_v13 = vld [vmem:[%s5556_s18 + $0x88] sm:$0xff] }
 0x5ad   : > { %2056 = vmatpush1.bf16.msra.mxu0 %v5463_v15  ;;  %2097 = vmatpush1.bf16.msra.mxu1 %v5468_v16  ;;  %v1911_v15 = vld [vmem:[%s5556_s18 + $0x98] sm:$0xff] }
 0x5ae   : > { %2169 = vmatprep.subr.bf16.mxu0 %v5718_v42  ;;  %2210 = vmatprep.subr.bf16.mxu1 %v5724_v43 }
 0x663   : > { %v1947_v5 = vpop.f32.mrb[32].mxu0  ;;  %v1988_v9 = vpop.f32.mrb[32].mxu1 }
 0x664   : > { %v1995_v11 = vadd.f32 %v1947_v5, %v1908_v4  ;;  %v1997_v12 = vadd.f32 %v1988_v9, %v1910_v7  ;;  %v1949_v14 = vpop.f32.mrb[33].mxu0  ;;  %v1990_v16 = vpop.f32.mrb[33].mxu1 }
 0x665   : > { %v1996_v50 = vadd.f32 %v1949_v14, %v1909_v13  ;;  %v1998_v10 = vadd.f32 %v1990_v16, %v1911_v15  ;;  %v1951_v31 = vpop.f32.mrb[34].mxu0  ;;  %v1992_v35 = vpop.f32.mrb[34].mxu1  ;;  %v5928_v13 = vld [vmem:[%s6887_s3 + $0xa8] ss:$16 sps:$4 sm:$0xff]   ;;  %v5934_v14 = vld [vmem:[%s6887_s3 + $0xc4] ss:$16 sps:$4 sm:$0xff]  }
 0x666   : > { %v1999_v37 = vadd.f32 %v1995_v11, %v5554_v28  ;;  %v1952_v38 = vpop.f32.mrb[35].mxu0  ;;  %v1993_v36 = vpop.f32.mrb[35].mxu1  ;;  %v2001_v59 = vadd.f32 %v1997_v12, %v5565_v21  ;;  %v5922_v12 = vld [vmem:[%s6887_s3 + $0xa0] ss:$16 sps:$4 sm:$0xff]   ;;  %v5940_v15 = vld [vmem:[%s6887_s3 + $0xcc] ss:$16 sps:$4 sm:$0xff]  }
 0x667   : > { %v2000_v26 = vadd.f32 %v1996_v50, %v5559_v32  ;;  %v2002_v0 = vadd.f32 %v1998_v10, %v5568_v24  ;;  %v5946_v16 = vld [vmem:[%s6887_s3 + $0xc0] ss:$16 sps:$4 sm:$0xff]   ;;  %v5952_v50 = vld [vmem:[%s6887_s3 + $0xc8] ss:$16 sps:$4 sm:$0xff]   ;;  %v5958_v10 = vld [vmem:[%s6887_s3 + $0xe4] ss:$16 sps:$4 sm:$0xff]   ;;  %v2284_v38 = vstv %s2283_s11 }
 0x668   : > { %v4048_v41 = vmul.f32 -1.442695, %v1999_v37  ;;  %v4050_v63 = vmul.f32 -1.442695, %v2001_v59  ;;  %v5964_v31 = vld [vmem:[%s6887_s3 + $0xec] ss:$16 sps:$4 sm:$0xff]   ;;  %vm2285_vm12 = vcmp.eq.s32.totalorder %v5403_v3, %v2284_v38 }
 0x669   : > { %v4049_v60 = vmul.f32 -1.442695, %v2000_v26  ;;  %v5970_v35 = vld [vmem:[%s6887_s3 + $0xe0] ss:$16 sps:$4 sm:$0xff]   ;;  %v5976_v37 = vld [vmem:[%s6887_s3 + $0xe8] ss:$16 sps:$4 sm:$0xff]  }
 0x66a   : > { %4464 = vpow2.f32 %v4048_v41  ;;  %v2286_v36 = vsel %vm2285_vm12, 1, %v4876_v8  ;;  %v2036_v26 = vld [vmem:[%s5556_s18 + $0xa0] sm:$0xff] }
 0x66b   : > { %4466 = vpow2.f32 %v4049_v60  ;;  %2288 = vperm.xlu0 %4298, %v2286_v36   ;;  %v2038_v60 = vld [vmem:[%s5556_s18 + $0xb0] sm:$0xff] }
 0x66c   : > { %4468 = vtanh.f32 %v2002_v0 }
 0x66d   : > { %4470 = vpow2.f32 %v4050_v63 }
 0x674   : > { %v4465_v6 = vpop.eup %4464 }
 0x675   : > { %v2012_v17 = vadd.f32 1.0, %v4465_v6  ;;  %v4467_v18 = vpop.eup %4466  ;;  %v2037_v6 = vld [vmem:[%s5556_s18 + $0xa8] sm:$0xff] }
 0x676   : > { %v2013_v19 = vadd.f32 1.0, %v4467_v18  ;;  %v4469_v22 = vpop.eup %4468  ;;  %v2039_v18 = vld [vmem:[%s5556_s18 + $0xb8] sm:$0xff] }
 0x677   : > { %4472 = vrcp.f32 %v2012_v17  ;;  %v4471_v23 = vpop.eup %4470 }
 0x678   : > { %4474 = vrcp.f32 %v2013_v19  ;;  %v2014_v40 = vadd.f32 1.0, %v4471_v23 }
 0x67a   : > { %4476 = vrcp.f32 %v2014_v40 }
 0x681   : > { %v4473_v29 = vpop.eup %4472 }
 0x682   : > { %v2023_v39 = vmul.f32 %v4473_v29, %v4469_v22  ;;  %v4475_v30 = vpop.eup %4474 }
 0x683   : > { %v2022_v44 = vmul.f32 %v4475_v30, %v5739_v25  ;;  %v5910_v25 = vld [vmem:[%s6887_s3 + $0xa4] ss:$16 sps:$4 sm:$0xff]  }
 0x684   : > { %v4477_v4 = vpop.eup %4476 }
 0x685   : > { %v5881_v1 = vadd.f32 %v2023_v39, %v2022_v44 }
 0x687   : > { %4478 = vtanh.f32 %v5881_v1 }
 0x691   : > { %v4479_v5 = vpop.eup %4478 }
 0x692   : > { %v2026_v7 = vmul.f32 %v4479_v5, %v4477_v4 }
 0x694   : > { %v5885_v9 = vsel %vm2034_vm11, %v2026_v7, %v5743_v34  ;;  %v2040_v11 = vpack.c.bf16 %v2026_v7, %v2026_v7  ;;  %v5916_v34 = vld [vmem:[%s6887_s3 + $0xac] ss:$16 sps:$4 sm:$0xff]  }
 0x696   : > { %2074 = vmatmul.mubr.bf16.vlgmr.msra.gmra.mrb[36].mxu0 %v2040_v11  ;;  %2115 = vmatmul.mubr.bf16.vlgmr.msra.gmra.mrb[36].mxu1 %v2040_v11 }
 0x697   : > { %2170 = vmatpush1.bf16.msra.mxu0 %v5748_v20  ;;  %2211 = vmatpush1.bf16.msra.mxu1 %v5754_v45 }
 0x698   : > { %2171 = vmatprep.subr.bf16.mxu0 %v5760_v33  ;;  %2212 = vmatprep.subr.bf16.mxu1 %v5766_v46 }
 0x699   : > { %2201 = vmatprep.mubr.bf16.mxu0 %v4876_v8  ;;  %2242 = vmatprep.mubr.bf16.mxu1 %v4876_v8 }
 0x69b   : > { %2172 = vmatpush1.bf16.msra.mxu0 %v5774_v47  ;;  %2213 = vmatpush1.bf16.msra.mxu1 %v5780_v48 }
 0x69c   : > { %2173 = vmatprep.subr.bf16.mxu0 %v5786_v49  ;;  %2214 = vmatprep.subr.bf16.mxu1 %v5792_v51 }
 0x69f   : > { %2174 = vmatpush1.bf16.msra.mxu0 %v5798_v52  ;;  %2215 = vmatpush1.bf16.msra.mxu1 %v5804_v53 }
 0x6a0   : > { %2175 = vmatprep.subr.bf16.mxu0 %v5810_v54  ;;  %2216 = vmatprep.subr.bf16.mxu1 %v5816_v55 }
 0x6a3   : > { %2176 = vmatpush1.bf16.msra.mxu0 %v5822_v56  ;;  %2217 = vmatpush1.bf16.msra.mxu1 %v5828_v57 }
 0x6a4   : > { %2177 = vmatprep.subr.bf16.mxu0 %v5834_v58  ;;  %2218 = vmatprep.subr.bf16.mxu1 %v5840_v61 }
 0x6a7   : > { %2178 = vmatpush1.bf16.msra.mxu0 %v5846_v62  ;;  %2219 = vmatpush1.bf16.msra.mxu1 %v5852_v27 }
 0x6a8   : > { %2179 = vmatprep.subr.bf16.mxu0 %v5910_v25  ;;  %2220 = vmatprep.subr.bf16.mxu1 %v5916_v34 }
 0x6ab   : > { %2180 = vmatpush1.bf16.msra.mxu0 %v5922_v12  ;;  %2221 = vmatpush1.bf16.msra.mxu1 %v5928_v13 }
 0x6ac   : > { %2181 = vmatprep.subr.bf16.mxu0 %v5934_v14  ;;  %2222 = vmatprep.subr.bf16.mxu1 %v5940_v15 }
 0x6af   : > { %2182 = vmatpush1.bf16.msra.mxu0 %v5946_v16  ;;  %2223 = vmatpush1.bf16.msra.mxu1 %v5952_v50 }
 0x6b0   : > { %2183 = vmatprep.subr.bf16.mxu0 %v5958_v10  ;;  %2224 = vmatprep.subr.bf16.mxu1 %v5964_v31 }
 0x6b3   : > { %2184 = vmatpush1.bf16.msra.mxu0 %v5970_v35  ;;  %2225 = vmatpush1.bf16.msra.mxu1 %v5976_v37 }
 0x6b4   : > { %2297 = vmatprep.subr.bf16.mxu0 %v5718_v42  ;;  %2338 = vmatprep.subr.bf16.mxu1 %v5724_v43 }
 0x769   : > { %v2075_v41 = vpop.f32.mrb[36].mxu0  ;;  %v2116_v59 = vpop.f32.mrb[36].mxu1 }
 0x76a   : > { %v2123_v0 = vadd.f32 %v2075_v41, %v2036_v26  ;;  %v2125_v63 = vadd.f32 %v2116_v59, %v2038_v60  ;;  %v2077_v17 = vpop.f32.mrb[37].mxu0  ;;  %v2118_v19 = vpop.f32.mrb[37].mxu1 }
 0x76b   : > { %v2124_v42 = vadd.f32 %v2077_v17, %v2037_v6  ;;  %v2126_v22 = vadd.f32 %v2118_v19, %v2039_v18  ;;  %v2079_v43 = vpop.f32.mrb[38].mxu0  ;;  %v2120_v23 = vpop.f32.mrb[38].mxu1 }
 0x76c   : > { %v2127_v29 = vadd.f32 %v2123_v0, %v5554_v28  ;;  %v2080_v39 = vpop.f32.mrb[39].mxu0  ;;  %v2121_v30 = vpop.f32.mrb[39].mxu1  ;;  %v2129_v4 = vadd.f32 %v2125_v63, %v5565_v21 }
 0x76d   : > { %v2128_v40 = vadd.f32 %v2124_v42, %v5559_v32  ;;  %v2130_v5 = vadd.f32 %v2126_v22, %v5568_v24  ;;  %v2161_v19 = vpop.permute.xlu1 %2160 }
 0x76e   : > { %v4051_v44 = vmul.f32 -1.442695, %v2127_v29  ;;  %v4053_v7 = vmul.f32 -1.442695, %v2129_v4  ;;  %vm2162_vm13 = vcmp.eq.s32.totalorder %v2161_v19, 1 }
 0x76f   : > { %v4052_v2 = vmul.f32 -1.442695, %v2128_v40 }
 0x770   : > { %4480 = vpow2.f32 %v4051_v44  ;;  %v2289_v44 = vpop.permute.xlu0 %2288 }
 0x771   : > { %4482 = vpow2.f32 %v4052_v2  ;;  %vm2290_vm15 = vcmp.eq.s32.totalorder %v2289_v44, 1 }
 0x772   : > { %4484 = vtanh.f32 %v2130_v5 }
 0x773   : > { %4486 = vpow2.f32 %v4053_v7 }
 0x77a   : > { %v4481_v11 = vpop.eup %4480 }
 0x77b   : > { %v2140_v38 = vadd.f32 1.0, %v4481_v11  ;;  %v4483_v36 = vpop.eup %4482 }
 0x77c   : > { %v2141_v26 = vadd.f32 1.0, %v4483_v36  ;;  %v4485_v41 = vpop.eup %4484 }
 0x77d   : > { %4488 = vrcp.f32 %v2140_v38  ;;  %v4487_v60 = vpop.eup %4486  ;;  %v2292_v38 = vld [vmem:[%s5556_s18 + $0xe0] sm:$0xff] }
 0x77e   : > { %4490 = vrcp.f32 %v2141_v26  ;;  %v2142_v17 = vadd.f32 1.0, %v4487_v60  ;;  %v2294_v26 = vld [vmem:[%s5556_s18 + $0xf0] sm:$0xff] }
 0x780   : > { %4492 = vrcp.f32 %v2142_v17  ;;  %v2295_v17 = vld [vmem:[%s5556_s18 + $0xf8] sm:$0xff] }
 0x787   : > { %v4489_v59 = vpop.eup %4488 }
 0x788   : > { %v2151_v0 = vmul.f32 %v4489_v59, %v4485_v41  ;;  %v4491_v6 = vpop.eup %4490 }
 0x789   : > { %v2150_v18 = vmul.f32 %v4491_v6, %v5881_v1 }
 0x78a   : > { %v4493_v42 = vpop.eup %4492 }
 0x78b   : > { %v5993_v63 = vadd.f32 %v2151_v0, %v2150_v18  ;;  %v2293_v0 = vld [vmem:[%s5556_s18 + $0xe8] sm:$0xff] }
 0x78d   : > { %4494 = vtanh.f32 %v5993_v63 }
 0x797   : > { %v4495_v22 = vpop.eup %4494 }
 0x798   : > { %v2154_v43 = vmul.f32 %v4495_v22, %v4493_v42 }
 0x79a   : > { %v5997_v23 = vsel %vm2162_vm13, %v2154_v43, %v5885_v9  ;;  %v2168_v29 = vpack.c.bf16 %v2154_v43, %v2154_v43 }
 0x79c   : > { %2202 = vmatmul.mubr.bf16.vlgmr.msra.gmra.mrb[40].mxu0 %v2168_v29  ;;  %2243 = vmatmul.mubr.bf16.vlgmr.msra.gmra.mrb[40].mxu1 %v2168_v29 }
 0x79d   : > { %2298 = vmatpush1.bf16.msra.mxu0 %v5748_v20  ;;  %2339 = vmatpush1.bf16.msra.mxu1 %v5754_v45  ;;  %v2412_v20 = vstv %s2411_s14 }
 0x79e   : > { %2299 = vmatprep.subr.bf16.mxu0 %v5760_v33  ;;  %2340 = vmatprep.subr.bf16.mxu1 %v5766_v46  ;;  %vm2413_vm14 = vcmp.eq.s32.totalorder %v5403_v3, %v2412_v20  ;;  %v2164_v33 = vld [vmem:[%s5556_s18 + $0xc0] sm:$0xff] }
 0x79f   : > { %2329 = vmatprep.mubr.bf16.mxu0 %v4876_v8  ;;  %2370 = vmatprep.mubr.bf16.mxu1 %v4876_v8  ;;  %v2414_v45 = vsel %vm2413_vm14, 1, %v4876_v8 }
 0x7a0   : > { %2416 = vperm.xlu1 %4299, %v2414_v45  }
 0x7a1   : > { %2300 = vmatpush1.bf16.msra.mxu0 %v5774_v47  ;;  %2341 = vmatpush1.bf16.msra.mxu1 %v5780_v48  ;;  %v2166_v47 = vld [vmem:[%s5556_s18 + $0xd0] sm:$0xff] }
 0x7a2   : > { %2301 = vmatprep.subr.bf16.mxu0 %v5786_v49  ;;  %2342 = vmatprep.subr.bf16.mxu1 %v5792_v51 }
 0x7a5   : > { %2302 = vmatpush1.bf16.msra.mxu0 %v5798_v52  ;;  %2343 = vmatpush1.bf16.msra.mxu1 %v5804_v53  ;;  %v2165_v52 = vld [vmem:[%s5556_s18 + $0xc8] sm:$0xff] }
 0x7a6   : > { %2303 = vmatprep.subr.bf16.mxu0 %v5810_v54  ;;  %2344 = vmatprep.subr.bf16.mxu1 %v5816_v55  ;;  %v2167_v54 = vld [vmem:[%s5556_s18 + $0xd8] sm:$0xff] }
 0x7a9   : > { %2304 = vmatpush1.bf16.msra.mxu0 %v5822_v56  ;;  %2345 = vmatpush1.bf16.msra.mxu1 %v5828_v57 }
 0x7aa   : > { %2305 = vmatprep.subr.bf16.mxu0 %v5834_v58  ;;  %2346 = vmatprep.subr.bf16.mxu1 %v5840_v61 }
 0x7ad   : > { %2306 = vmatpush1.bf16.msra.mxu0 %v5846_v62  ;;  %2347 = vmatpush1.bf16.msra.mxu1 %v5852_v27 }
 0x7ae   : > { %2307 = vmatprep.subr.bf16.mxu0 %v5910_v25  ;;  %2348 = vmatprep.subr.bf16.mxu1 %v5916_v34 }
 0x7b1   : > { %2308 = vmatpush1.bf16.msra.mxu0 %v5922_v12  ;;  %2349 = vmatpush1.bf16.msra.mxu1 %v5928_v13 }
 0x7b2   : > { %2309 = vmatprep.subr.bf16.mxu0 %v5934_v14  ;;  %2350 = vmatprep.subr.bf16.mxu1 %v5940_v15 }
 0x7b5   : > { %2310 = vmatpush1.bf16.msra.mxu0 %v5946_v16  ;;  %2351 = vmatpush1.bf16.msra.mxu1 %v5952_v50 }
 0x7b6   : > { %2311 = vmatprep.subr.bf16.mxu0 %v5958_v10  ;;  %2352 = vmatprep.subr.bf16.mxu1 %v5964_v31 }
 0x7b9   : > { %2312 = vmatpush1.bf16.msra.mxu0 %v5970_v35  ;;  %2353 = vmatpush1.bf16.msra.mxu1 %v5976_v37 }
 0x86f   : > { %v2203_v46 = vpop.f32.mrb[40].mxu0  ;;  %v2244_v48 = vpop.f32.mrb[40].mxu1 }
 0x870   : > { %v2251_v49 = vadd.f32 %v2203_v46, %v2164_v33  ;;  %v2253_v51 = vadd.f32 %v2244_v48, %v2166_v47  ;;  %v2205_v53 = vpop.f32.mrb[41].mxu0  ;;  %v2246_v55 = vpop.f32.mrb[41].mxu1 }
 0x871   : > { %v2252_v56 = vadd.f32 %v2205_v53, %v2165_v52  ;;  %v2254_v57 = vadd.f32 %v2246_v55, %v2167_v54  ;;  %v2207_v58 = vpop.f32.mrb[42].mxu0  ;;  %v2248_v61 = vpop.f32.mrb[42].mxu1 }
 0x872   : > { %v2255_v62 = vadd.f32 %v2251_v49, %v5554_v28  ;;  %v2208_v3 = vpop.f32.mrb[43].mxu0  ;;  %v2249_v27 = vpop.f32.mrb[43].mxu1  ;;  %v2257_v25 = vadd.f32 %v2253_v51, %v5565_v21 }
 0x873   : > { %v2256_v8 = vadd.f32 %v2252_v56, %v5559_v32  ;;  %v2258_v34 = vadd.f32 %v2254_v57, %v5568_v24 }
 0x874   : > { %v4054_v1 = vmul.f32 -1.442695, %v2255_v62  ;;  %v4056_v12 = vmul.f32 -1.442695, %v2257_v25 }
 0x875   : > { %v4055_v9 = vmul.f32 -1.442695, %v2256_v8 }
 0x876   : > { %4496 = vpow2.f32 %v4054_v1 }
 0x877   : > { %4498 = vpow2.f32 %v4055_v9 }
 0x878   : > { %4500 = vtanh.f32 %v2258_v34 }
 0x879   : > { %4502 = vpow2.f32 %v4056_v12 }
 0x880   : > { %v4497_v13 = vpop.eup %4496 }
 0x881   : > { %v2268_v14 = vadd.f32 1.0, %v4497_v13  ;;  %v4499_v15 = vpop.eup %4498 }
 0x882   : > { %v2269_v16 = vadd.f32 1.0, %v4499_v15  ;;  %v4501_v50 = vpop.eup %4500 }
 0x883   : > { %4504 = vrcp.f32 %v2268_v14  ;;  %v4503_v10 = vpop.eup %4502 }
 0x884   : > { %4506 = vrcp.f32 %v2269_v16  ;;  %v2270_v39 = vadd.f32 1.0, %v4503_v10 }
 0x886   : > { %4508 = vrcp.f32 %v2270_v39 }
 0x88d   : > { %v4505_v31 = vpop.eup %4504 }
 0x88e   : > { %v2279_v35 = vmul.f32 %v4505_v31, %v4501_v50  ;;  %v4507_v37 = vpop.eup %4506 }
 0x88f   : > { %v2278_v30 = vmul.f32 %v4507_v37, %v5993_v63 }
 0x890   : > { %v4509_v2 = vpop.eup %4508 }
 0x891   : > { %v2280_v40 = vadd.f32 %v2279_v35, %v2278_v30 }
 0x893   : > { %4510 = vtanh.f32 %v2280_v40 }
 0x89d   : > { %v4511_v4 = vpop.eup %4510 }
 0x89e   : > { %v2282_v5 = vmul.f32 %v4511_v4, %v4509_v2 }
 0x8a0   : > { %v2291_v7 = vsel %vm2290_vm15, %v2282_v5, %v5997_v23  ;;  %v2296_v11 = vpack.c.bf16 %v2282_v5, %v2282_v5 }
 0x8a2   : > { %2330 = vmatmul.mubr.bf16.vlgmr.msra.gmra.mrb[44].mxu0 %v2296_v11  ;;  %2371 = vmatmul.mubr.bf16.vlgmr.msra.gmra.mrb[44].mxu1 %v2296_v11 }
 0x975   : > { %v2331_v36 = vpop.f32.mrb[44].mxu0  ;;  %v2372_v41 = vpop.f32.mrb[44].mxu1 }
 0x976   : > { %v2379_v60 = vadd.f32 %v2331_v36, %v2292_v38  ;;  %v2381_v59 = vadd.f32 %v2372_v41, %v2294_v26  ;;  %v2333_v6 = vpop.f32.mrb[45].mxu0  ;;  %v2374_v18 = vpop.f32.mrb[45].mxu1 }
 0x977   : > { %v2380_v63 = vadd.f32 %v2333_v6, %v2293_v0  ;;  %v2382_v19 = vadd.f32 %v2374_v18, %v2295_v17  ;;  %v2335_v42 = vpop.f32.mrb[46].mxu0  ;;  %v2376_v22 = vpop.f32.mrb[46].mxu1 }
 0x978   : > { %v2383_v43 = vadd.f32 %v2379_v60, %v5554_v28  ;;  %v2336_v23 = vpop.f32.mrb[47].mxu0  ;;  %v2377_v29 = vpop.f32.mrb[47].mxu1  ;;  %v2385_v46 = vadd.f32 %v2381_v59, %v5565_v21 }
 0x979   : > { %v2384_v20 = vadd.f32 %v2380_v63, %v5559_v32  ;;  %v2386_v47 = vadd.f32 %v2382_v19, %v5568_v24  ;;  %v2417_v24 = vpop.permute.xlu1 %2416 }
 0x97a   : > { %v4057_v45 = vmul.f32 -1.442695, %v2383_v43  ;;  %v4059_v48 = vmul.f32 -1.442695, %v2385_v46  ;;  %vm2418_vm0 = vcmp.eq.s32.totalorder %v2417_v24, 1 }
 0x97b   : > { %v4058_v33 = vmul.f32 -1.442695, %v2384_v20 }
 0x97c   : > { %4512 = vpow2.f32 %v4057_v45 }
 0x97d   : > { %4514 = vpow2.f32 %v4058_v33 }
 0x97e   : > { %4516 = vtanh.f32 %v2386_v47 }
 0x97f   : > { %4518 = vpow2.f32 %v4059_v48 }
 0x986   : > { %v4513_v49 = vpop.eup %4512 }
 0x987   : > { %v2396_v51 = vadd.f32 1.0, %v4513_v49  ;;  %v4515_v52 = vpop.eup %4514 }
 0x988   : > { %v2397_v28 = vadd.f32 1.0, %v4515_v52  ;;  %v4517_v53 = vpop.eup %4516 }
 0x989   : > { %4520 = vrcp.f32 %v2396_v51  ;;  %v4519_v54 = vpop.eup %4518 }
 0x98a   : > { %4522 = vrcp.f32 %v2397_v28  ;;  %v2398_v57 = vadd.f32 1.0, %v4519_v54 }
 0x98c   : > { %4524 = vrcp.f32 %v2398_v57 }
 0x993   : > { %v4521_v32 = vpop.eup %4520 }
 0x994   : > { %v2407_v55 = vmul.f32 %v4521_v32, %v4517_v53  ;;  %v4523_v56 = vpop.eup %4522 }
 0x995   : > { %v2406_v58 = vmul.f32 %v4523_v56, %v2280_v40 }
 0x996   : > { %v4525_v21 = vpop.eup %4524 }
 0x997   : > { %v2408_v61 = vadd.f32 %v2407_v55, %v2406_v58 }
 0x999   : > { %2421 = vst [vmem:[#allocation4] sm:$0xff] %v2408_v61  ;;  %4526 = vtanh.f32 %v2408_v61 }
 0x9a3   : > { %v4527_v62 = vpop.eup %4526 }
 0x9a4   : > { %v2410_v3 = vmul.f32 %v4527_v62, %v4525_v21 }
 0x9a6   : > { %v2419_v27 = vsel %vm2418_vm0, %v2410_v3, %v2291_v7  ;;  %2420 = vst [vmem:[#allocation3] sm:$0xff] %v2410_v3 }
 0x9a7   : > { %2422 = vst [vmem:[#allocation5] sm:$0xff] %v2419_v27 }
 0x9a8 PF: > { %p4060_p7 = scmp.ne.s32.totalorder %s4856_s27, 3 }
 0x9a9   : > { %v6056_v8 = vld [vmem:[%s6887_s3 + $0x4] ss:$16 sps:$4 sm:$0xff] (!%p4060_p7)   ;;  %v6061_v1 = vld [vmem:[%s6887_s3] ss:$16 sps:$4 sm:$0xff] (!%p4060_p7)   ;;  %v4877_v9 = vmov (!%p4060_p7), 0   ;;  %s4061_s29 = sadd.s32 (!%p4060_p7), 4294967295, %s4856_s27  ;;  %v2725_v45 = vlaneseq (!%p4060_p7) }
 0x9aa   : > { %2426 = sbr.rel (%p4060_p7) target bundleno = 4819 (0x12d3), region = 60  ;;  %2670 = vmatprep.mubr.bf16.mxu0 (!%p4060_p7), %v4877_v9  ;;  %2711 = vmatprep.mubr.bf16.mxu1 (!%p4060_p7), %v4877_v9  ;;  %v6069_v25 = vld [vmem:[%s6887_s3 + $0x24] ss:$16 sps:$4 sm:$0xff] (!%p4060_p7)   ;;  %v6076_v34 = vld [vmem:[%s6887_s3 + $0x20] ss:$16 sps:$4 sm:$0xff] (!%p4060_p7)   ;;  %s6185_s27 = sshll.u32 (!%p4060_p7), %s4061_s29, 3 }
 0x9ab   : > { %2638 = vmatprep.subr.bf16.mxu0 (!%p4060_p7), %v6056_v8  ;;  %4560 = vset.pattern.permute.xlu0 (!%p4060_p7), %v4877_v9  ;;  %v6083_v12 = vld [vmem:[%s6887_s3 + $0x44] ss:$16 sps:$4 sm:$0xff] (!%p4060_p7)   ;;  %v6088_v13 = vld [vmem:[%s6887_s3 + $0xc] ss:$16 sps:$4 sm:$0xff] (!%p4060_p7)   ;;  %v6093_v14 = vld [vmem:[%s6887_s3 + $0x8] ss:$16 sps:$4 sm:$0xff] (!%p4060_p7)   ;;  %v2773_v0 = vstv (!%p4060_p7), %s6185_s27 }
 0x9ac   : > { %2639 = vmatpush1.bf16.msra.mxu0 (!%p4060_p7), %v6061_v1  ;;  %4561 = vset.pattern.permute.xlu1 (!%p4060_p7), %v4877_v9  ;;  %v6099_v15 = vld [vmem:[%s6887_s3 + $0x40] ss:$16 sps:$4 sm:$0xff] (!%p4060_p7)   ;;  %v6106_v16 = vld [vmem:[%s6887_s3 + $0x64] ss:$16 sps:$4 sm:$0xff] (!%p4060_p7)   ;;  %v6112_v50 = vld [vmem:[%s6887_s3 + $0x2c] ss:$16 sps:$4 sm:$0xff] (!%p4060_p7)  }
 0x9ad   : > { %2640 = vmatprep.subr.bf16.mxu0 (!%p4060_p7), %v6069_v25  ;;  %2679 = vmatprep.subr.bf16.mxu1 (!%p4060_p7), %v6088_v13  ;;  %v6117_v10 = vld [vmem:[%s6887_s3 + $0x28] ss:$16 sps:$4 sm:$0xff] (!%p4060_p7)   ;;  %v6124_v31 = vld [vmem:[%s6887_s3 + $0x60] ss:$16 sps:$4 sm:$0xff] (!%p4060_p7)   ;;  %v6129_v35 = vld [vmem:[%s6887_s3 + $0x84] ss:$16 sps:$4 sm:$0xff] (!%p4060_p7)  }
 0x9ae   : > { %2680 = vmatpush1.bf16.msra.mxu1 (!%p4060_p7), %v6093_v14  ;;  %v6134_v37 = vld [vmem:[%s6887_s3 + $0x4c] ss:$16 sps:$4 sm:$0xff] (!%p4060_p7)   ;;  %v6141_v39 = vld [vmem:[%s6887_s3 + $0x48] ss:$16 sps:$4 sm:$0xff] (!%p4060_p7)   ;;  %v6153_v40 = vld [vmem:[%s6887_s3 + $0x80] ss:$16 sps:$4 sm:$0xff] (!%p4060_p7)  }
 0x9af   : > { %2681 = vmatprep.subr.bf16.mxu1 (!%p4060_p7), %v6112_v50  ;;  %v6147_v30 = vld [vmem:[%s6887_s3 + $0x6c] ss:$16 sps:$4 sm:$0xff] (!%p4060_p7)   ;;  %v6159_v44 = vld [vmem:[%s6887_s3 + $0xa4] ss:$16 sps:$4 sm:$0xff] (!%p4060_p7)   ;;  %v6165_v2 = vld [vmem:[%s6887_s3 + $0x68] ss:$16 sps:$4 sm:$0xff] (!%p4060_p7)  }
 0x9b0   : > { %2641 = vmatpush1.bf16.msra.mxu0 (!%p4060_p7), %v6076_v34  ;;  %v6172_v4 = vld [vmem:[%s6887_s3 + $0x8c] ss:$16 sps:$4 sm:$0xff] (!%p4060_p7)   ;;  %v6177_v5 = vld [vmem:[%s6887_s3 + $0xa0] ss:$16 sps:$4 sm:$0xff] (!%p4060_p7)   ;;  %v6183_v7 = vld [vmem:[%s6887_s3 + $0xc4] ss:$16 sps:$4 sm:$0xff] (!%p4060_p7)  }
 0x9b1   : > { %2642 = vmatprep.subr.bf16.mxu0 %v6083_v12  ;;  %v6192_v11 = vld [vmem:[%s6887_s3 + $0x88] ss:$16 sps:$4 sm:$0xff]   ;;  %v6197_v38 = vld [vmem:[%s6887_s3 + $0xc0] ss:$16 sps:$4 sm:$0xff]   ;;  %v6203_v36 = vld [vmem:[%s6887_s3 + $0xac] ss:$16 sps:$4 sm:$0xff]  }
 0x9b2   : > { %2682 = vmatpush1.bf16.msra.mxu1 %v6117_v10  ;;  %v2430_v26 = vld [vmem:[%s5003_s16] sm:$0xff]  ;;  %v6214_v60 = vld [vmem:[%s6887_s3 + $0xa8] ss:$16 sps:$4 sm:$0xff]   ;;  %v6221_v6 = vld [vmem:[%s6887_s3 + $0xcc] ss:$16 sps:$4 sm:$0xff]   ;;  %s2900_s12 = sadd.s32 1, %s6185_s27 }
 0x9b3   : > { %2683 = vmatprep.subr.bf16.mxu1 %v6134_v37  ;;  %v6209_v41 = vld [vmem:[%s6887_s3 + $0xe4] ss:$16 sps:$4 sm:$0xff]   ;;  %vm2431_vm1 = vcmp.gt.s32.totalorder %v2430_v26, 0  ;;  %v4062_v59 = vadd.s32 4294967295, %v2430_v26  ;;  %v6230_v18 = vld [vmem:[%s6887_s3 + $0xe0] ss:$16 sps:$4 sm:$0xff]   ;;  %v2901_v29 = vstv %s2900_s12 }
 0x9b4   : > { %2643 = vmatpush1.bf16.msra.mxu0 %v6099_v15  ;;  %v2435_v63 = vld [vmem:[#allocation3] sm:$0xff]  ;;  %v6237_v19 = vld [vmem:[%s6887_s3 + $0xc8] ss:$16 sps:$4 sm:$0xff]   ;;  %v6247_v22 = vld [vmem:[%s6887_s3 + $0xec] ss:$16 sps:$4 sm:$0xff]   ;;  %s2427_s30 = ssub.s32 1, %s6932_s20 }
 0x9b5   : > { %2644 = vmatprep.subr.bf16.mxu0 %v6106_v16  ;;  %v6225_v17 = vsel %vm2431_vm1, %v4062_v59, 23  ;;  %v2445_v43 = vpack.c.bf16 %v2435_v63, %v2435_v63  ;;  %v6254_v23 = vld [vmem:[%s6887_s3 + $0xe8] ss:$16 sps:$4 sm:$0xff]   ;;  %v2726_v33 = vshrl.u32 %v2725_v45, 7  ;;  %s4138_s29 = sshll.u32 %s2427_s30, 8  ;;  %s3028_s20 = sadd.s32 2, %s6185_s27 }
 0x9b6   : > { %2684 = vmatpush1.bf16.msra.mxu1 %v6141_v39  ;;  %vm2774_vm2 = vcmp.eq.s32.totalorder %v6225_v17, %v2773_v0  ;;  %vm2902_vm3 = vcmp.eq.s32.totalorder %v6225_v17, %v2901_v29  ;;  %v2429_v47 = vld [vmem:[%s6886_s2] sm:$0xf]  ;;  %s6301_s14 = scalar_lea.vmem [#allocation2], %s4138_s29  ;;  %s3156_s10 = sadd.s32 3, %s6185_s27  ;;  %vm4879_vm1 = vmmov 0  }
 0x9b7   : > { %2685 = vmatprep.subr.bf16.mxu1 %v6147_v30  ;;  %v2775_v42 = vsel %vm2774_vm2, 1, %v4877_v9  ;;  %v2903_v20 = vsel %vm2902_vm3, 1, %v4877_v9  ;;  %v2727_v46 = vsub.s32 0, %v2726_v33  ;;  %v2731_v48 = vsub.s32 1, %v2726_v33  ;;  %v2441_v49 = vld [vmem:[%s6301_s14] sm:$0xff]  ;;  %v2442_v52 = vld [vmem:[%s6301_s14 + $0x8] sm:$0xff] }
 0x9b8   : > { %2645 = vmatpush1.bf16.msra.mxu0 %v6124_v31  ;;  %2777 = vperm.xlu0 %4560, %v2775_v42   ;;  %v2735_v55 = vsub.s32 2, %v2726_v33  ;;  %v2443_v21 = vld [vmem:[%s6301_s14 + $0x10] sm:$0xff]  ;;  %v2739_v63 = vsub.s32 3, %v2726_v33  ;;  %v2444_v42 = vld [vmem:[%s6301_s14 + $0x18] sm:$0xff]  ;;  %s3284_s16 = sadd.s32 4, %s6185_s27  ;;  %s3412_s9 = sadd.s32 5, %s6185_s27 }
 0x9b9   : > { %2646 = vmatprep.subr.bf16.mxu0 %v6129_v35  ;;  %v6304_v51 = vrot.slane %v2429_v47, %v2727_v46  ;;  %v6307_v53 = vrot.slane %v2429_v47, %v2731_v48  ;;  %s3540_s26 = sadd.s32 6, %s6185_s27  ;;  %s3668_s22 = sadd.s32 7, %s6185_s27 }
 0x9ba   : > { %2686 = vmatpush1.bf16.msra.mxu1 %v6165_v2  ;;  %v6312_v27 = vrot.slane %v2429_v47, %v2735_v55  ;;  %v6316_v46 = vrot.slane %v2429_v47, %v2739_v63 }
 0x9bb   : > { %2687 = vmatprep.subr.bf16.mxu1 %v6172_v4 }
 0x9bc   : > { %2647 = vmatpush1.bf16.msra.mxu0 %v6153_v40  ;;  %2905 = vperm.xlu0 %4560, %v2903_v20  }
 0x9bd   : > { %2648 = vmatprep.subr.bf16.mxu0 %v6159_v44 }
 0x9be   : > { %2688 = vmatpush1.bf16.msra.mxu1 %v6192_v11 }
 0x9bf   : > { %2689 = vmatprep.subr.bf16.mxu1 %v6203_v36 }
 0x9c0   : > { %2649 = vmatpush1.bf16.msra.mxu0 %v6177_v5 }
 0x9c1   : > { %2650 = vmatprep.subr.bf16.mxu0 %v6183_v7 }
 0x9c2   : > { %2690 = vmatpush1.bf16.msra.mxu1 %v6214_v60 }
 0x9c3   : > { %2691 = vmatprep.subr.bf16.mxu1 %v6221_v6 }
 0x9c4   : > { %2651 = vmatpush1.bf16.msra.mxu0 %v6197_v38 }
 0x9c5   : > { %2652 = vmatprep.subr.bf16.mxu0 %v6209_v41 }
 0x9c6   : > { %2692 = vmatpush1.bf16.msra.mxu1 %v6237_v19 }
 0x9c7   : > { %2693 = vmatprep.subr.bf16.mxu1 %v6247_v22 }
 0x9c8   : > { %2653 = vmatpush1.bf16.msra.mxu0 %v6230_v18 }
 0x9c9   : > { %2786 = vmatprep.subr.bf16.mxu0 %v6056_v8 }
 0x9ca   : > { %2694 = vmatpush1.bf16.msra.mxu1 %v6254_v23 }
 0x9cb   : > { %2671 = vmatmul.mubr.bf16.vlgmr.msra.gmra.mrb[0].mxu0 %v2445_v43  ;;  %2827 = vmatprep.subr.bf16.mxu1 %v6088_v13 }
 0x9cc   : > { %2787 = vmatpush1.bf16.msra.mxu0 %v6061_v1  ;;  %2818 = vmatprep.mubr.bf16.mxu0 %v4877_v9 }
 0x9cd   : > { %2788 = vmatprep.subr.bf16.mxu0 %v6069_v25  ;;  %2712 = vmatmul.mubr.bf16.vlgmr.msra.gmra.mrb[0].mxu1 %v2445_v43 }
 0x9ce   : > { %2828 = vmatpush1.bf16.msra.mxu1 %v6093_v14  ;;  %2859 = vmatprep.mubr.bf16.mxu1 %v4877_v9 }
 0x9cf   : > { %2829 = vmatprep.subr.bf16.mxu1 %v6112_v50 }
 0x9d0   : > { %2789 = vmatpush1.bf16.msra.mxu0 %v6076_v34 }
 0x9d1   : > { %2790 = vmatprep.subr.bf16.mxu0 %v6083_v12 }
 0x9d2   : > { %2830 = vmatpush1.bf16.msra.mxu1 %v6117_v10 }
 0x9d3   : > { %2831 = vmatprep.subr.bf16.mxu1 %v6134_v37 }
 0x9d4   : > { %2791 = vmatpush1.bf16.msra.mxu0 %v6099_v15 }
 0x9d5   : > { %2792 = vmatprep.subr.bf16.mxu0 %v6106_v16 }
 0x9d6   : > { %2832 = vmatpush1.bf16.msra.mxu1 %v6141_v39 }
 0x9d7   : > { %2833 = vmatprep.subr.bf16.mxu1 %v6147_v30 }
 0x9d8   : > { %2793 = vmatpush1.bf16.msra.mxu0 %v6124_v31 }
 0x9d9   : > { %2794 = vmatprep.subr.bf16.mxu0 %v6129_v35 }
 0x9da   : > { %2834 = vmatpush1.bf16.msra.mxu1 %v6165_v2 }
 0x9db   : > { %2835 = vmatprep.subr.bf16.mxu1 %v6172_v4 }
 0x9dc   : > { %2795 = vmatpush1.bf16.msra.mxu0 %v6153_v40 }
 0x9dd   : > { %2796 = vmatprep.subr.bf16.mxu0 %v6159_v44 }
 0x9de   : > { %2836 = vmatpush1.bf16.msra.mxu1 %v6192_v11 }
 0x9df   : > { %2837 = vmatprep.subr.bf16.mxu1 %v6203_v36 }
 0x9e0   : > { %2797 = vmatpush1.bf16.msra.mxu0 %v6177_v5 }
 0x9e1   : > { %2798 = vmatprep.subr.bf16.mxu0 %v6183_v7 }
 0x9e2   : > { %2838 = vmatpush1.bf16.msra.mxu1 %v6214_v60 }
 0x9e3   : > { %2839 = vmatprep.subr.bf16.mxu1 %v6221_v6 }
 0x9e4   : > { %2799 = vmatpush1.bf16.msra.mxu0 %v6197_v38 }
 0x9e5   : > { %2800 = vmatprep.subr.bf16.mxu0 %v6209_v41 }
 0x9e6   : > { %2840 = vmatpush1.bf16.msra.mxu1 %v6237_v19 }
 0x9e7   : > { %2841 = vmatprep.subr.bf16.mxu1 %v6247_v22 }
 0x9e8   : > { %2801 = vmatpush1.bf16.msra.mxu0 %v6230_v18 }
 0x9e9   : > { %2914 = vmatprep.subr.bf16.mxu0 %v6056_v8 }
 0x9ea   : > { %2842 = vmatpush1.bf16.msra.mxu1 %v6254_v23 }
 0x9eb   : > { %2955 = vmatprep.subr.bf16.mxu1 %v6088_v13 }
 0xa9e   : > { %v2672_v28 = vpop.f32.mrb[0].mxu0 }
 0xa9f   : > { %v2720_v54 = vadd.f32 %v2672_v28, %v2441_v49  ;;  %v2674_v32 = vpop.f32.mrb[1].mxu0 }
 0xaa0   : > { %v2721_v56 = vadd.f32 %v2674_v32, %v2442_v52  ;;  %v2676_v57 = vpop.f32.mrb[2].mxu0  ;;  %v2713_v3 = vpop.f32.mrb[0].mxu1 }
 0xaa1   : > { %v2745_v58 = vadd.f32 %v6304_v51, %v2720_v54  ;;  %v2677_v61 = vpop.f32.mrb[3].mxu0  ;;  %v2722_v59 = vadd.f32 %v2713_v3, %v2443_v21  ;;  %v2715_v0 = vpop.f32.mrb[1].mxu1 }
 0xaa2   : > { %v2746_v24 = vadd.f32 %v6307_v53, %v2721_v56  ;;  %v2717_v43 = vpop.f32.mrb[2].mxu1  ;;  %v2723_v45 = vadd.f32 %v2715_v0, %v2444_v42  ;;  %v2436_v56 = vld [vmem:[#allocation4] sm:$0xff]  ;;  %v3029_v0 = vstv %s3028_s20  ;;  %v2781_v42 = vld [vmem:[%s6301_s14 + $0x20] sm:$0xff] }
 0xaa3   : > { %v4098_v62 = vmul.f32 -1.442695, %v2745_v58  ;;  %v2718_v29 = vpop.f32.mrb[3].mxu1  ;;  %v2747_v20 = vadd.f32 %v6312_v27, %v2722_v59  ;;  %vm3030_vm4 = vcmp.eq.s32.totalorder %v6225_v17, %v3029_v0  ;;  %v2782_v43 = vld [vmem:[%s6301_s14 + $0x28] sm:$0xff] }
 0xaa4   : > { %v4099_v26 = vmul.f32 -1.442695, %v2746_v24  ;;  %v2748_v49 = vadd.f32 %v6316_v46, %v2723_v45  ;;  %v3031_v63 = vsel %vm3030_vm4, 1, %v4877_v9 }
 0xaa5   : > { %4618 = vpow2.f32 %v4098_v62  ;;  %v4100_v48 = vmul.f32 -1.442695, %v2747_v20  ;;  %3033 = vperm.xlu1 %4561, %v3031_v63  }
 0xaa6   : > { %4620 = vpow2.f32 %v4099_v26 }
 0xaa7   : > { %4622 = vpow2.f32 %v4100_v48 }
 0xaa8   : > { %4624 = vtanh.f32 %v2748_v49 }
 0xaaf   : > { %v4619_v52 = vpop.eup %4618 }
 0xab0   : > { %v4621_v28 = vpop.eup %4620  ;;  %v2758_v54 = vadd.f32 1.0, %v4619_v52 }
 0xab1   : > { %v2759_v32 = vadd.f32 1.0, %v4621_v28  ;;  %v4623_v33 = vpop.eup %4622 }
 0xab2   : > { %4626 = vrcp.f32 %v2758_v54  ;;  %v4625_v55 = vpop.eup %4624  ;;  %v2760_v58 = vadd.f32 1.0, %v4623_v33 }
 0xab3   : > { %4628 = vrcp.f32 %v2759_v32 }
 0xab4   : > { %4630 = vrcp.f32 %v2760_v58 }
 0xabc   : > { %v4627_v57 = vpop.eup %4626 }
 0xabd   : > { %v4629_v61 = vpop.eup %4628  ;;  %v2769_v21 = vmul.f32 %v4627_v57, %v4625_v55 }
 0xabe   : > { %v2768_v47 = vmul.f32 %v4629_v61, %v2436_v56  ;;  %v4631_v62 = vpop.eup %4630  ;;  %v2783_v56 = vld [vmem:[%s6301_s14 + $0x30] sm:$0xff] }
 0xac0   : > { %v6319_v24 = vadd.f32 %v2769_v21, %v2768_v47  ;;  %v2784_v47 = vld [vmem:[%s6301_s14 + $0x38] sm:$0xff] }
 0xac2   : > { %4632 = vtanh.f32 %v6319_v24 }
 0xacc   : > { %v4633_v3 = vpop.eup %4632 }
 0xacd   : > { %v6322_v26 = vmul.f32 %v4633_v3, %v4631_v62 }
 0xacf   : > { %v2785_v59 = vpack.c.bf16 %v6322_v26, %v6322_v26 }
 0xad1   : > { %2819 = vmatmul.mubr.bf16.vlgmr.msra.gmra.mrb[4].mxu0 %v2785_v59  ;;  %2860 = vmatmul.mubr.bf16.vlgmr.msra.gmra.mrb[4].mxu1 %v2785_v59 }
 0xad2   : > { %2915 = vmatpush1.bf16.msra.mxu0 %v6061_v1  ;;  %2956 = vmatpush1.bf16.msra.mxu1 %v6093_v14 }
 0xad3   : > { %2916 = vmatprep.subr.bf16.mxu0 %v6069_v25  ;;  %2957 = vmatprep.subr.bf16.mxu1 %v6112_v50 }
 0xad4   : > { %2946 = vmatprep.mubr.bf16.mxu0 %v4877_v9  ;;  %2987 = vmatprep.mubr.bf16.mxu1 %v4877_v9 }
 0xad6   : > { %2917 = vmatpush1.bf16.msra.mxu0 %v6076_v34  ;;  %2958 = vmatpush1.bf16.msra.mxu1 %v6117_v10 }
 0xad7   : > { %2918 = vmatprep.subr.bf16.mxu0 %v6083_v12  ;;  %2959 = vmatprep.subr.bf16.mxu1 %v6134_v37 }
 0xada   : > { %2919 = vmatpush1.bf16.msra.mxu0 %v6099_v15  ;;  %2960 = vmatpush1.bf16.msra.mxu1 %v6141_v39 }
 0xadb   : > { %2920 = vmatprep.subr.bf16.mxu0 %v6106_v16  ;;  %2961 = vmatprep.subr.bf16.mxu1 %v6147_v30 }
 0xade   : > { %2921 = vmatpush1.bf16.msra.mxu0 %v6124_v31  ;;  %2962 = vmatpush1.bf16.msra.mxu1 %v6165_v2 }
 0xadf   : > { %2922 = vmatprep.subr.bf16.mxu0 %v6129_v35  ;;  %2963 = vmatprep.subr.bf16.mxu1 %v6172_v4 }
 0xae2   : > { %2923 = vmatpush1.bf16.msra.mxu0 %v6153_v40  ;;  %2964 = vmatpush1.bf16.msra.mxu1 %v6192_v11 }
 0xae3   : > { %2924 = vmatprep.subr.bf16.mxu0 %v6159_v44  ;;  %2965 = vmatprep.subr.bf16.mxu1 %v6203_v36 }
 0xae6   : > { %2925 = vmatpush1.bf16.msra.mxu0 %v6177_v5  ;;  %2966 = vmatpush1.bf16.msra.mxu1 %v6214_v60 }
 0xae7   : > { %2926 = vmatprep.subr.bf16.mxu0 %v6183_v7  ;;  %2967 = vmatprep.subr.bf16.mxu1 %v6221_v6 }
 0xaea   : > { %2927 = vmatpush1.bf16.msra.mxu0 %v6197_v38  ;;  %2968 = vmatpush1.bf16.msra.mxu1 %v6237_v19 }
 0xaeb   : > { %2928 = vmatprep.subr.bf16.mxu0 %v6209_v41  ;;  %2969 = vmatprep.subr.bf16.mxu1 %v6247_v22 }
 0xaee   : > { %2929 = vmatpush1.bf16.msra.mxu0 %v6230_v18  ;;  %2970 = vmatpush1.bf16.msra.mxu1 %v6254_v23 }
 0xaef   : > { %3042 = vmatprep.subr.bf16.mxu0 %v6056_v8  ;;  %3083 = vmatprep.subr.bf16.mxu1 %v6088_v13 }
 0xba4   : > { %v2820_v29 = vpop.f32.mrb[4].mxu0  ;;  %v2861_v20 = vpop.f32.mrb[4].mxu1 }
 0xba5   : > { %v2868_v45 = vadd.f32 %v2820_v29, %v2781_v42  ;;  %v2822_v48 = vpop.f32.mrb[5].mxu0  ;;  %v2863_v49 = vpop.f32.mrb[5].mxu1  ;;  %v2870_v21 = vadd.f32 %v2861_v20, %v2783_v56 }
 0xba6   : > { %v2869_v52 = vadd.f32 %v2822_v48, %v2782_v43  ;;  %v2824_v28 = vpop.f32.mrb[6].mxu0  ;;  %v2865_v54 = vpop.f32.mrb[6].mxu1  ;;  %v2871_v62 = vadd.f32 %v2863_v49, %v2784_v47 }
 0xba7   : > { %v2872_v32 = vadd.f32 %v2868_v45, %v6304_v51  ;;  %v2825_v33 = vpop.f32.mrb[7].mxu0  ;;  %v2866_v55 = vpop.f32.mrb[7].mxu1  ;;  %v2874_v3 = vadd.f32 %v2870_v21, %v6312_v27 }
 0xba8   : > { %v2873_v57 = vadd.f32 %v2869_v52, %v6307_v53  ;;  %v2875_v59 = vadd.f32 %v2871_v62, %v6316_v46  ;;  %v2778_v33 = vpop.permute.xlu0 %2777 }
 0xba9   : > { %v4101_v58 = vmul.f32 -1.442695, %v2872_v32  ;;  %v4103_v0 = vmul.f32 -1.442695, %v2874_v3  ;;  %vm2779_vm5 = vcmp.eq.s32.totalorder %v2778_v33, 1  ;;  %v2909_v3 = vld [vmem:[%s6301_s14 + $0x40] sm:$0xff] }
 0xbaa   : > { %v4102_v61 = vmul.f32 -1.442695, %v2873_v57  ;;  %v2437_v57 = vld [vmem:[#allocation5] sm:$0xff] }
 0xbab   : > { %4634 = vpow2.f32 %v4101_v58  ;;  %v2780_v21 = vsel %vm2779_vm5, %v6322_v26, %v2437_v57 }
 0xbac   : > { %4636 = vpow2.f32 %v4102_v61  ;;  %v2906_v55 = vpop.permute.xlu0 %2905 }
 0xbad   : > { %4638 = vtanh.f32 %v2875_v59  ;;  %vm2907_vm6 = vcmp.eq.s32.totalorder %v2906_v55, 1  ;;  %v2910_v59 = vld [vmem:[%s6301_s14 + $0x48] sm:$0xff] }
 0xbae   : > { %4640 = vpow2.f32 %v4103_v0 }
 0xbb5   : > { %v4635_v63 = vpop.eup %4634 }
 0xbb6   : > { %v2885_v42 = vadd.f32 1.0, %v4635_v63  ;;  %v4637_v43 = vpop.eup %4636 }
 0xbb7   : > { %v2886_v29 = vadd.f32 1.0, %v4637_v43  ;;  %v4639_v45 = vpop.eup %4638 }
 0xbb8   : > { %4642 = vrcp.f32 %v2885_v42  ;;  %v4641_v48 = vpop.eup %4640 }
 0xbb9   : > { %4644 = vrcp.f32 %v2886_v29  ;;  %v2887_v54 = vadd.f32 1.0, %v4641_v48 }
 0xbbb   : > { %4646 = vrcp.f32 %v2887_v54 }
 0xbc2   : > { %v4643_v52 = vpop.eup %4642 }
 0xbc3   : > { %v2896_v20 = vmul.f32 %v4643_v52, %v4639_v45  ;;  %v4645_v28 = vpop.eup %4644 }
 0xbc4   : > { %v2895_v49 = vmul.f32 %v4645_v28, %v6319_v24  ;;  %v3157_v24 = vstv %s3156_s10 }
 0xbc5   : > { %v4647_v56 = vpop.eup %4646  ;;  %vm3158_vm7 = vcmp.eq.s32.totalorder %v6225_v17, %v3157_v24 }
 0xbc6   : > { %v6372_v32 = vadd.f32 %v2896_v20, %v2895_v49  ;;  %v3159_v26 = vsel %vm3158_vm7, 1, %v4877_v9  ;;  %v2911_v49 = vld [vmem:[%s6301_s14 + $0x50] sm:$0xff] }
 0xbc7   : > { %3161 = vperm.xlu1 %4561, %v3159_v26  }
 0xbc8   : > { %4648 = vtanh.f32 %v6372_v32 }
 0xbd2   : > { %v4649_v58 = vpop.eup %4648 }
 0xbd3   : > { %v2899_v61 = vmul.f32 %v4649_v58, %v4647_v56  ;;  %v2912_v58 = vld [vmem:[%s6301_s14 + $0x58] sm:$0xff] }
 0xbd5   : > { %v6376_v47 = vsel %vm2907_vm6, %v2899_v61, %v2780_v21  ;;  %v2913_v62 = vpack.c.bf16 %v2899_v61, %v2899_v61 }
 0xbd7   : > { %2947 = vmatmul.mubr.bf16.vlgmr.msra.gmra.mrb[8].mxu0 %v2913_v62  ;;  %2988 = vmatmul.mubr.bf16.vlgmr.msra.gmra.mrb[8].mxu1 %v2913_v62 }
 0xbd8   : > { %3043 = vmatpush1.bf16.msra.mxu0 %v6061_v1  ;;  %3084 = vmatpush1.bf16.msra.mxu1 %v6093_v14 }
 0xbd9   : > { %3044 = vmatprep.subr.bf16.mxu0 %v6069_v25  ;;  %3085 = vmatprep.subr.bf16.mxu1 %v6112_v50 }
 0xbda   : > { %3074 = vmatprep.mubr.bf16.mxu0 %v4877_v9  ;;  %3115 = vmatprep.mubr.bf16.mxu1 %v4877_v9 }
 0xbdc   : > { %3045 = vmatpush1.bf16.msra.mxu0 %v6076_v34  ;;  %3086 = vmatpush1.bf16.msra.mxu1 %v6117_v10 }
 0xbdd   : > { %3046 = vmatprep.subr.bf16.mxu0 %v6083_v12  ;;  %3087 = vmatprep.subr.bf16.mxu1 %v6134_v37 }
 0xbe0   : > { %3047 = vmatpush1.bf16.msra.mxu0 %v6099_v15  ;;  %3088 = vmatpush1.bf16.msra.mxu1 %v6141_v39 }
 0xbe1   : > { %3048 = vmatprep.subr.bf16.mxu0 %v6106_v16  ;;  %3089 = vmatprep.subr.bf16.mxu1 %v6147_v30 }
 0xbe4   : > { %3049 = vmatpush1.bf16.msra.mxu0 %v6124_v31  ;;  %3090 = vmatpush1.bf16.msra.mxu1 %v6165_v2 }
 0xbe5   : > { %3050 = vmatprep.subr.bf16.mxu0 %v6129_v35  ;;  %3091 = vmatprep.subr.bf16.mxu1 %v6172_v4 }
 0xbe8   : > { %3051 = vmatpush1.bf16.msra.mxu0 %v6153_v40  ;;  %3092 = vmatpush1.bf16.msra.mxu1 %v6192_v11 }
 0xbe9   : > { %3052 = vmatprep.subr.bf16.mxu0 %v6159_v44  ;;  %3093 = vmatprep.subr.bf16.mxu1 %v6203_v36 }
 0xbec   : > { %3053 = vmatpush1.bf16.msra.mxu0 %v6177_v5  ;;  %3094 = vmatpush1.bf16.msra.mxu1 %v6214_v60 }
 0xbed   : > { %3054 = vmatprep.subr.bf16.mxu0 %v6183_v7  ;;  %3095 = vmatprep.subr.bf16.mxu1 %v6221_v6 }
 0xbf0   : > { %3055 = vmatpush1.bf16.msra.mxu0 %v6197_v38  ;;  %3096 = vmatpush1.bf16.msra.mxu1 %v6237_v19 }
 0xbf1   : > { %3056 = vmatprep.subr.bf16.mxu0 %v6209_v41  ;;  %3097 = vmatprep.subr.bf16.mxu1 %v6247_v22 }
 0xbf4   : > { %3057 = vmatpush1.bf16.msra.mxu0 %v6230_v18  ;;  %3098 = vmatpush1.bf16.msra.mxu1 %v6254_v23 }
 0xbf5   : > { %3170 = vmatprep.subr.bf16.mxu0 %v6056_v8  ;;  %3211 = vmatprep.subr.bf16.mxu1 %v6088_v13 }
 0xcaa   : > { %v2948_v0 = vpop.f32.mrb[8].mxu0  ;;  %v2989_v63 = vpop.f32.mrb[8].mxu1 }
 0xcab   : > { %v2996_v42 = vadd.f32 %v2948_v0, %v2909_v3  ;;  %v2950_v43 = vpop.f32.mrb[9].mxu0  ;;  %v2991_v29 = vpop.f32.mrb[9].mxu1  ;;  %v2998_v57 = vadd.f32 %v2989_v63, %v2911_v49 }
 0xcac   : > { %v2997_v45 = vadd.f32 %v2950_v43, %v2910_v59  ;;  %v2952_v48 = vpop.f32.mrb[10].mxu0  ;;  %v2993_v52 = vpop.f32.mrb[10].mxu1  ;;  %v2999_v61 = vadd.f32 %v2991_v29, %v2912_v58  ;;  %v3038_v58 = vld [vmem:[%s6301_s14 + $0x68] sm:$0xff] }
 0xcad   : > { %v3000_v20 = vadd.f32 %v2996_v42, %v6304_v51  ;;  %v2953_v28 = vpop.f32.mrb[11].mxu0  ;;  %v2994_v54 = vpop.f32.mrb[11].mxu1  ;;  %v3002_v21 = vadd.f32 %v2998_v57, %v6312_v27  ;;  %v3037_v57 = vld [vmem:[%s6301_s14 + $0x60] sm:$0xff] }
 0xcae   : > { %v3001_v33 = vadd.f32 %v2997_v45, %v6307_v53  ;;  %v3003_v62 = vadd.f32 %v2999_v61, %v6316_v46  ;;  %v3034_v28 = vpop.permute.xlu1 %3033 }
 0xcaf   : > { %v4104_v55 = vmul.f32 -1.442695, %v3000_v20  ;;  %v4106_v24 = vmul.f32 -1.442695, %v3002_v21  ;;  %vm3035_vm8 = vcmp.eq.s32.totalorder %v3034_v28, 1 }
 0xcb0   : > { %v4105_v56 = vmul.f32 -1.442695, %v3001_v33 }
 0xcb1   : > { %4650 = vpow2.f32 %v4104_v55 }
 0xcb2   : > { %4652 = vpow2.f32 %v4105_v56 }
 0xcb3   : > { %4654 = vtanh.f32 %v3003_v62 }
 0xcb4   : > { %4656 = vpow2.f32 %v4106_v24 }
 0xcbb   : > { %v4651_v26 = vpop.eup %4650 }
 0xcbc   : > { %v3013_v3 = vadd.f32 1.0, %v4651_v26  ;;  %v4653_v59 = vpop.eup %4652 }
 0xcbd   : > { %v3014_v0 = vadd.f32 1.0, %v4653_v59  ;;  %v4655_v42 = vpop.eup %4654 }
 0xcbe   : > { %4658 = vrcp.f32 %v3013_v3  ;;  %v4657_v43 = vpop.eup %4656 }
 0xcbf   : > { %4660 = vrcp.f32 %v3014_v0  ;;  %v3015_v52 = vadd.f32 1.0, %v4657_v43  ;;  %v3039_v43 = vld [vmem:[%s6301_s14 + $0x70] sm:$0xff] }
 0xcc1   : > { %4662 = vrcp.f32 %v3015_v52 }
 0xcc8   : > { %v4659_v45 = vpop.eup %4658 }
 0xcc9   : > { %v3024_v63 = vmul.f32 %v4659_v45, %v4655_v42  ;;  %v4661_v48 = vpop.eup %4660 }
 0xcca   : > { %v3023_v29 = vmul.f32 %v4661_v48, %v6372_v32  ;;  %v3285_v32 = vstv %s3284_s16 }
 0xccb   : > { %v4663_v54 = vpop.eup %4662  ;;  %vm3286_vm9 = vcmp.eq.s32.totalorder %v6225_v17, %v3285_v32 }
 0xccc   : > { %v6424_v20 = vadd.f32 %v3024_v63, %v3023_v29  ;;  %v3040_v29 = vld [vmem:[%s6301_s14 + $0x78] sm:$0xff] }
 0xcce   : > { %4664 = vtanh.f32 %v6424_v20 }
 0xcd8   : > { %v4665_v49 = vpop.eup %4664 }
 0xcd9   : > { %v3027_v33 = vmul.f32 %v4665_v49, %v4663_v54 }
 0xcdb   : > { %v6428_v55 = vsel %vm3035_vm8, %v3027_v33, %v6376_v47  ;;  %v3041_v56 = vpack.c.bf16 %v3027_v33, %v3027_v33  ;;  %v3287_v47 = vsel %vm3286_vm9, 1, %v4877_v9 }
 0xcdc   : > { %3289 = vperm.xlu0 %4560, %v3287_v47  }
 0xcdd   : > { %3075 = vmatmul.mubr.bf16.vlgmr.msra.gmra.mrb[12].mxu0 %v3041_v56  ;;  %3116 = vmatmul.mubr.bf16.vlgmr.msra.gmra.mrb[12].mxu1 %v3041_v56 }
 0xcde   : > { %3171 = vmatpush1.bf16.msra.mxu0 %v6061_v1  ;;  %3212 = vmatpush1.bf16.msra.mxu1 %v6093_v14 }
 0xcdf   : > { %3172 = vmatprep.subr.bf16.mxu0 %v6069_v25  ;;  %3213 = vmatprep.subr.bf16.mxu1 %v6112_v50 }
 0xce0   : > { %3202 = vmatprep.mubr.bf16.mxu0 %v4877_v9  ;;  %3243 = vmatprep.mubr.bf16.mxu1 %v4877_v9 }
 0xce2   : > { %3173 = vmatpush1.bf16.msra.mxu0 %v6076_v34  ;;  %3214 = vmatpush1.bf16.msra.mxu1 %v6117_v10 }
 0xce3   : > { %3174 = vmatprep.subr.bf16.mxu0 %v6083_v12  ;;  %3215 = vmatprep.subr.bf16.mxu1 %v6134_v37 }
 0xce6   : > { %3175 = vmatpush1.bf16.msra.mxu0 %v6099_v15  ;;  %3216 = vmatpush1.bf16.msra.mxu1 %v6141_v39 }
 0xce7   : > { %3176 = vmatprep.subr.bf16.mxu0 %v6106_v16  ;;  %3217 = vmatprep.subr.bf16.mxu1 %v6147_v30 }
 0xcea   : > { %3177 = vmatpush1.bf16.msra.mxu0 %v6124_v31  ;;  %3218 = vmatpush1.bf16.msra.mxu1 %v6165_v2 }
 0xceb   : > { %3178 = vmatprep.subr.bf16.mxu0 %v6129_v35  ;;  %3219 = vmatprep.subr.bf16.mxu1 %v6172_v4 }
 0xcee   : > { %3179 = vmatpush1.bf16.msra.mxu0 %v6153_v40  ;;  %3220 = vmatpush1.bf16.msra.mxu1 %v6192_v11 }
 0xcef   : > { %3180 = vmatprep.subr.bf16.mxu0 %v6159_v44  ;;  %3221 = vmatprep.subr.bf16.mxu1 %v6203_v36 }
 0xcf2   : > { %3181 = vmatpush1.bf16.msra.mxu0 %v6177_v5  ;;  %3222 = vmatpush1.bf16.msra.mxu1 %v6214_v60 }
 0xcf3   : > { %3182 = vmatprep.subr.bf16.mxu0 %v6183_v7  ;;  %3223 = vmatprep.subr.bf16.mxu1 %v6221_v6 }
 0xcf6   : > { %3183 = vmatpush1.bf16.msra.mxu0 %v6197_v38  ;;  %3224 = vmatpush1.bf16.msra.mxu1 %v6237_v19 }
 0xcf7   : > { %3184 = vmatprep.subr.bf16.mxu0 %v6209_v41  ;;  %3225 = vmatprep.subr.bf16.mxu1 %v6247_v22 }
 0xcfa   : > { %3185 = vmatpush1.bf16.msra.mxu0 %v6230_v18  ;;  %3226 = vmatpush1.bf16.msra.mxu1 %v6254_v23 }
 0xcfb   : > { %3298 = vmatprep.subr.bf16.mxu0 %v6056_v8  ;;  %3339 = vmatprep.subr.bf16.mxu1 %v6088_v13 }
 0xdb0   : > { %v3076_v61 = vpop.f32.mrb[12].mxu0  ;;  %v3117_v21 = vpop.f32.mrb[12].mxu1 }
 0xdb1   : > { %v3124_v62 = vadd.f32 %v3076_v61, %v3037_v57  ;;  %v3078_v24 = vpop.f32.mrb[13].mxu0  ;;  %v3119_v26 = vpop.f32.mrb[13].mxu1  ;;  %v3126_v52 = vadd.f32 %v3117_v21, %v3039_v43 }
 0xdb2   : > { %v3125_v3 = vadd.f32 %v3078_v24, %v3038_v58  ;;  %v3080_v8 = vpop.f32.mrb[14].mxu0  ;;  %v3121_v59 = vpop.f32.mrb[14].mxu1  ;;  %v3127_v28 = vadd.f32 %v3119_v26, %v3040_v29 }
 0xdb3   : > { %v3128_v13 = vadd.f32 %v3124_v62, %v6304_v51  ;;  %v3081_v0 = vpop.f32.mrb[15].mxu0  ;;  %v3122_v42 = vpop.f32.mrb[15].mxu1  ;;  %v3130_v54 = vadd.f32 %v3126_v52, %v6312_v27 }
 0xdb4   : > { %v3129_v45 = vadd.f32 %v3125_v3, %v6307_v53  ;;  %v3131_v49 = vadd.f32 %v3127_v28, %v6316_v46  ;;  %v3162_v59 = vpop.permute.xlu1 %3161 }
 0xdb5   : > { %v4107_v63 = vmul.f32 -1.442695, %v3128_v13  ;;  %v4109_v33 = vmul.f32 -1.442695, %v3130_v54  ;;  %vm3163_vm10 = vcmp.eq.s32.totalorder %v3162_v59, 1 }
 0xdb6   : > { %v4108_v48 = vmul.f32 -1.442695, %v3129_v45  ;;  %v6579_v59 = vld [vmem:[%s6887_s3 + $0x28] ss:$16 sps:$4 sm:$0xff]  }
 0xdb7   : > { %4666 = vpow2.f32 %v4107_v63 }
 0xdb8   : > { %4668 = vpow2.f32 %v4108_v48 }
 0xdb9   : > { %4670 = vtanh.f32 %v3131_v49 }
 0xdba   : > { %4672 = vpow2.f32 %v4109_v33 }
 0xdc1   : > { %v4667_v56 = vpop.eup %4666 }
 0xdc2   : > { %v3141_v32 = vadd.f32 1.0, %v4667_v56  ;;  %v4669_v47 = vpop.eup %4668 }
 0xdc3   : > { %v3142_v57 = vadd.f32 1.0, %v4669_v47  ;;  %v4671_v58 = vpop.eup %4670 }
 0xdc4   : > { %4674 = vrcp.f32 %v3141_v32  ;;  %v4673_v61 = vpop.eup %4672  ;;  %v3290_v32 = vpop.permute.xlu0 %3289 }
 0xdc5   : > { %4676 = vrcp.f32 %v3142_v57  ;;  %v3143_v3 = vadd.f32 1.0, %v4673_v61  ;;  %vm3291_vm12 = vcmp.eq.s32.totalorder %v3290_v32, 1 }
 0xdc7   : > { %4678 = vrcp.f32 %v3143_v3  ;;  %v6559_v3 = vld [vmem:[%s6887_s3 + $0x24] ss:$16 sps:$4 sm:$0xff]  }
 0xdce   : > { %v4675_v62 = vpop.eup %4674 }
 0xdcf   : > { %v3152_v21 = vmul.f32 %v4675_v62, %v4671_v58  ;;  %v4677_v24 = vpop.eup %4676 }
 0xdd0   : > { %v3151_v26 = vmul.f32 %v4677_v24, %v6424_v20  ;;  %v6553_v24 = vld [vmem:[%s6887_s3 + $0x8] ss:$16 sps:$4 sm:$0xff]  }
 0xdd1   : > { %v4679_v13 = vpop.eup %4678 }
 0xdd2   : > { %v6476_v8 = vadd.f32 %v3152_v21, %v3151_v26  ;;  %v6547_v21 = vld [vmem:[%s6887_s3] ss:$16 sps:$4 sm:$0xff]   ;;  %v6565_v26 = vld [vmem:[%s6887_s3 + $0x2c] ss:$16 sps:$4 sm:$0xff]  }
 0xdd4   : > { %4680 = vtanh.f32 %v6476_v8 }
 0xdde   : > { %v4681_v0 = vpop.eup %4680 }
 0xddf   : > { %v3155_v42 = vmul.f32 %v4681_v0, %v4679_v13  ;;  %v6585_v13 = vld [vmem:[%s6887_s3 + $0x44] ss:$16 sps:$4 sm:$0xff]   ;;  %v6591_v0 = vld [vmem:[%s6887_s3 + $0x4c] ss:$16 sps:$4 sm:$0xff]  }
 0xde1   : > { %v6480_v43 = vsel %vm3163_vm10, %v3155_v42, %v6428_v55  ;;  %v3169_v45 = vpack.c.bf16 %v3155_v42, %v3155_v42  ;;  %v6597_v42 = vld [vmem:[%s6887_s3 + $0x40] ss:$16 sps:$4 sm:$0xff]  }
 0xde3   : > { %3203 = vmatmul.mubr.bf16.vlgmr.msra.gmra.mrb[16].mxu0 %v3169_v45  ;;  %3244 = vmatmul.mubr.bf16.vlgmr.msra.gmra.mrb[16].mxu1 %v3169_v45  ;;  %v6609_v45 = vld [vmem:[%s6887_s3 + $0x64] ss:$16 sps:$4 sm:$0xff]  }
 0xde4   : > { %3299 = vmatpush1.bf16.msra.mxu0 %v6061_v1  ;;  %3340 = vmatpush1.bf16.msra.mxu1 %v6093_v14  ;;  %v6517_v1 = vld [vmem:[%s6887_s3 + $0x4] ss:$16 sps:$4 sm:$0xff]  }
 0xde5   : > { %3300 = vmatprep.subr.bf16.mxu0 %v6069_v25  ;;  %3341 = vmatprep.subr.bf16.mxu1 %v6112_v50  ;;  %v6523_v25 = vld [vmem:[%s6887_s3 + $0xc] ss:$16 sps:$4 sm:$0xff]   ;;  %v3165_v14 = vld [vmem:[%s6301_s14 + $0x80] sm:$0xff] }
 0xde6   : > { %3330 = vmatprep.mubr.bf16.mxu0 %v4877_v9  ;;  %3371 = vmatprep.mubr.bf16.mxu1 %v4877_v9 }
 0xde8   : > { %3301 = vmatpush1.bf16.msra.mxu0 %v6076_v34  ;;  %3342 = vmatpush1.bf16.msra.mxu1 %v6117_v10  ;;  %v3413_v34 = vstv %s3412_s9 }
 0xde9   : > { %3302 = vmatprep.subr.bf16.mxu0 %v6083_v12  ;;  %3343 = vmatprep.subr.bf16.mxu1 %v6134_v37  ;;  %vm3414_vm11 = vcmp.eq.s32.totalorder %v6225_v17, %v3413_v34  ;;  %v6615_v34 = vld [vmem:[%s6887_s3 + $0x6c] ss:$16 sps:$4 sm:$0xff]  }
 0xdea   : > { %v3415_v12 = vsel %vm3414_vm11, 1, %v4877_v9 }
 0xdeb   : > { %3417 = vperm.xlu1 %4561, %v3415_v12   ;;  %v6621_v12 = vld [vmem:[%s6887_s3 + $0x60] ss:$16 sps:$4 sm:$0xff]  }
 0xdec   : > { %3303 = vmatpush1.bf16.msra.mxu0 %v6099_v15  ;;  %3344 = vmatpush1.bf16.msra.mxu1 %v6141_v39  ;;  %v3166_v15 = vld [vmem:[%s6301_s14 + $0x88] sm:$0xff] }
 0xded   : > { %3304 = vmatprep.subr.bf16.mxu0 %v6106_v16  ;;  %3345 = vmatprep.subr.bf16.mxu1 %v6147_v30 }
 0xdf0   : > { %3305 = vmatpush1.bf16.msra.mxu0 %v6124_v31  ;;  %3346 = vmatpush1.bf16.msra.mxu1 %v6165_v2 }
 0xdf1   : > { %3306 = vmatprep.subr.bf16.mxu0 %v6129_v35  ;;  %3347 = vmatprep.subr.bf16.mxu1 %v6172_v4  ;;  %v3167_v4 = vld [vmem:[%s6301_s14 + $0x90] sm:$0xff] }
 0xdf4   : > { %3307 = vmatpush1.bf16.msra.mxu0 %v6153_v40  ;;  %3348 = vmatpush1.bf16.msra.mxu1 %v6192_v11 }
 0xdf5   : > { %3308 = vmatprep.subr.bf16.mxu0 %v6159_v44  ;;  %3349 = vmatprep.subr.bf16.mxu1 %v6203_v36  ;;  %v3168_v36 = vld [vmem:[%s6301_s14 + $0x98] sm:$0xff] }
 0xdf8   : > { %3309 = vmatpush1.bf16.msra.mxu0 %v6177_v5  ;;  %3350 = vmatpush1.bf16.msra.mxu1 %v6214_v60 }
 0xdf9   : > { %3310 = vmatprep.subr.bf16.mxu0 %v6183_v7  ;;  %3351 = vmatprep.subr.bf16.mxu1 %v6221_v6 }
 0xdfc   : > { %3311 = vmatpush1.bf16.msra.mxu0 %v6197_v38  ;;  %3352 = vmatpush1.bf16.msra.mxu1 %v6237_v19 }
 0xdfd   : > { %3312 = vmatprep.subr.bf16.mxu0 %v6209_v41  ;;  %3353 = vmatprep.subr.bf16.mxu1 %v6247_v22 }
 0xe00   : > { %3313 = vmatpush1.bf16.msra.mxu0 %v6230_v18  ;;  %3354 = vmatpush1.bf16.msra.mxu1 %v6254_v23 }
 0xe01   : > { %3426 = vmatprep.subr.bf16.mxu0 %v6517_v1  ;;  %3467 = vmatprep.subr.bf16.mxu1 %v6523_v25 }
 0xeb6   : > { %v3204_v16 = vpop.f32.mrb[16].mxu0  ;;  %v3245_v50 = vpop.f32.mrb[16].mxu1 }
 0xeb7   : > { %v3252_v10 = vadd.f32 %v3204_v16, %v3165_v14  ;;  %v3206_v31 = vpop.f32.mrb[17].mxu0  ;;  %v3247_v35 = vpop.f32.mrb[17].mxu1  ;;  %v3254_v38 = vadd.f32 %v3245_v50, %v3167_v4  ;;  %v6627_v14 = vld [vmem:[%s6887_s3 + $0x68] ss:$16 sps:$4 sm:$0xff]   ;;  %v6639_v16 = vld [vmem:[%s6887_s3 + $0x8c] ss:$16 sps:$4 sm:$0xff]  }
 0xeb8   : > { %v3253_v37 = vadd.f32 %v3206_v31, %v3166_v15  ;;  %v3208_v39 = vpop.f32.mrb[18].mxu0  ;;  %v3249_v30 = vpop.f32.mrb[18].mxu1  ;;  %v3255_v41 = vadd.f32 %v3247_v35, %v3168_v36  ;;  %v6633_v15 = vld [vmem:[%s6887_s3 + $0x84] ss:$16 sps:$4 sm:$0xff]   ;;  %v6645_v50 = vld [vmem:[%s6887_s3 + $0x80] ss:$16 sps:$4 sm:$0xff]  }
 0xeb9   : > { %v3256_v40 = vadd.f32 %v3252_v10, %v6304_v51  ;;  %v3209_v44 = vpop.f32.mrb[19].mxu0  ;;  %v3250_v2 = vpop.f32.mrb[19].mxu1  ;;  %v3258_v60 = vadd.f32 %v3254_v38, %v6312_v27  ;;  %v6651_v10 = vld [vmem:[%s6887_s3 + $0x88] ss:$16 sps:$4 sm:$0xff]   ;;  %v6657_v31 = vld [vmem:[%s6887_s3 + $0xa4] ss:$16 sps:$4 sm:$0xff]  }
 0xeba   : > { %v3257_v5 = vadd.f32 %v3253_v37, %v6307_v53  ;;  %v3259_v6 = vadd.f32 %v3255_v41, %v6316_v46  ;;  %v6663_v35 = vld [vmem:[%s6887_s3 + $0xac] ss:$16 sps:$4 sm:$0xff]   ;;  %v6669_v37 = vld [vmem:[%s6887_s3 + $0xa0] ss:$16 sps:$4 sm:$0xff]   ;;  %v6675_v39 = vld [vmem:[%s6887_s3 + $0xa8] ss:$16 sps:$4 sm:$0xff]  }
 0xebb   : > { %v4110_v7 = vmul.f32 -1.442695, %v3256_v40  ;;  %v4112_v18 = vmul.f32 -1.442695, %v3258_v60  ;;  %v6681_v30 = vld [vmem:[%s6887_s3 + $0xc4] ss:$16 sps:$4 sm:$0xff]  }
 0xebc   : > { %v4111_v11 = vmul.f32 -1.442695, %v3257_v5  ;;  %v6687_v40 = vld [vmem:[%s6887_s3 + $0xcc] ss:$16 sps:$4 sm:$0xff]   ;;  %v6693_v44 = vld [vmem:[%s6887_s3 + $0xc0] ss:$16 sps:$4 sm:$0xff]  }
 0xebd   : > { %4682 = vpow2.f32 %v4110_v7  ;;  %v6699_v2 = vld [vmem:[%s6887_s3 + $0xc8] ss:$16 sps:$4 sm:$0xff]   ;;  %v6705_v4 = vld [vmem:[%s6887_s3 + $0xe4] ss:$16 sps:$4 sm:$0xff]   ;;  %v6712_v5 = vld [vmem:[%s6887_s3 + $0xe0] ss:$16 sps:$4 sm:$0xff]   ;;  %v3541_v7 = vstv %s3540_s26 }
 0xebe   : > { %4684 = vpow2.f32 %v4111_v11  ;;  %vm3542_vm13 = vcmp.eq.s32.totalorder %v6225_v17, %v3541_v7  ;;  %v3293_v11 = vld [vmem:[%s6301_s14 + $0xa0] sm:$0xff]  ;;  %v3294_v38 = vld [vmem:[%s6301_s14 + $0xa8] sm:$0xff] }
 0xebf   : > { %4686 = vtanh.f32 %v3259_v6 }
 0xec0   : > { %4688 = vpow2.f32 %v4112_v18 }
 0xec7   : > { %v4683_v19 = vpop.eup %4682 }
 0xec8   : > { %v3269_v20 = vadd.f32 1.0, %v4683_v19  ;;  %v4685_v55 = vpop.eup %4684 }
 0xec9   : > { %v3270_v63 = vadd.f32 1.0, %v4685_v55  ;;  %v4687_v48 = vpop.eup %4686 }
 0xeca   : > { %4690 = vrcp.f32 %v3269_v20  ;;  %v4689_v52 = vpop.eup %4688 }
 0xecb   : > { %4692 = vrcp.f32 %v3270_v63  ;;  %v3271_v49 = vadd.f32 1.0, %v4689_v52  ;;  %v3295_v63 = vld [vmem:[%s6301_s14 + $0xb0] sm:$0xff] }
 0xecd   : > { %4694 = vrcp.f32 %v3271_v49 }
 0xed4   : > { %v4691_v29 = vpop.eup %4690 }
 0xed5   : > { %v3280_v28 = vmul.f32 %v4691_v29, %v4687_v48  ;;  %v4693_v54 = vpop.eup %4692 }
 0xed6   : > { %v3279_v33 = vmul.f32 %v4693_v54, %v6476_v8  ;;  %v6573_v8 = vld [vmem:[%s6887_s3 + $0x20] ss:$16 sps:$4 sm:$0xff]   ;;  %v3296_v54 = vld [vmem:[%s6301_s14 + $0xb8] sm:$0xff] }
 0xed7   : > { %v4695_v47 = vpop.eup %4694 }
 0xed8   : > { %v6538_v56 = vadd.f32 %v3280_v28, %v3279_v33 }
 0xeda   : > { %4696 = vtanh.f32 %v6538_v56 }
 0xee4   : > { %v4697_v57 = vpop.eup %4696 }
 0xee5   : > { %v3283_v58 = vmul.f32 %v4697_v57, %v4695_v47 }
 0xee7   : > { %v6542_v61 = vsel %vm3291_vm12, %v3283_v58, %v6480_v43  ;;  %v3297_v62 = vpack.c.bf16 %v3283_v58, %v3283_v58  ;;  %v6603_v43 = vld [vmem:[%s6887_s3 + $0x48] ss:$16 sps:$4 sm:$0xff]  }
 0xee9   : > { %3331 = vmatmul.mubr.bf16.vlgmr.msra.gmra.mrb[20].mxu0 %v3297_v62  ;;  %3372 = vmatmul.mubr.bf16.vlgmr.msra.gmra.mrb[20].mxu1 %v3297_v62 }
 0xeea   : > { %3427 = vmatpush1.bf16.msra.mxu0 %v6547_v21  ;;  %3468 = vmatpush1.bf16.msra.mxu1 %v6553_v24 }
 0xeeb   : > { %3428 = vmatprep.subr.bf16.mxu0 %v6559_v3  ;;  %3469 = vmatprep.subr.bf16.mxu1 %v6565_v26 }
 0xeec   : > { %3458 = vmatprep.mubr.bf16.mxu0 %v4877_v9  ;;  %3499 = vmatprep.mubr.bf16.mxu1 %v4877_v9 }
 0xeee   : > { %3429 = vmatpush1.bf16.msra.mxu0 %v6573_v8  ;;  %3470 = vmatpush1.bf16.msra.mxu1 %v6579_v59 }
 0xeef   : > { %3430 = vmatprep.subr.bf16.mxu0 %v6585_v13  ;;  %3471 = vmatprep.subr.bf16.mxu1 %v6591_v0 }
 0xef2   : > { %3431 = vmatpush1.bf16.msra.mxu0 %v6597_v42  ;;  %3472 = vmatpush1.bf16.msra.mxu1 %v6603_v43 }
 0xef3   : > { %3432 = vmatprep.subr.bf16.mxu0 %v6609_v45  ;;  %3473 = vmatprep.subr.bf16.mxu1 %v6615_v34 }
 0xef6   : > { %3433 = vmatpush1.bf16.msra.mxu0 %v6621_v12  ;;  %3474 = vmatpush1.bf16.msra.mxu1 %v6627_v14 }
 0xef7   : > { %3434 = vmatprep.subr.bf16.mxu0 %v6633_v15  ;;  %3475 = vmatprep.subr.bf16.mxu1 %v6639_v16 }
 0xefa   : > { %3435 = vmatpush1.bf16.msra.mxu0 %v6645_v50  ;;  %3476 = vmatpush1.bf16.msra.mxu1 %v6651_v10 }
 0xefb   : > { %3436 = vmatprep.subr.bf16.mxu0 %v6657_v31  ;;  %3477 = vmatprep.subr.bf16.mxu1 %v6663_v35 }
 0xefe   : > { %3437 = vmatpush1.bf16.msra.mxu0 %v6669_v37  ;;  %3478 = vmatpush1.bf16.msra.mxu1 %v6675_v39 }
 0xeff   : > { %3438 = vmatprep.subr.bf16.mxu0 %v6681_v30  ;;  %3479 = vmatprep.subr.bf16.mxu1 %v6687_v40 }
 0xf02   : > { %3439 = vmatpush1.bf16.msra.mxu0 %v6693_v44  ;;  %3480 = vmatpush1.bf16.msra.mxu1 %v6699_v2 }
 0xf03   : > { %3440 = vmatprep.subr.bf16.mxu0 %v6705_v4  ;;  %3481 = vmatprep.subr.bf16.mxu1 %v6247_v22  ;;  %v3543_v22 = vsel %vm3542_vm13, 1, %v4877_v9 }
 0xf04   : > { %3545 = vperm.xlu0 %4560, %v3543_v22  }
 0xf06   : > { %3441 = vmatpush1.bf16.msra.mxu0 %v6712_v5  ;;  %3482 = vmatpush1.bf16.msra.mxu1 %v6254_v23 }
 0xf07   : > { %3554 = vmatprep.subr.bf16.mxu0 %v6517_v1  ;;  %3595 = vmatprep.subr.bf16.mxu1 %v6523_v25 }
 0xfbc   : > { %v3332_v36 = vpop.f32.mrb[20].mxu0  ;;  %v3373_v41 = vpop.f32.mrb[20].mxu1 }
 0xfbd   : > { %v3380_v60 = vadd.f32 %v3332_v36, %v3293_v11  ;;  %v3334_v6 = vpop.f32.mrb[21].mxu0  ;;  %v3375_v23 = vpop.f32.mrb[21].mxu1  ;;  %v3382_v28 = vadd.f32 %v3373_v41, %v3295_v63 }
 0xfbe   : > { %v3381_v18 = vadd.f32 %v3334_v6, %v3294_v38  ;;  %v3336_v1 = vpop.f32.mrb[22].mxu0  ;;  %v3377_v19 = vpop.f32.mrb[22].mxu1  ;;  %v3383_v49 = vadd.f32 %v3375_v23, %v3296_v54 }
 0xfbf   : > { %v3384_v25 = vadd.f32 %v3380_v60, %v6304_v51  ;;  %v3337_v20 = vpop.f32.mrb[23].mxu0  ;;  %v3378_v55 = vpop.f32.mrb[23].mxu1  ;;  %v3386_v33 = vadd.f32 %v3382_v28, %v6312_v27 }
 0xfc0   : > { %v3385_v48 = vadd.f32 %v3381_v18, %v6307_v53  ;;  %v3387_v32 = vadd.f32 %v3383_v49, %v6316_v46  ;;  %v3418_v18 = vpop.permute.xlu1 %3417 }
 0xfc1   : > { %v4113_v52 = vmul.f32 -1.442695, %v3384_v25  ;;  %v4115_v47 = vmul.f32 -1.442695, %v3386_v33  ;;  %vm3419_vm14 = vcmp.eq.s32.totalorder %v3418_v18, 1  ;;  %v3546_v33 = vpop.permute.xlu0 %3545  ;;  %v3549_v18 = vld [vmem:[%s6301_s14 + $0xe0] sm:$0xff] }
 0xfc2   : > { %v4114_v29 = vmul.f32 -1.442695, %v3385_v48  ;;  %vm3547_vm0 = vcmp.eq.s32.totalorder %v3546_v33, 1 }
 0xfc3   : > { %4698 = vpow2.f32 %v4113_v52 }
 0xfc4   : > { %4700 = vpow2.f32 %v4114_v29 }
 0xfc5   : > { %4702 = vtanh.f32 %v3387_v32 }
 0xfc6   : > { %4704 = vpow2.f32 %v4115_v47 }
 0xfcd   : > { %v4699_v57 = vpop.eup %4698 }
 0xfce   : > { %v3397_v58 = vadd.f32 1.0, %v4699_v57  ;;  %v4701_v62 = vpop.eup %4700 }
 0xfcf   : > { %v3398_v7 = vadd.f32 1.0, %v4701_v62  ;;  %v4703_v22 = vpop.eup %4702 }
 0xfd0   : > { %4706 = vrcp.f32 %v3397_v58  ;;  %v4705_v11 = vpop.eup %4704 }
 0xfd1   : > { %4708 = vrcp.f32 %v3398_v7  ;;  %v3399_v60 = vadd.f32 1.0, %v4705_v11  ;;  %v4610_v7 = vld [vmem:[%s6889_s5] sm:$0xff]   ;;  %v4611_v11 = vld [vmem:[%s6889_s5 + $0x8] sm:$0xff]  }
 0xfd3   : > { %4710 = vrcp.f32 %v3399_v60  ;;  %v4615_v60 = vld [vmem:[%s6889_s5 + $0x28] sm:$0xff]  }
 0xfda   : > { %v4707_v38 = vpop.eup %4706 }
 0xfdb   : > { %v3408_v36 = vmul.f32 %v4707_v38, %v4703_v22  ;;  %v4709_v41 = vpop.eup %4708  ;;  %v4878_v22 = vmov 0.0   ;;  %v4612_v38 = vld [vmem:[%s6889_s5 + $0x10] sm:$0xff]  }
 0xfdc   : > { %v3407_v6 = vmul.f32 %v4709_v41, %v6538_v56  ;;  %v4776_v56 = vld [vmem:[%s6887_s3 + $0xec] ss:$16 sps:$4 sm:$0xff]   ;;  %v4614_v41 = vld [vmem:[%s6889_s5 + $0x20] sm:$0xff]  }
 0xfdd   : > { %v4711_v1 = vpop.eup %4710 }
 0xfde   : > { %v6730_v23 = vadd.f32 %v3408_v36, %v3407_v6  ;;  %v4613_v36 = vld [vmem:[%s6889_s5 + $0x18] sm:$0xff]   ;;  %v4616_v6 = vld [vmem:[%s6889_s5 + $0x30] sm:$0xff]  }
 0xfe0   : > { %4712 = vtanh.f32 %v6730_v23 }
 0xfea   : > { %v4713_v19 = vpop.eup %4712 }
 0xfeb   : > { %v3411_v25 = vmul.f32 %v4713_v19, %v4711_v1  ;;  %v3550_v1 = vld [vmem:[%s6301_s14 + $0xe8] sm:$0xff] }
 0xfed   : > { %v6734_v20 = vsel %vm3419_vm14, %v3411_v25, %v6542_v61  ;;  %v3425_v55 = vpack.c.bf16 %v3411_v25, %v3411_v25  ;;  %v4777_v61 = vld [vmem:[%s6887_s3 + $0xe8] ss:$16 sps:$4 sm:$0xff]  }
 0xfef   : > { %3459 = vmatmul.mubr.bf16.vlgmr.msra.gmra.mrb[24].mxu0 %v3425_v55  ;;  %3500 = vmatmul.mubr.bf16.vlgmr.msra.gmra.mrb[24].mxu1 %v3425_v55 }
 0xff0   : > { %3555 = vmatpush1.bf16.msra.mxu0 %v6547_v21  ;;  %3596 = vmatpush1.bf16.msra.mxu1 %v6553_v24  ;;  %v3669_v21 = vstv %s3668_s22 }
 0xff1   : > { %3556 = vmatprep.subr.bf16.mxu0 %v6559_v3  ;;  %3597 = vmatprep.subr.bf16.mxu1 %v6565_v26  ;;  %vm3670_vm15 = vcmp.eq.s32.totalorder %v6225_v17, %v3669_v21  ;;  %v3421_v3 = vld [vmem:[%s6301_s14 + $0xc0] sm:$0xff]  ;;  %v3422_v26 = vld [vmem:[%s6301_s14 + $0xc8] sm:$0xff]  ;;  %v3423_v17 = vld [vmem:[%s6301_s14 + $0xd0] sm:$0xff] }
 0xff2   : > { %3586 = vmatprep.mubr.bf16.mxu0 %v4877_v9  ;;  %3627 = vmatprep.mubr.bf16.mxu1 %v4877_v9  ;;  %v3671_v24 = vsel %vm3670_vm15, 1, %v4877_v9 }
 0xff3   : > { %3673 = vperm.xlu1 %4561, %v3671_v24  }
 0xff4   : > { %3557 = vmatpush1.bf16.msra.mxu0 %v6573_v8  ;;  %3598 = vmatpush1.bf16.msra.mxu1 %v6579_v59 }
 0xff5   : > { %3558 = vmatprep.subr.bf16.mxu0 %v6585_v13  ;;  %3599 = vmatprep.subr.bf16.mxu1 %v6591_v0 }
 0xff8   : > { %3559 = vmatpush1.bf16.msra.mxu0 %v6597_v42  ;;  %3600 = vmatpush1.bf16.msra.mxu1 %v6603_v43 }
 0xff9   : > { %3560 = vmatprep.subr.bf16.mxu0 %v6609_v45  ;;  %3601 = vmatprep.subr.bf16.mxu1 %v6615_v34 }
 0xffc   : > { %3561 = vmatpush1.bf16.msra.mxu0 %v6621_v12  ;;  %3602 = vmatpush1.bf16.msra.mxu1 %v6627_v14 }
 0xffd   : > { %3562 = vmatprep.subr.bf16.mxu0 %v6633_v15  ;;  %3603 = vmatprep.subr.bf16.mxu1 %v6639_v16 }
0x1000   : > { %3563 = vmatpush1.bf16.msra.mxu0 %v6645_v50  ;;  %3604 = vmatpush1.bf16.msra.mxu1 %v6651_v10 }
0x1001   : > { %3564 = vmatprep.subr.bf16.mxu0 %v6657_v31  ;;  %3605 = vmatprep.subr.bf16.mxu1 %v6663_v35  ;;  %v3424_v31 = vld [vmem:[%s6301_s14 + $0xd8] sm:$0xff] }
0x1004   : > { %3565 = vmatpush1.bf16.msra.mxu0 %v6669_v37  ;;  %3606 = vmatpush1.bf16.msra.mxu1 %v6675_v39 }
0x1005   : > { %3566 = vmatprep.subr.bf16.mxu0 %v6681_v30  ;;  %3607 = vmatprep.subr.bf16.mxu1 %v6687_v40 }
0x1008   : > { %3567 = vmatpush1.bf16.msra.mxu0 %v6693_v44  ;;  %3608 = vmatpush1.bf16.msra.mxu1 %v6699_v2 }
0x1009   : > { %3568 = vmatprep.subr.bf16.mxu0 %v6705_v4  ;;  %3609 = vmatprep.subr.bf16.mxu1 %v4776_v56 }
0x100c   : > { %3569 = vmatpush1.bf16.msra.mxu0 %v6712_v5  ;;  %3610 = vmatpush1.bf16.msra.mxu1 %v4777_v61 }
0x100d   : > { %4148 = vmatprep.subr.bf16.mxu0 %v4878_v22 }
0x10c2   : > { %v3460_v8 = vpop.f32.mrb[24].mxu0  ;;  %v3501_v59 = vpop.f32.mrb[24].mxu1 }
0x10c3   : > { %v3508_v13 = vadd.f32 %v3460_v8, %v3421_v3  ;;  %v3462_v0 = vpop.f32.mrb[25].mxu0  ;;  %v3503_v42 = vpop.f32.mrb[25].mxu1  ;;  %v3510_v10 = vadd.f32 %v3501_v59, %v3423_v17  ;;  %v3551_v59 = vld [vmem:[%s6301_s14 + $0xf0] sm:$0xff] }
0x10c4   : > { %v3509_v43 = vadd.f32 %v3462_v0, %v3422_v26  ;;  %v3464_v45 = vpop.f32.mrb[26].mxu0  ;;  %v3505_v34 = vpop.f32.mrb[26].mxu1  ;;  %v3511_v35 = vadd.f32 %v3503_v42, %v3424_v31 }
0x10c5   : > { %v3512_v12 = vadd.f32 %v3508_v13, %v6304_v51  ;;  %v3465_v14 = vpop.f32.mrb[27].mxu0  ;;  %v3506_v15 = vpop.f32.mrb[27].mxu1  ;;  %v3514_v37 = vadd.f32 %v3510_v10, %v6312_v27  ;;  %v3552_v45 = vld [vmem:[%s6301_s14 + $0xf8] sm:$0xff] }
0x10c6   : > { %v3513_v16 = vadd.f32 %v3509_v43, %v6307_v53  ;;  %v3515_v39 = vadd.f32 %v3511_v35, %v6316_v46 }
0x10c7   : > { %v4116_v9 = vmul.f32 -1.442695, %v3512_v12  ;;  %v4118_v30 = vmul.f32 -1.442695, %v3514_v37 }
0x10c8   : > { %v4117_v50 = vmul.f32 -1.442695, %v3513_v16 }
0x10c9   : > { %4714 = vpow2.f32 %v4116_v9 }
0x10ca   : > { %4716 = vpow2.f32 %v4117_v50 }
0x10cb   : > { %4718 = vtanh.f32 %v3515_v39 }
0x10cc   : > { %4720 = vpow2.f32 %v4118_v30  ;;  %v3674_v30 = vpop.permute.xlu1 %3673 }
0x10cd   : > { %vm3675_vm2 = vcmp.eq.s32.totalorder %v3674_v30, 1 }
0x10d3   : > { %v4715_v40 = vpop.eup %4714 }
0x10d4   : > { %v3525_v44 = vadd.f32 1.0, %v4715_v40  ;;  %v4717_v2 = vpop.eup %4716 }
0x10d5   : > { %v3526_v4 = vadd.f32 1.0, %v4717_v2  ;;  %v4719_v5 = vpop.eup %4718 }
0x10d6   : > { %4722 = vrcp.f32 %v3525_v44  ;;  %v4721_v63 = vpop.eup %4720 }
0x10d7   : > { %4724 = vrcp.f32 %v3526_v4  ;;  %v3527_v28 = vadd.f32 1.0, %v4721_v63 }
0x10d9   : > { %4726 = vrcp.f32 %v3527_v28 }
0x10e0   : > { %v4723_v48 = vpop.eup %4722 }
0x10e1   : > { %v3536_v52 = vmul.f32 %v4723_v48, %v4719_v5  ;;  %v4725_v29 = vpop.eup %4724  ;;  %v4122_v5 = vld [vmem:[%s6890_s6] ss:$0 sm:$0xff] }
0x10e2   : > { %v3535_v54 = vmul.f32 %v4725_v29, %v6730_v23  ;;  %v4617_v23 = vld [vmem:[%s6889_s5 + $0x38] sm:$0xff]  }
0x10e3   : > { %v4727_v32 = vpop.eup %4726 }
0x10e4   : > { %v6784_v49 = vadd.f32 %v3536_v52, %v3535_v54 }
0x10e6   : > { %4728 = vtanh.f32 %v6784_v49 }
0x10f0   : > { %v4729_v47 = vpop.eup %4728 }
0x10f1   : > { %v3539_v57 = vmul.f32 %v4729_v47, %v4727_v32 }
0x10f3   : > { %v6788_v58 = vsel %vm3547_vm0, %v3539_v57, %v6734_v20  ;;  %v3553_v62 = vpack.c.bf16 %v3539_v57, %v3539_v57 }
0x10f5   : > { %3587 = vmatmul.mubr.bf16.vlgmr.msra.gmra.mrb[28].mxu0 %v3553_v62  ;;  %3628 = vmatmul.mubr.bf16.vlgmr.msra.gmra.mrb[28].mxu1 %v3553_v62 }
0x10f6   : > { %4149 = vmatpush3.bf16.msra.mxu0 %v4610_v7  ;;  %4164 = vmatprep.mubr.msk.bf16.mxu0 %vm4879_vm1, %v4878_v22 }
0x10f7   : > { %4150 = vmatprep.subr.bf16.mxu0 %v4878_v22 }
0x10fa   : > { %4151 = vmatpush3.bf16.msra.mxu0 %v4611_v11 }
0x10fb   : > { %4152 = vmatprep.subr.bf16.mxu0 %v4878_v22 }
0x10fe   : > { %4153 = vmatpush3.bf16.msra.mxu0 %v4612_v38 }
0x10ff   : > { %4154 = vmatprep.subr.bf16.mxu0 %v4878_v22 }
0x1102   : > { %4155 = vmatpush3.bf16.msra.mxu0 %v4613_v36 }
0x1103   : > { %4156 = vmatprep.subr.bf16.mxu0 %v4878_v22 }
0x1106   : > { %4157 = vmatpush3.bf16.msra.mxu0 %v4614_v41 }
0x1107   : > { %4158 = vmatprep.subr.bf16.mxu0 %v4878_v22 }
0x110a   : > { %4159 = vmatpush3.bf16.msra.mxu0 %v4615_v60 }
0x110b   : > { %4160 = vmatprep.subr.bf16.mxu0 %v4878_v22 }
0x110e   : > { %4161 = vmatpush3.bf16.msra.mxu0 %v4616_v6 }
0x110f   : > { %4162 = vmatprep.subr.bf16.mxu0 %v4878_v22 }
0x1112   : > { %4163 = vmatpush3.bf16.msra.mxu0 %v4617_v23 }
0x11c8   : > { %v3588_v19 = vpop.f32.mrb[28].mxu0  ;;  %v3629_v25 = vpop.f32.mrb[28].mxu1 }
0x11c9   : > { %v3636_v20 = vadd.f32 %v3588_v19, %v3549_v18  ;;  %v3590_v55 = vpop.f32.mrb[29].mxu0  ;;  %v3631_v56 = vpop.f32.mrb[29].mxu1  ;;  %v3638_v43 = vadd.f32 %v3629_v25, %v3551_v59 }
0x11ca   : > { %v3637_v61 = vadd.f32 %v3590_v55, %v3550_v1  ;;  %v3592_v21 = vpop.f32.mrb[30].mxu0  ;;  %v3633_v24 = vpop.f32.mrb[30].mxu1  ;;  %v3639_v34 = vadd.f32 %v3631_v56, %v3552_v45 }
0x11cb   : > { %v3640_v3 = vadd.f32 %v3636_v20, %v6304_v51  ;;  %v3593_v26 = vpop.f32.mrb[31].mxu0  ;;  %v3634_v8 = vpop.f32.mrb[31].mxu1  ;;  %v3642_v12 = vadd.f32 %v3638_v43, %v6312_v27 }
0x11cc   : > { %v3641_v13 = vadd.f32 %v3637_v61, %v6307_v53  ;;  %v3643_v14 = vadd.f32 %v3639_v34, %v6316_v46 }
0x11cd   : > { %v4119_v0 = vmul.f32 -1.442695, %v3640_v3  ;;  %v4121_v15 = vmul.f32 -1.442695, %v3642_v12 }
0x11ce   : > { %v4120_v42 = vmul.f32 -1.442695, %v3641_v13 }
0x11cf   : > { %4730 = vpow2.f32 %v4119_v0 }
0x11d0   : > { %4732 = vpow2.f32 %v4120_v42 }
0x11d1   : > { %4734 = vtanh.f32 %v3643_v14 }
0x11d2   : > { %4736 = vpow2.f32 %v4121_v15 }
0x11d9   : > { %v4731_v17 = vpop.eup %4730 }
0x11da   : > { %v3653_v16 = vadd.f32 1.0, %v4731_v17  ;;  %v4733_v51 = vpop.eup %4732 }
0x11db   : > { %v3654_v9 = vadd.f32 1.0, %v4733_v51  ;;  %v4735_v53 = vpop.eup %4734 }
0x11dc   : > { %4738 = vrcp.f32 %v3653_v16  ;;  %v4737_v50 = vpop.eup %4736 }
0x11dd   : > { %4740 = vrcp.f32 %v3654_v9  ;;  %v3655_v37 = vadd.f32 1.0, %v4737_v50 }
0x11df   : > { %4742 = vrcp.f32 %v3655_v37 }
0x11e6   : > { %v4739_v10 = vpop.eup %4738 }
0x11e7   : > { %v3664_v31 = vmul.f32 %v4739_v10, %v4735_v53  ;;  %v4741_v35 = vpop.eup %4740 }
0x11e8   : > { %v3663_v39 = vmul.f32 %v4741_v35, %v6784_v49 }
0x11e9   : > { %v4743_v46 = vpop.eup %4742 }
0x11ea   : > { %v3665_v27 = vadd.f32 %v3664_v31, %v3663_v39 }
0x11ec   : > { %3678 = vst [vmem:[#allocation4] sm:$0xff] %v3665_v27  ;;  %4744 = vtanh.f32 %v3665_v27 }
0x11f6   : > { %v4745_v40 = vpop.eup %4744 }
0x11f7   : > { %v3667_v44 = vmul.f32 %v4745_v40, %v4743_v46 }
0x11f9   : > { %v3676_v2 = vsel %vm3675_vm2, %v3667_v44, %v6788_v58  ;;  %3677 = vst [vmem:[#allocation3] sm:$0xff] %v3667_v44 }
0x11fa   : > { %3679 = vst [vmem:[#allocation5] sm:$0xff] %v3676_v2  ;;  %v3681_v4 = vpack.c.bf16 %v3676_v2, %v3676_v2 }
0x11fc   : > { %4165 = vmatmul.mubr.bf16.vlgmr.msra.gmra.mrb[32].mxu0 %v3681_v4 }
0x12cf   : > { %v3787_v63 = vpop.f32.mrb[32].mxu0 }
0x12d0   : > { %v3788_v48 = vadd.f32 %v4122_v5, %v3787_v63  ;;  %v4166_v52 = vpop.f32.mrb[33].mxu0 }
0x12d1   : > { %v3790_v29 = vpop.f32.mrb[34].mxu0 }
0x12d2   : > { %3793 = vst [vmem:[%s316_s21] sm:$0xff] %v3788_v48  ;;  %v4167_v28 = vpop.f32.mrb[35].mxu0 }
0x12d3 PF: > { %s4132_s12 = sshll.u32 %s4860_s28, 7  ;;  %s3808_s11 = sshll.u32 %s316_s21, 4  ;;  %s3809_s11 = int_to_ptr.vmem [resolvable:$true] %s3808_s11 }
0x12d4   : > { %s6833_s24 = scalar_lea.hbm %s6891_s7, %s4132_s12  ;;  %s6909_s20 = sand.u32 1, %s4848_s25  }
0x12d5   : > { %s3795_s10 = scalar_lea.sflag [#allocation7], %s6909_s20  ;;  %s4778_s16 = scalar_lea.vmem %s3809_s11, 128 }
0x12d6   : > { %p4779_p8 = scmp.ne.s32.totalorder %s3809_s11, %s4778_s16  ;;  %s4880_s18 = smov [#allocation6]  }
0x12d7   : > { %s4782_s26 = sshll.u32 %s4880_s18, 4  ;;  %s4783_s26 = int_to_ptr.vmem [resolvable:$false] %s4782_s26 }
0x12d8   : > { %p4780_p10 = pnand %p4779_p8, %p4970_p3  ;;  %s4784_s17 = scalar_lea.vmem %s4783_s26, 256 }
0x12d9   : > { %p4785_p12 = scmp.lt.s32.totalorder %s3809_s11, %s4783_s26  ;;  %p4786_p13 = scmp.lt.s32.totalorder %s4784_s17, %s4778_s16 }
0x12da   : > { %p4781_p11 = pneg %p4780_p10 }
0x12db   : > { %p4787_p0 = por %p4786_p13, %p4785_p12 }
0x12dd   : > { %p4788_p1 = pnand %p4787_p0, %p4781_p11 }
0x12df   : > { %4791 = shalt.err (!%p4788_p1)
}
0x12e0   : > { %s4792_s28 = scalar_lea.hbm %s6833_s24, 128  ;;  %s4796_s23 = scalar_lea.hbm %s6891_s7, 256 }
0x12e1   : > { %p4793_p2 = scmp.ne.s32.totalorder %s6833_s24, %s4792_s28  ;;  %p4797_p6 = scmp.lt.u32.totalorder %s6833_s24, %s6891_s7 }
0x12e2   : > { %p4798_p7 = scmp.lt.u32.totalorder %s4796_s23, %s4792_s28  ;;  %p4800_p10 = scmp.lt.u32.totalorder %s4792_s28, %s6833_s24 }
0x12e3   : > { %p4794_p4 = pnand %p4793_p2, %p4970_p3 }
0x12e4   : > { %p4799_p8 = por %p4798_p7, %p4797_p6 }
0x12e5   : > { %p4795_p5 = pneg %p4794_p4 }
0x12e6   : > { %p4801_p11 = por %p4800_p10, %p4799_p8 }
0x12e8   : > { %p4802_p12 = pnand %p4801_p11, %p4795_p5 }
0x12ea   : > { %4805 = shalt.err (!%p4802_p12)
}
0x12eb   : > { %4169 = dma.vmem_to_hbm [thread:$0]  (%p4970_p3), %s3809_s11, 128, %s6833_s24, %s3795_s10  }
0x12ec PF: > { %s6910_s22 = sld [smem:[#allocation9_spill]]  ;;  %p4175_p13 = scmp.ge.s32.totalorder %s4872_s8, 2 }
0x12ee   : > { %p4172_p0 = pnand %p4175_p13, %p4980_p9 }
0x12f2   : > { %s3820_s27 = sand.u32 1, %s6910_s22  }
0x12f3   : > { %s3821_s12 = scalar_lea.sflag [#allocation7], %s3820_s27 }
0x12f4   : > { %4839 = dma.done.wait (!%p4172_p0), %s3821_s12, 128  }
0x12f5   : > { %4841 = vsyncadd (!%p4172_p0), %s3821_s12, 4294967168  ;;  %s20_s8 = sadd.s32 1, %s4872_s8   ;;  %s6912_s30 = sld [smem:[#allocation10_spill]] }
0x12f6   : > { %p17_p1 = scmp.ge.s32.totalorder %s20_s8, 10   ;;  %s6913_s26 = sld [smem:[#allocation16_spill]] }
0x12f7   : > { %s6914_s27 = sld [smem:[#allocation11_spill]]  ;;  %s6915_s28 = sld [smem:[#allocation12_spill]] }
0x12f8   : > { %s6916_s29 = sld [smem:[#allocation13_spill]]  ;;  %s6917_s13 = sld [smem:[#allocation14_spill]] }
0x12f9   : > { %s6918_s24 = smov %s4848_s25  ;;  %19 = sbr.rel (!%p17_p1) target bundleno = 5 (0x5), region = 102 }
0x12fb   : > { %s6919_s25 = smov %s6912_s30 }
0x12fe   : > { %s6920_s30 = smov %s6917_s13 }
0x1300   :  { %3826 = vsyncpa [#allocation7], 1 }
0x1301   :  { %3828 = vsyncpa [#allocation7 + $0x1], 1 }

</bundles_post_ra>
